<compile_context>
chip_gen: v7x
topology: tpu7x:2x2x1
jax: 0.10.0
libtpu: 0.0.40
codegen_flags: <defaults>
</compile_context>

<pallas_src>
import jax
import jax.numpy as jnp
from jax import lax
from jax.experimental import pallas as pl
from jax.experimental.pallas import tpu as pltpu

# ---------------- config (tiny ViT) ----------------
IMG = 16                     # spatial size
IN_CH = 3                    # channels
PATCH = 4                    # patch size -> 16 patches
EMBED = 32                   # embed dim
HEADS = 4                    # attention heads
HEAD_DIM = EMBED // HEADS    # 8
DEPTH = 2                    # transformer blocks
MLP_DIM = 4 * EMBED          # 128
NUM_CLASSES = 10
LN_EPS = 1e-6                # timm ViT uses eps=1e-6
N_PATCH = (IMG // PATCH) ** 2
TOKENS = N_PATCH + 1         # + cls token = 17

# ---------------- padded (lane/sublane friendly) sizes ----------------
D_PAD = 128                  # embed dim padded to full lane width
HEAD_PAD = D_PAD // HEADS    # 32: per-head lane band (true dim 8)
T_PAD = 24                   # tokens 17 -> 24 (multiple of 8 sublanes)
CPP = IN_CH * PATCH * PATCH  # 48 (flattened patch)
CPP_PAD = 64                 # 48 -> 64 (shrunk from 128 per feedback)
MLP_PAD = MLP_DIM            # already 128
NC_PAD = 128                 # classes padded to lane width


# ---------------- shared math helpers (pure jnp; kernel and reference) -------
def _gelu(x):
    # TODO(synk): timm uses exact (erf) GELU; tanh approximation used here.
    return 0.5 * x * (1.0 + jnp.tanh(0.7978845608028654 *
                                     (x + 0.044715 * x * x * x)))


def _layernorm(x, g, b, eps=LN_EPS):
    mu = jnp.mean(x, axis=-1, keepdims=True)
    var = jnp.mean((x - mu) ** 2, axis=-1, keepdims=True)
    return (x - mu) * jax.lax.rsqrt(var + eps) * g + b


# ---------------- fused Pallas kernel (whole forward, whole batch) -----------
def _vit_fused_kernel(patch_ref, add_ref, mask_ref, pw_ref,
                      lnp_ref, wqkv_ref, bqkv_ref, wp_ref, bp_ref,
                      w1_ref, bm1_ref, w2_ref, bm2_ref,
                      ng_ref, nb_ref, hw_ref, hb_ref, out_ref):
    f32 = jnp.float32
    bf16 = jnp.bfloat16
    inv_d = f32(1.0 / EMBED)
    scale = f32(1.0 / (HEAD_DIM ** 0.5))

    # Hoisted constants.
    lane = jax.lax.broadcasted_iota(jnp.int32, (1, D_PAD), 1)
    lane_mask = (lane < EMBED).astype(f32)              # true embed lanes (LN)
    band_masks = [((lane >= h * HEAD_PAD) & (lane < (h + 1) * HEAD_PAD)
                   ).astype(bf16) for h in range(HEADS)]
    attn_mask = mask_ref[...]                            # (BT, BT) f32 0/1

    def ln(x, g, b):
        # LayerNorm over the TRUE embed dim: padded lanes of x are zero so the
        # sums are exact; gamma/beta are zero-padded so padded lanes stay zero.
        mu = jnp.sum(x, axis=-1, keepdims=True) * inv_d
        xc = (x - mu) * lane_mask
        var = jnp.sum(xc * xc, axis=-1, keepdims=True) * inv_d
        return xc * jax.lax.rsqrt(var + LN_EPS) * g + b

    # ---- patch embedding + cls token + positional embedding (fused) ----
    # patch_ref: (B*T_PAD, CPP_PAD) with cls-slot / pad rows & lanes zeroed;
    # add_ref already folds patch bias, cls token and positional embedding.
    tok = (jnp.dot(patch_ref[...].astype(bf16), pw_ref[...],
                   preferred_element_type=f32) + add_ref[...])

    # ---- transformer blocks (weights stacked along leading DEPTH axis) ----
    def layer_body(layer, tok):
        lnp = lnp_ref[layer]                             # (4, D_PAD)
        # -- attention branch --
        h = ln(tok, lnp[0:1], lnp[1:2])
        qkv = (jnp.dot(h.astype(bf16), wqkv_ref[layer],
                       preferred_element_type=f32) + bqkv_ref[layer])
        q = (qkv[:, 0:D_PAD] * scale).astype(bf16)       # (BT, 128)
        k = qkv[:, D_PAD:2 * D_PAD].astype(bf16)
        v = qkv[:, 2 * D_PAD:3 * D_PAD].astype(bf16)
        ctx = jnp.zeros_like(tok)                        # (BT, 128) f32
        for hh in range(HEADS):                          # static 4-way unroll
            kh = k * band_masks[hh]                      # select head band
            s = lax.dot_general(q, kh, (((1,), (1,)), ((), ())),
                                preferred_element_type=f32)   # (BT, BT)
            # masked softmax (no row-max: logits are bounded at these scales)
            p = jnp.exp(s) * attn_mask
            p = p * pl.reciprocal(jnp.sum(p, axis=-1, keepdims=True),
                                  approx=True)
            ctx = ctx + jnp.dot(p.astype(bf16), v * band_masks[hh],
                                preferred_element_type=f32)
        # fused output projection: one lane-dense (BT,128)x(128,128) dot
        tok = tok + (jnp.dot(ctx.astype(bf16), wp_ref[layer],
                             preferred_element_type=f32) + bp_ref[layer])
        # -- MLP branch --
        h = ln(tok, lnp[2:3], lnp[3:4])
        h = (jnp.dot(h.astype(bf16), w1_ref[layer],
                     preferred_element_type=f32) + bm1_ref[layer])
        h = _gelu(h)
        tok = tok + (jnp.dot(h.astype(bf16), w2_ref[layer],
                             preferred_element_type=f32) + bm2_ref[layer])
        return tok

    tok = lax.fori_loop(0, DEPTH, layer_body, tok, unroll=True)

    # ---- final LayerNorm + classification head (all rows; wrapper picks cls)
    h = ln(tok, ng_ref[...], nb_ref[...])
    out_ref[...] = (jnp.dot(h.astype(bf16), hw_ref[...],
                            preferred_element_type=f32) + hb_ref[...])


# ---------------- wrappers ----------------
def extract_patches(x, P):
    # x: NCHW -> (B, N_patches, C*P*P); channel-major flattening matches the
    # flattened PyTorch conv weight (D, C, P, P).
    B, C, H, W = x.shape
    x = x.reshape(B, C, H // P, P, W // P, P)
    x = x.transpose(0, 2, 4, 1, 3, 5)
    return x.reshape(B, (H // P) * (W // P), C * P * P)


PACKED_KEYS = ("patch_w", "lnp", "wqkv", "bqkv", "wp", "bp",
               "w1", "bm1", "w2", "bm2", "norm_g", "norm_b",
               "head_w", "head_b")


def vit_forward(x, packed):
    B = x.shape[0]
    BT = B * T_PAD
    patches = extract_patches(x, PATCH)                      # (B, N, CPP)
    patches_pad = jnp.zeros((B, T_PAD, CPP_PAD), jnp.float32)
    patches_pad = patches_pad.at[:, 1:1 + N_PATCH, :CPP].set(patches)
    patches_pad = patches_pad.reshape(BT, CPP_PAD)

    # additive term (cls/pos/bias) tiled over the folded batch axis
    add_bt = jnp.tile(packed["add_term"], (B, 1))            # (BT, D_PAD)

    # hoisted attention mask: same batch block AND key token within TOKENS
    idx = jnp.arange(BT)
    same_blk = (idx[:, None] // T_PAD) == (idx[None, :] // T_PAD)
    key_ok = (idx[None, :] % T_PAD) < TOKENS
    attn_mask = (same_blk & key_ok).astype(jnp.float32)      # (BT, BT)

    weights = [packed[k] for k in PACKED_KEYS]
    vmem = pl.BlockSpec(memory_space=pltpu.MemorySpace.VMEM)

    out = pl.pallas_call(
        _vit_fused_kernel,
        out_shape=jax.ShapeDtypeStruct((BT, NC_PAD), jnp.float32),
        in_specs=[vmem] * (3 + len(weights)),
        out_specs=vmem,
    )(patches_pad, add_bt, attn_mask, *weights)

    # cls token of each batch element, true classes only
    return out.reshape(B, T_PAD, NC_PAD)[:, 0, :NUM_CLASSES]


# ---------------- parameter packing (pad + stack + bf16 for the kernel) ------
def _zpad(a, shape):
    return jnp.pad(a, [(0, s - d) for d, s in zip(a.shape, shape)])


def pack_params(p):
    bf = jnp.bfloat16
    patch_w = _zpad(p["patch_w"], (CPP_PAD, D_PAD)).astype(bf)

    # additive term: row0 = cls + pos[0]; rows 1..16 = patch_b + pos[i]; else 0
    add_term = jnp.zeros((T_PAD, D_PAD), jnp.float32)
    add_term = add_term.at[0, :EMBED].set(p["cls_token"][0, 0]
                                          + p["pos_embed"][0, 0])
    add_term = add_term.at[1:TOKENS, :EMBED].set(p["patch_b"][0]
                                                 + p["pos_embed"][0, 1:])

    lnp, wqkv, bqkv, wp, bp = [], [], [], [], []
    w1, bm1, w2, bm2 = [], [], [], []
    for blk in p["blocks"]:
        lnp.append(jnp.stack([_zpad(blk["g1"][0], (D_PAD,)),
                              _zpad(blk["b1"][0], (D_PAD,)),
                              _zpad(blk["g2"][0], (D_PAD,)),
                              _zpad(blk["b2"][0], (D_PAD,))]))
        # qkv weights -> (D_PAD, 3*HEADS*HEAD_PAD): [Q|K|V] chunks of 128 lanes,
        # each chunk split into 32-lane head bands (true dim 8, rest zero).
        w = blk["wqkv"].reshape(EMBED, 3, HEADS, HEAD_DIM)
        w = jnp.pad(w, ((0, D_PAD - EMBED), (0, 0), (0, 0),
                        (0, HEAD_PAD - HEAD_DIM)))
        wqkv.append(w.reshape(D_PAD, 3 * HEADS * HEAD_PAD).astype(bf))
        b = blk["bqkv"].reshape(1, 3, HEADS, HEAD_DIM)
        b = jnp.pad(b, ((0, 0), (0, 0), (0, 0), (0, HEAD_PAD - HEAD_DIM)))
        bqkv.append(b.reshape(1, 3 * HEADS * HEAD_PAD))
        # output projection -> (HEADS*HEAD_PAD, D_PAD) matching ctx band layout
        wpr = blk["wp"].reshape(HEADS, HEAD_DIM, EMBED)
        wpr = jnp.pad(wpr, ((0, 0), (0, HEAD_PAD - HEAD_DIM),
                            (0, D_PAD - EMBED)))
        wp.append(wpr.reshape(HEADS * HEAD_PAD, D_PAD).astype(bf))
        bp.append(_zpad(blk["bp"], (1, D_PAD)))
        w1.append(_zpad(blk["w1"], (D_PAD, MLP_PAD)).astype(bf))
        bm1.append(_zpad(blk["bm1"], (1, MLP_PAD)))
        w2.append(_zpad(blk["w2"], (MLP_PAD, D_PAD)).astype(bf))
        bm2.append(_zpad(blk["bm2"], (1, D_PAD)))

    return dict(
        add_term=add_term, patch_w=patch_w,
        lnp=jnp.stack(lnp), wqkv=jnp.stack(wqkv), bqkv=jnp.stack(bqkv),
        wp=jnp.stack(wp), bp=jnp.stack(bp),
        w1=jnp.stack(w1), bm1=jnp.stack(bm1),
        w2=jnp.stack(w2), bm2=jnp.stack(bm2),
        norm_g=_zpad(p["norm_g"], (1, D_PAD)),
        norm_b=_zpad(p["norm_b"], (1, D_PAD)),
        head_w=_zpad(p["head_w"], (D_PAD, NC_PAD)).astype(bf),
        head_b=_zpad(p["head_b"], (1, NC_PAD)),
    )


# ---------------- pure-JAX reference (for correctness check) ----------------
def ref_forward(x, params):
    B = x.shape[0]
    patches = extract_patches(x, PATCH)
    emb = patches @ params["patch_w"] + params["patch_b"][0]
    cls = jnp.broadcast_to(params["cls_token"], (B, 1, EMBED))
    tok = jnp.concatenate([cls, emb], axis=1) + params["pos_embed"]
    hd = EMBED // HEADS
    for bp in params["blocks"]:
        h = _layernorm(tok, bp["g1"][0], bp["b1"][0])
        qkv = h @ bp["wqkv"] + bp["bqkv"][0]
        q, k, v = jnp.split(qkv, 3, axis=-1)
        sh = lambda t: t.reshape(B, -1, HEADS, hd).transpose(0, 2, 1, 3)
        q, k, v = sh(q), sh(k), sh(v)
        s = jnp.einsum("bhqd,bhkd->bhqk", q, k) / (hd ** 0.5)
        a = jax.nn.softmax(s, axis=-1)
        o = jnp.einsum("bhqk,bhkd->bhqd", a, v).transpose(0, 2, 1, 3)
        o = o.reshape(B, -1, EMBED)
        tok = tok + o @ bp["wp"] + bp["bp"][0]
        h = _layernorm(tok, bp["g2"][0], bp["b2"][0])
        h = _gelu(h @ bp["w1"] + bp["bm1"][0])
        tok = tok + h @ bp["w2"] + bp["bm2"][0]
    cls_out = _layernorm(tok[:, 0], params["norm_g"][0], params["norm_b"][0])
    return cls_out @ params["head_w"] + params["head_b"][0]


# ---------------- deterministic parameter init ----------------
def init_params(key):
    kit = iter(jax.random.split(key, 64))

    def nrm(shape, s=0.02):
        return (s * jax.random.normal(next(kit), shape)).astype(jnp.float32)

    cpp = IN_CH * PATCH * PATCH
    params = dict(
        patch_w=nrm((cpp, EMBED)),
        patch_b=jnp.zeros((1, EMBED), jnp.float32),
        cls_token=nrm((1, 1, EMBED)),
        pos_embed=nrm((1, TOKENS, EMBED)),
        norm_g=jnp.ones((1, EMBED), jnp.float32),
        norm_b=jnp.zeros((1, EMBED), jnp.float32),
        head_w=nrm((EMBED, NUM_CLASSES)),
        head_b=jnp.zeros((1, NUM_CLASSES), jnp.float32),
        blocks=[],
    )
    for _ in range(DEPTH):
        params["blocks"].append(dict(
            g1=jnp.ones((1, EMBED), jnp.float32),
            b1=jnp.zeros((1, EMBED), jnp.float32),
            wqkv=nrm((EMBED, 3 * EMBED)),
            bqkv=jnp.zeros((1, 3 * EMBED), jnp.float32),
            wp=nrm((EMBED, EMBED)),
            bp=jnp.zeros((1, EMBED), jnp.float32),
            g2=jnp.ones((1, EMBED), jnp.float32),
            b2=jnp.zeros((1, EMBED), jnp.float32),
            w1=nrm((EMBED, MLP_DIM)),
            bm1=jnp.zeros((1, MLP_DIM), jnp.float32),
            w2=nrm((MLP_DIM, EMBED)),
            bm2=jnp.zeros((1, EMBED), jnp.float32),
        ))
    return params


if __name__ == "__main__":
    key = jax.random.PRNGKey(0)
    k_x, k_p = jax.random.split(key)
    x = jax.random.normal(k_x, (2, IN_CH, IMG, IMG), dtype=jnp.float32)  # NCHW
    params = init_params(k_p)
    packed = pack_params(params)

    fwd = jax.jit(vit_forward)
    out = jax.block_until_ready(fwd(x, packed))          # (2, NUM_CLASSES)
    ref = jax.block_until_ready(ref_forward(x, params))

    assert out.shape == (2, NUM_CLASSES)
    # bf16 weights/operands in the kernel vs f32 reference -> slightly looser
    # tolerance; real layout/mask bugs would produce O(1) errors.
    assert jnp.allclose(out, ref, rtol=3e-2, atol=5e-3), "mismatch vs reference"
    print("KERNEL_OK")
</pallas_src>

<mosaic_0001>
module attributes {stable_mosaic.version = 11 : i64} {
  func.func @_vit_fused_kernel(%arg0: memref<48x64xf32, #tpu.memory_space<vmem>>, %arg1: memref<48x128xf32, #tpu.memory_space<vmem>>, %arg2: memref<48x48xf32, #tpu.memory_space<vmem>>, %arg3: memref<64x128xbf16, #tpu.memory_space<vmem>>, %arg4: memref<2x4x128xf32, #tpu.memory_space<vmem>>, %arg5: memref<2x128x384xbf16, #tpu.memory_space<vmem>>, %arg6: memref<2x1x384xf32, #tpu.memory_space<vmem>>, %arg7: memref<2x128x128xbf16, #tpu.memory_space<vmem>>, %arg8: memref<2x1x128xf32, #tpu.memory_space<vmem>>, %arg9: memref<2x128x128xbf16, #tpu.memory_space<vmem>>, %arg10: memref<2x1x128xf32, #tpu.memory_space<vmem>>, %arg11: memref<2x128x128xbf16, #tpu.memory_space<vmem>>, %arg12: memref<2x1x128xf32, #tpu.memory_space<vmem>>, %arg13: memref<1x128xf32, #tpu.memory_space<vmem>>, %arg14: memref<1x128xf32, #tpu.memory_space<vmem>>, %arg15: memref<128x128xbf16, #tpu.memory_space<vmem>>, %arg16: memref<1x128xf32, #tpu.memory_space<vmem>>, %arg17: memref<48x128xf32, #tpu.memory_space<vmem>>) attributes {dimension_semantics = [], scalar_prefetch = 0 : i64, scratch_operands = 0 : i64, tpu.core_type = #tpu.core_type<tc>} {
    %0 = tpu.iota {dimensions = array<i32: 1>} : vector<1x128xi32>
    %c32_i32 = arith.constant 32 : i32
    %1 = vector.broadcast %c32_i32 : i32 to vector<1x128xi32>
    %2 = arith.cmpi slt, %0, %1 : vector<1x128xi32>
    %3 = arith.extui %2 : vector<1x128xi1> to vector<1x128xi32>
    %4 = arith.sitofp %3 : vector<1x128xi32> to vector<1x128xf32>
    %c0_i32 = arith.constant 0 : i32
    %5 = vector.broadcast %c0_i32 : i32 to vector<1x128xi32>
    %6 = arith.cmpi sge, %0, %5 : vector<1x128xi32>
    %c32_i32_0 = arith.constant 32 : i32
    %7 = vector.broadcast %c32_i32_0 : i32 to vector<1x128xi32>
    %8 = arith.cmpi slt, %0, %7 : vector<1x128xi32>
    %9 = arith.andi %6, %8 : vector<1x128xi1>
    %10 = arith.extui %9 : vector<1x128xi1> to vector<1x128xi32>
    %11 = arith.sitofp %10 : vector<1x128xi32> to vector<1x128xf32>
    %12 = arith.truncf %11 : vector<1x128xf32> to vector<1x128xbf16>
    %c32_i32_1 = arith.constant 32 : i32
    %13 = vector.broadcast %c32_i32_1 : i32 to vector<1x128xi32>
    %14 = arith.cmpi sge, %0, %13 : vector<1x128xi32>
    %c64_i32 = arith.constant 64 : i32
    %15 = vector.broadcast %c64_i32 : i32 to vector<1x128xi32>
    %16 = arith.cmpi slt, %0, %15 : vector<1x128xi32>
    %17 = arith.andi %14, %16 : vector<1x128xi1>
    %18 = arith.extui %17 : vector<1x128xi1> to vector<1x128xi32>
    %19 = arith.sitofp %18 : vector<1x128xi32> to vector<1x128xf32>
    %20 = arith.truncf %19 : vector<1x128xf32> to vector<1x128xbf16>
    %c64_i32_2 = arith.constant 64 : i32
    %21 = vector.broadcast %c64_i32_2 : i32 to vector<1x128xi32>
    %22 = arith.cmpi sge, %0, %21 : vector<1x128xi32>
    %c96_i32 = arith.constant 96 : i32
    %23 = vector.broadcast %c96_i32 : i32 to vector<1x128xi32>
    %24 = arith.cmpi slt, %0, %23 : vector<1x128xi32>
    %25 = arith.andi %22, %24 : vector<1x128xi1>
    %26 = arith.extui %25 : vector<1x128xi1> to vector<1x128xi32>
    %27 = arith.sitofp %26 : vector<1x128xi32> to vector<1x128xf32>
    %28 = arith.truncf %27 : vector<1x128xf32> to vector<1x128xbf16>
    %c96_i32_3 = arith.constant 96 : i32
    %29 = vector.broadcast %c96_i32_3 : i32 to vector<1x128xi32>
    %30 = arith.cmpi sge, %0, %29 : vector<1x128xi32>
    %c128_i32 = arith.constant 128 : i32
    %31 = vector.broadcast %c128_i32 : i32 to vector<1x128xi32>
    %32 = arith.cmpi slt, %0, %31 : vector<1x128xi32>
    %33 = arith.andi %30, %32 : vector<1x128xi1>
    %34 = arith.extui %33 : vector<1x128xi1> to vector<1x128xi32>
    %35 = arith.sitofp %34 : vector<1x128xi32> to vector<1x128xf32>
    %36 = arith.truncf %35 : vector<1x128xf32> to vector<1x128xbf16>
    %c0 = arith.constant 0 : index
    %c0_4 = arith.constant 0 : index
    %37 = vector.load %arg2[%c0, %c0_4] : memref<48x48xf32, #tpu.memory_space<vmem>>, vector<48x48xf32>
    %c0_5 = arith.constant 0 : index
    %c0_6 = arith.constant 0 : index
    %38 = vector.load %arg0[%c0_5, %c0_6] : memref<48x64xf32, #tpu.memory_space<vmem>>, vector<48x64xf32>
    %39 = arith.truncf %38 : vector<48x64xf32> to vector<48x64xbf16>
    %c0_7 = arith.constant 0 : index
    %c0_8 = arith.constant 0 : index
    %40 = vector.load %arg3[%c0_7, %c0_8] : memref<64x128xbf16, #tpu.memory_space<vmem>>, vector<64x128xbf16>
    %cst = arith.constant dense<0.000000e+00> : vector<48x128xf32>
    %41 = tpu.matmul %39, %40, %cst {dimension_numbers = #tpu.dot_dimension_numbers<[1], [0], [0], [1], [0, 0, 1, 1], [], []>} : vector<48x64xbf16>, vector<64x128xbf16>, vector<48x128xf32> -> vector<48x128xf32>
    %c0_9 = arith.constant 0 : index
    %c0_10 = arith.constant 0 : index
    %42 = vector.load %arg1[%c0_9, %c0_10] : memref<48x128xf32, #tpu.memory_space<vmem>>, vector<48x128xf32>
    %43 = arith.addf %41, %42 : vector<48x128xf32>
    %cst_11 = arith.constant 3.125000e-02 : f32
    %cst_12 = arith.constant 0.353553385 : f32
    %c0_i32_13 = arith.constant 0 : i32
    %44 = arith.index_cast %c0_i32_13 : i32 to index
    %c0_14 = arith.constant 0 : index
    %c0_15 = arith.constant 0 : index
    %45 = vector.load %arg4[%44, %c0_14, %c0_15] : memref<2x4x128xf32, #tpu.memory_space<vmem>>, vector<1x4x128xf32>
    %46 = vector.shape_cast %45 : vector<1x4x128xf32> to vector<4x128xf32>
    %47 = vector.extract_strided_slice %46 {offsets = [0, 0], sizes = [1, 128], strides = [1, 1]} : vector<4x128xf32> to vector<1x128xf32>
    %48 = vector.extract_strided_slice %46 {offsets = [1, 0], sizes = [1, 128], strides = [1, 1]} : vector<4x128xf32> to vector<1x128xf32>
    %cst_16 = arith.constant dense<0.000000e+00> : vector<48xf32>
    %49 = vector.multi_reduction <add>, %43, %cst_16 [1] : vector<48x128xf32> to vector<48xf32>
    %50 = vector.shape_cast %49 : vector<48xf32> to vector<48x1xf32>
    %51 = vector.broadcast %cst_11 : f32 to vector<48x1xf32>
    %52 = arith.mulf %50, %51 : vector<48x1xf32>
    %53 = vector.broadcast %52 : vector<48x1xf32> to vector<48x128xf32>
    %54 = arith.subf %43, %53 : vector<48x128xf32>
    %55 = vector.broadcast %4 : vector<1x128xf32> to vector<48x128xf32>
    %56 = arith.mulf %54, %55 : vector<48x128xf32>
    %57 = arith.mulf %56, %56 : vector<48x128xf32>
    %cst_17 = arith.constant dense<0.000000e+00> : vector<48xf32>
    %58 = vector.multi_reduction <add>, %57, %cst_17 [1] : vector<48x128xf32> to vector<48xf32>
    %59 = vector.shape_cast %58 : vector<48xf32> to vector<48x1xf32>
    %60 = vector.broadcast %cst_11 : f32 to vector<48x1xf32>
    %61 = arith.mulf %59, %60 : vector<48x1xf32>
    %cst_18 = arith.constant 9.99999997E-7 : f32
    %62 = vector.broadcast %cst_18 : f32 to vector<48x1xf32>
    %63 = arith.addf %61, %62 : vector<48x1xf32>
    %64 = math.rsqrt %63 : vector<48x1xf32>
    %65 = vector.broadcast %64 : vector<48x1xf32> to vector<48x128xf32>
    %66 = arith.mulf %56, %65 : vector<48x128xf32>
    %67 = vector.broadcast %47 : vector<1x128xf32> to vector<48x128xf32>
    %68 = arith.mulf %66, %67 : vector<48x128xf32>
    %69 = vector.broadcast %48 : vector<1x128xf32> to vector<48x128xf32>
    %70 = arith.addf %68, %69 : vector<48x128xf32>
    %71 = arith.truncf %70 : vector<48x128xf32> to vector<48x128xbf16>
    %72 = arith.index_cast %c0_i32_13 : i32 to index
    %c0_19 = arith.constant 0 : index
    %c0_20 = arith.constant 0 : index
    %73 = vector.load %arg5[%72, %c0_19, %c0_20] : memref<2x128x384xbf16, #tpu.memory_space<vmem>>, vector<1x128x384xbf16>
    %74 = vector.shape_cast %73 : vector<1x128x384xbf16> to vector<128x384xbf16>
    %cst_21 = arith.constant dense<0.000000e+00> : vector<48x384xf32>
    %75 = tpu.matmul %71, %74, %cst_21 {dimension_numbers = #tpu.dot_dimension_numbers<[1], [0], [0], [1], [0, 0, 1, 1], [], []>} : vector<48x128xbf16>, vector<128x384xbf16>, vector<48x384xf32> -> vector<48x384xf32>
    %76 = arith.index_cast %c0_i32_13 : i32 to index
    %c0_22 = arith.constant 0 : index
    %c0_23 = arith.constant 0 : index
    %77 = vector.load %arg6[%76, %c0_22, %c0_23] : memref<2x1x384xf32, #tpu.memory_space<vmem>>, vector<1x1x384xf32>
    %78 = vector.shape_cast %77 : vector<1x1x384xf32> to vector<1x384xf32>
    %79 = vector.broadcast %78 : vector<1x384xf32> to vector<48x384xf32>
    %80 = arith.addf %75, %79 : vector<48x384xf32>
    %81 = vector.extract_strided_slice %80 {offsets = [0, 0], sizes = [48, 128], strides = [1, 1]} : vector<48x384xf32> to vector<48x128xf32>
    %82 = vector.broadcast %cst_12 : f32 to vector<48x128xf32>
    %83 = arith.mulf %81, %82 : vector<48x128xf32>
    %84 = arith.truncf %83 : vector<48x128xf32> to vector<48x128xbf16>
    %85 = vector.extract_strided_slice %80 {offsets = [0, 128], sizes = [48, 128], strides = [1, 1]} : vector<48x384xf32> to vector<48x128xf32>
    %86 = arith.truncf %85 : vector<48x128xf32> to vector<48x128xbf16>
    %87 = vector.extract_strided_slice %80 {offsets = [0, 256], sizes = [48, 128], strides = [1, 1]} : vector<48x384xf32> to vector<48x128xf32>
    %88 = arith.truncf %87 : vector<48x128xf32> to vector<48x128xbf16>
    %cst_24 = arith.constant 0.000000e+00 : f32
    %89 = vector.broadcast %cst_24 : f32 to vector<48x128xf32>
    %90 = vector.broadcast %12 : vector<1x128xbf16> to vector<48x128xbf16>
    %91 = arith.mulf %86, %90 : vector<48x128xbf16>
    %cst_25 = arith.constant dense<0.000000e+00> : vector<48x48xf32>
    %92 = tpu.matmul %84, %91, %cst_25 {dimension_numbers = #tpu.dot_dimension_numbers<[1], [1], [0], [0], [0, 0, 1, 0], [], []>} : vector<48x128xbf16>, vector<48x128xbf16>, vector<48x48xf32> -> vector<48x48xf32>
    %93 = math.exp %92 : vector<48x48xf32>
    %94 = arith.mulf %93, %37 : vector<48x48xf32>
    %cst_26 = arith.constant dense<0.000000e+00> : vector<48xf32>
    %95 = vector.multi_reduction <add>, %94, %cst_26 [1] : vector<48x48xf32> to vector<48xf32>
    %96 = vector.shape_cast %95 : vector<48xf32> to vector<48x1xf32>
    %97 = tpu.reciprocal %96 {approx = true} : vector<48x1xf32> -> vector<48x1xf32>
    %98 = vector.broadcast %97 : vector<48x1xf32> to vector<48x48xf32>
    %99 = arith.mulf %94, %98 : vector<48x48xf32>
    %100 = arith.truncf %99 : vector<48x48xf32> to vector<48x48xbf16>
    %101 = vector.broadcast %12 : vector<1x128xbf16> to vector<48x128xbf16>
    %102 = arith.mulf %88, %101 : vector<48x128xbf16>
    %cst_27 = arith.constant dense<0.000000e+00> : vector<48x128xf32>
    %103 = tpu.matmul %100, %102, %cst_27 {dimension_numbers = #tpu.dot_dimension_numbers<[1], [0], [0], [1], [0, 0, 1, 1], [], []>} : vector<48x48xbf16>, vector<48x128xbf16>, vector<48x128xf32> -> vector<48x128xf32>
    %104 = arith.addf %89, %103 : vector<48x128xf32>
    %105 = vector.broadcast %20 : vector<1x128xbf16> to vector<48x128xbf16>
    %106 = arith.mulf %86, %105 : vector<48x128xbf16>
    %cst_28 = arith.constant dense<0.000000e+00> : vector<48x48xf32>
    %107 = tpu.matmul %84, %106, %cst_28 {dimension_numbers = #tpu.dot_dimension_numbers<[1], [1], [0], [0], [0, 0, 1, 0], [], []>} : vector<48x128xbf16>, vector<48x128xbf16>, vector<48x48xf32> -> vector<48x48xf32>
    %108 = math.exp %107 : vector<48x48xf32>
    %109 = arith.mulf %108, %37 : vector<48x48xf32>
    %cst_29 = arith.constant dense<0.000000e+00> : vector<48xf32>
    %110 = vector.multi_reduction <add>, %109, %cst_29 [1] : vector<48x48xf32> to vector<48xf32>
    %111 = vector.shape_cast %110 : vector<48xf32> to vector<48x1xf32>
    %112 = tpu.reciprocal %111 {approx = true} : vector<48x1xf32> -> vector<48x1xf32>
    %113 = vector.broadcast %112 : vector<48x1xf32> to vector<48x48xf32>
    %114 = arith.mulf %109, %113 : vector<48x48xf32>
    %115 = arith.truncf %114 : vector<48x48xf32> to vector<48x48xbf16>
    %116 = vector.broadcast %20 : vector<1x128xbf16> to vector<48x128xbf16>
    %117 = arith.mulf %88, %116 : vector<48x128xbf16>
    %cst_30 = arith.constant dense<0.000000e+00> : vector<48x128xf32>
    %118 = tpu.matmul %115, %117, %cst_30 {dimension_numbers = #tpu.dot_dimension_numbers<[1], [0], [0], [1], [0, 0, 1, 1], [], []>} : vector<48x48xbf16>, vector<48x128xbf16>, vector<48x128xf32> -> vector<48x128xf32>
    %119 = arith.addf %104, %118 : vector<48x128xf32>
    %120 = vector.broadcast %28 : vector<1x128xbf16> to vector<48x128xbf16>
    %121 = arith.mulf %86, %120 : vector<48x128xbf16>
    %cst_31 = arith.constant dense<0.000000e+00> : vector<48x48xf32>
    %122 = tpu.matmul %84, %121, %cst_31 {dimension_numbers = #tpu.dot_dimension_numbers<[1], [1], [0], [0], [0, 0, 1, 0], [], []>} : vector<48x128xbf16>, vector<48x128xbf16>, vector<48x48xf32> -> vector<48x48xf32>
    %123 = math.exp %122 : vector<48x48xf32>
    %124 = arith.mulf %123, %37 : vector<48x48xf32>
    %cst_32 = arith.constant dense<0.000000e+00> : vector<48xf32>
    %125 = vector.multi_reduction <add>, %124, %cst_32 [1] : vector<48x48xf32> to vector<48xf32>
    %126 = vector.shape_cast %125 : vector<48xf32> to vector<48x1xf32>
    %127 = tpu.reciprocal %126 {approx = true} : vector<48x1xf32> -> vector<48x1xf32>
    %128 = vector.broadcast %127 : vector<48x1xf32> to vector<48x48xf32>
    %129 = arith.mulf %124, %128 : vector<48x48xf32>
    %130 = arith.truncf %129 : vector<48x48xf32> to vector<48x48xbf16>
    %131 = vector.broadcast %28 : vector<1x128xbf16> to vector<48x128xbf16>
    %132 = arith.mulf %88, %131 : vector<48x128xbf16>
    %cst_33 = arith.constant dense<0.000000e+00> : vector<48x128xf32>
    %133 = tpu.matmul %130, %132, %cst_33 {dimension_numbers = #tpu.dot_dimension_numbers<[1], [0], [0], [1], [0, 0, 1, 1], [], []>} : vector<48x48xbf16>, vector<48x128xbf16>, vector<48x128xf32> -> vector<48x128xf32>
    %134 = arith.addf %119, %133 : vector<48x128xf32>
    %135 = vector.broadcast %36 : vector<1x128xbf16> to vector<48x128xbf16>
    %136 = arith.mulf %86, %135 : vector<48x128xbf16>
    %cst_34 = arith.constant dense<0.000000e+00> : vector<48x48xf32>
    %137 = tpu.matmul %84, %136, %cst_34 {dimension_numbers = #tpu.dot_dimension_numbers<[1], [1], [0], [0], [0, 0, 1, 0], [], []>} : vector<48x128xbf16>, vector<48x128xbf16>, vector<48x48xf32> -> vector<48x48xf32>
    %138 = math.exp %137 : vector<48x48xf32>
    %139 = arith.mulf %138, %37 : vector<48x48xf32>
    %cst_35 = arith.constant dense<0.000000e+00> : vector<48xf32>
    %140 = vector.multi_reduction <add>, %139, %cst_35 [1] : vector<48x48xf32> to vector<48xf32>
    %141 = vector.shape_cast %140 : vector<48xf32> to vector<48x1xf32>
    %142 = tpu.reciprocal %141 {approx = true} : vector<48x1xf32> -> vector<48x1xf32>
    %143 = vector.broadcast %142 : vector<48x1xf32> to vector<48x48xf32>
    %144 = arith.mulf %139, %143 : vector<48x48xf32>
    %145 = arith.truncf %144 : vector<48x48xf32> to vector<48x48xbf16>
    %146 = vector.broadcast %36 : vector<1x128xbf16> to vector<48x128xbf16>
    %147 = arith.mulf %88, %146 : vector<48x128xbf16>
    %cst_36 = arith.constant dense<0.000000e+00> : vector<48x128xf32>
    %148 = tpu.matmul %145, %147, %cst_36 {dimension_numbers = #tpu.dot_dimension_numbers<[1], [0], [0], [1], [0, 0, 1, 1], [], []>} : vector<48x48xbf16>, vector<48x128xbf16>, vector<48x128xf32> -> vector<48x128xf32>
    %149 = arith.addf %134, %148 : vector<48x128xf32>
    %150 = arith.truncf %149 : vector<48x128xf32> to vector<48x128xbf16>
    %151 = arith.index_cast %c0_i32_13 : i32 to index
    %c0_37 = arith.constant 0 : index
    %c0_38 = arith.constant 0 : index
    %152 = vector.load %arg7[%151, %c0_37, %c0_38] : memref<2x128x128xbf16, #tpu.memory_space<vmem>>, vector<1x128x128xbf16>
    %153 = vector.shape_cast %152 : vector<1x128x128xbf16> to vector<128x128xbf16>
    %cst_39 = arith.constant dense<0.000000e+00> : vector<48x128xf32>
    %154 = tpu.matmul %150, %153, %cst_39 {dimension_numbers = #tpu.dot_dimension_numbers<[1], [0], [0], [1], [0, 0, 1, 1], [], []>} : vector<48x128xbf16>, vector<128x128xbf16>, vector<48x128xf32> -> vector<48x128xf32>
    %155 = arith.index_cast %c0_i32_13 : i32 to index
    %c0_40 = arith.constant 0 : index
    %c0_41 = arith.constant 0 : index
    %156 = vector.load %arg8[%155, %c0_40, %c0_41] : memref<2x1x128xf32, #tpu.memory_space<vmem>>, vector<1x1x128xf32>
    %157 = vector.shape_cast %156 : vector<1x1x128xf32> to vector<1x128xf32>
    %158 = vector.broadcast %157 : vector<1x128xf32> to vector<48x128xf32>
    %159 = arith.addf %154, %158 : vector<48x128xf32>
    %160 = arith.addf %43, %159 : vector<48x128xf32>
    %161 = vector.extract_strided_slice %46 {offsets = [2, 0], sizes = [1, 128], strides = [1, 1]} : vector<4x128xf32> to vector<1x128xf32>
    %162 = vector.extract_strided_slice %46 {offsets = [3, 0], sizes = [1, 128], strides = [1, 1]} : vector<4x128xf32> to vector<1x128xf32>
    %cst_42 = arith.constant dense<0.000000e+00> : vector<48xf32>
    %163 = vector.multi_reduction <add>, %160, %cst_42 [1] : vector<48x128xf32> to vector<48xf32>
    %164 = vector.shape_cast %163 : vector<48xf32> to vector<48x1xf32>
    %165 = vector.broadcast %cst_11 : f32 to vector<48x1xf32>
    %166 = arith.mulf %164, %165 : vector<48x1xf32>
    %167 = vector.broadcast %166 : vector<48x1xf32> to vector<48x128xf32>
    %168 = arith.subf %160, %167 : vector<48x128xf32>
    %169 = vector.broadcast %4 : vector<1x128xf32> to vector<48x128xf32>
    %170 = arith.mulf %168, %169 : vector<48x128xf32>
    %171 = arith.mulf %170, %170 : vector<48x128xf32>
    %cst_43 = arith.constant dense<0.000000e+00> : vector<48xf32>
    %172 = vector.multi_reduction <add>, %171, %cst_43 [1] : vector<48x128xf32> to vector<48xf32>
    %173 = vector.shape_cast %172 : vector<48xf32> to vector<48x1xf32>
    %174 = vector.broadcast %cst_11 : f32 to vector<48x1xf32>
    %175 = arith.mulf %173, %174 : vector<48x1xf32>
    %cst_44 = arith.constant 9.99999997E-7 : f32
    %176 = vector.broadcast %cst_44 : f32 to vector<48x1xf32>
    %177 = arith.addf %175, %176 : vector<48x1xf32>
    %178 = math.rsqrt %177 : vector<48x1xf32>
    %179 = vector.broadcast %178 : vector<48x1xf32> to vector<48x128xf32>
    %180 = arith.mulf %170, %179 : vector<48x128xf32>
    %181 = vector.broadcast %161 : vector<1x128xf32> to vector<48x128xf32>
    %182 = arith.mulf %180, %181 : vector<48x128xf32>
    %183 = vector.broadcast %162 : vector<1x128xf32> to vector<48x128xf32>
    %184 = arith.addf %182, %183 : vector<48x128xf32>
    %185 = arith.truncf %184 : vector<48x128xf32> to vector<48x128xbf16>
    %186 = arith.index_cast %c0_i32_13 : i32 to index
    %c0_45 = arith.constant 0 : index
    %c0_46 = arith.constant 0 : index
    %187 = vector.load %arg9[%186, %c0_45, %c0_46] : memref<2x128x128xbf16, #tpu.memory_space<vmem>>, vector<1x128x128xbf16>
    %188 = vector.shape_cast %187 : vector<1x128x128xbf16> to vector<128x128xbf16>
    %cst_47 = arith.constant dense<0.000000e+00> : vector<48x128xf32>
    %189 = tpu.matmul %185, %188, %cst_47 {dimension_numbers = #tpu.dot_dimension_numbers<[1], [0], [0], [1], [0, 0, 1, 1], [], []>} : vector<48x128xbf16>, vector<128x128xbf16>, vector<48x128xf32> -> vector<48x128xf32>
    %190 = arith.index_cast %c0_i32_13 : i32 to index
    %c0_48 = arith.constant 0 : index
    %c0_49 = arith.constant 0 : index
    %191 = vector.load %arg10[%190, %c0_48, %c0_49] : memref<2x1x128xf32, #tpu.memory_space<vmem>>, vector<1x1x128xf32>
    %192 = vector.shape_cast %191 : vector<1x1x128xf32> to vector<1x128xf32>
    %193 = vector.broadcast %192 : vector<1x128xf32> to vector<48x128xf32>
    %194 = arith.addf %189, %193 : vector<48x128xf32>
    %cst_50 = arith.constant 5.000000e-01 : f32
    %195 = vector.broadcast %cst_50 : f32 to vector<48x128xf32>
    %196 = arith.mulf %195, %194 : vector<48x128xf32>
    %cst_51 = arith.constant 4.471500e-02 : f32
    %197 = vector.broadcast %cst_51 : f32 to vector<48x128xf32>
    %198 = arith.mulf %197, %194 : vector<48x128xf32>
    %199 = arith.mulf %198, %194 : vector<48x128xf32>
    %200 = arith.mulf %199, %194 : vector<48x128xf32>
    %201 = arith.addf %194, %200 : vector<48x128xf32>
    %cst_52 = arith.constant 0.797884583 : f32
    %202 = vector.broadcast %cst_52 : f32 to vector<48x128xf32>
    %203 = arith.mulf %202, %201 : vector<48x128xf32>
    %204 = math.tanh %203 : vector<48x128xf32>
    %cst_53 = arith.constant 1.000000e+00 : f32
    %205 = vector.broadcast %cst_53 : f32 to vector<48x128xf32>
    %206 = arith.addf %205, %204 : vector<48x128xf32>
    %207 = arith.mulf %196, %206 : vector<48x128xf32>
    %208 = arith.truncf %207 : vector<48x128xf32> to vector<48x128xbf16>
    %209 = arith.index_cast %c0_i32_13 : i32 to index
    %c0_54 = arith.constant 0 : index
    %c0_55 = arith.constant 0 : index
    %210 = vector.load %arg11[%209, %c0_54, %c0_55] : memref<2x128x128xbf16, #tpu.memory_space<vmem>>, vector<1x128x128xbf16>
    %211 = vector.shape_cast %210 : vector<1x128x128xbf16> to vector<128x128xbf16>
    %cst_56 = arith.constant dense<0.000000e+00> : vector<48x128xf32>
    %212 = tpu.matmul %208, %211, %cst_56 {dimension_numbers = #tpu.dot_dimension_numbers<[1], [0], [0], [1], [0, 0, 1, 1], [], []>} : vector<48x128xbf16>, vector<128x128xbf16>, vector<48x128xf32> -> vector<48x128xf32>
    %213 = arith.index_cast %c0_i32_13 : i32 to index
    %c0_57 = arith.constant 0 : index
    %c0_58 = arith.constant 0 : index
    %214 = vector.load %arg12[%213, %c0_57, %c0_58] : memref<2x1x128xf32, #tpu.memory_space<vmem>>, vector<1x1x128xf32>
    %215 = vector.shape_cast %214 : vector<1x1x128xf32> to vector<1x128xf32>
    %216 = vector.broadcast %215 : vector<1x128xf32> to vector<48x128xf32>
    %217 = arith.addf %212, %216 : vector<48x128xf32>
    %218 = arith.addf %160, %217 : vector<48x128xf32>
    %c1_i32 = arith.constant 1 : i32
    %219 = arith.index_cast %c1_i32 : i32 to index
    %c0_59 = arith.constant 0 : index
    %c0_60 = arith.constant 0 : index
    %220 = vector.load %arg4[%219, %c0_59, %c0_60] : memref<2x4x128xf32, #tpu.memory_space<vmem>>, vector<1x4x128xf32>
    %221 = vector.shape_cast %220 : vector<1x4x128xf32> to vector<4x128xf32>
    %222 = vector.extract_strided_slice %221 {offsets = [0, 0], sizes = [1, 128], strides = [1, 1]} : vector<4x128xf32> to vector<1x128xf32>
    %223 = vector.extract_strided_slice %221 {offsets = [1, 0], sizes = [1, 128], strides = [1, 1]} : vector<4x128xf32> to vector<1x128xf32>
    %cst_61 = arith.constant dense<0.000000e+00> : vector<48xf32>
    %224 = vector.multi_reduction <add>, %218, %cst_61 [1] : vector<48x128xf32> to vector<48xf32>
    %225 = vector.shape_cast %224 : vector<48xf32> to vector<48x1xf32>
    %226 = vector.broadcast %cst_11 : f32 to vector<48x1xf32>
    %227 = arith.mulf %225, %226 : vector<48x1xf32>
    %228 = vector.broadcast %227 : vector<48x1xf32> to vector<48x128xf32>
    %229 = arith.subf %218, %228 : vector<48x128xf32>
    %230 = vector.broadcast %4 : vector<1x128xf32> to vector<48x128xf32>
    %231 = arith.mulf %229, %230 : vector<48x128xf32>
    %232 = arith.mulf %231, %231 : vector<48x128xf32>
    %cst_62 = arith.constant dense<0.000000e+00> : vector<48xf32>
    %233 = vector.multi_reduction <add>, %232, %cst_62 [1] : vector<48x128xf32> to vector<48xf32>
    %234 = vector.shape_cast %233 : vector<48xf32> to vector<48x1xf32>
    %235 = vector.broadcast %cst_11 : f32 to vector<48x1xf32>
    %236 = arith.mulf %234, %235 : vector<48x1xf32>
    %cst_63 = arith.constant 9.99999997E-7 : f32
    %237 = vector.broadcast %cst_63 : f32 to vector<48x1xf32>
    %238 = arith.addf %236, %237 : vector<48x1xf32>
    %239 = math.rsqrt %238 : vector<48x1xf32>
    %240 = vector.broadcast %239 : vector<48x1xf32> to vector<48x128xf32>
    %241 = arith.mulf %231, %240 : vector<48x128xf32>
    %242 = vector.broadcast %222 : vector<1x128xf32> to vector<48x128xf32>
    %243 = arith.mulf %241, %242 : vector<48x128xf32>
    %244 = vector.broadcast %223 : vector<1x128xf32> to vector<48x128xf32>
    %245 = arith.addf %243, %244 : vector<48x128xf32>
    %246 = arith.truncf %245 : vector<48x128xf32> to vector<48x128xbf16>
    %247 = arith.index_cast %c1_i32 : i32 to index
    %c0_64 = arith.constant 0 : index
    %c0_65 = arith.constant 0 : index
    %248 = vector.load %arg5[%247, %c0_64, %c0_65] : memref<2x128x384xbf16, #tpu.memory_space<vmem>>, vector<1x128x384xbf16>
    %249 = vector.shape_cast %248 : vector<1x128x384xbf16> to vector<128x384xbf16>
    %cst_66 = arith.constant dense<0.000000e+00> : vector<48x384xf32>
    %250 = tpu.matmul %246, %249, %cst_66 {dimension_numbers = #tpu.dot_dimension_numbers<[1], [0], [0], [1], [0, 0, 1, 1], [], []>} : vector<48x128xbf16>, vector<128x384xbf16>, vector<48x384xf32> -> vector<48x384xf32>
    %251 = arith.index_cast %c1_i32 : i32 to index
    %c0_67 = arith.constant 0 : index
    %c0_68 = arith.constant 0 : index
    %252 = vector.load %arg6[%251, %c0_67, %c0_68] : memref<2x1x384xf32, #tpu.memory_space<vmem>>, vector<1x1x384xf32>
    %253 = vector.shape_cast %252 : vector<1x1x384xf32> to vector<1x384xf32>
    %254 = vector.broadcast %253 : vector<1x384xf32> to vector<48x384xf32>
    %255 = arith.addf %250, %254 : vector<48x384xf32>
    %256 = vector.extract_strided_slice %255 {offsets = [0, 0], sizes = [48, 128], strides = [1, 1]} : vector<48x384xf32> to vector<48x128xf32>
    %257 = vector.broadcast %cst_12 : f32 to vector<48x128xf32>
    %258 = arith.mulf %256, %257 : vector<48x128xf32>
    %259 = arith.truncf %258 : vector<48x128xf32> to vector<48x128xbf16>
    %260 = vector.extract_strided_slice %255 {offsets = [0, 128], sizes = [48, 128], strides = [1, 1]} : vector<48x384xf32> to vector<48x128xf32>
    %261 = arith.truncf %260 : vector<48x128xf32> to vector<48x128xbf16>
    %262 = vector.extract_strided_slice %255 {offsets = [0, 256], sizes = [48, 128], strides = [1, 1]} : vector<48x384xf32> to vector<48x128xf32>
    %263 = arith.truncf %262 : vector<48x128xf32> to vector<48x128xbf16>
    %cst_69 = arith.constant 0.000000e+00 : f32
    %264 = vector.broadcast %cst_69 : f32 to vector<48x128xf32>
    %265 = vector.broadcast %12 : vector<1x128xbf16> to vector<48x128xbf16>
    %266 = arith.mulf %261, %265 : vector<48x128xbf16>
    %cst_70 = arith.constant dense<0.000000e+00> : vector<48x48xf32>
    %267 = tpu.matmul %259, %266, %cst_70 {dimension_numbers = #tpu.dot_dimension_numbers<[1], [1], [0], [0], [0, 0, 1, 0], [], []>} : vector<48x128xbf16>, vector<48x128xbf16>, vector<48x48xf32> -> vector<48x48xf32>
    %268 = math.exp %267 : vector<48x48xf32>
    %269 = arith.mulf %268, %37 : vector<48x48xf32>
    %cst_71 = arith.constant dense<0.000000e+00> : vector<48xf32>
    %270 = vector.multi_reduction <add>, %269, %cst_71 [1] : vector<48x48xf32> to vector<48xf32>
    %271 = vector.shape_cast %270 : vector<48xf32> to vector<48x1xf32>
    %272 = tpu.reciprocal %271 {approx = true} : vector<48x1xf32> -> vector<48x1xf32>
    %273 = vector.broadcast %272 : vector<48x1xf32> to vector<48x48xf32>
    %274 = arith.mulf %269, %273 : vector<48x48xf32>
    %275 = arith.truncf %274 : vector<48x48xf32> to vector<48x48xbf16>
    %276 = vector.broadcast %12 : vector<1x128xbf16> to vector<48x128xbf16>
    %277 = arith.mulf %263, %276 : vector<48x128xbf16>
    %cst_72 = arith.constant dense<0.000000e+00> : vector<48x128xf32>
    %278 = tpu.matmul %275, %277, %cst_72 {dimension_numbers = #tpu.dot_dimension_numbers<[1], [0], [0], [1], [0, 0, 1, 1], [], []>} : vector<48x48xbf16>, vector<48x128xbf16>, vector<48x128xf32> -> vector<48x128xf32>
    %279 = arith.addf %264, %278 : vector<48x128xf32>
    %280 = vector.broadcast %20 : vector<1x128xbf16> to vector<48x128xbf16>
    %281 = arith.mulf %261, %280 : vector<48x128xbf16>
    %cst_73 = arith.constant dense<0.000000e+00> : vector<48x48xf32>
    %282 = tpu.matmul %259, %281, %cst_73 {dimension_numbers = #tpu.dot_dimension_numbers<[1], [1], [0], [0], [0, 0, 1, 0], [], []>} : vector<48x128xbf16>, vector<48x128xbf16>, vector<48x48xf32> -> vector<48x48xf32>
    %283 = math.exp %282 : vector<48x48xf32>
    %284 = arith.mulf %283, %37 : vector<48x48xf32>
    %cst_74 = arith.constant dense<0.000000e+00> : vector<48xf32>
    %285 = vector.multi_reduction <add>, %284, %cst_74 [1] : vector<48x48xf32> to vector<48xf32>
    %286 = vector.shape_cast %285 : vector<48xf32> to vector<48x1xf32>
    %287 = tpu.reciprocal %286 {approx = true} : vector<48x1xf32> -> vector<48x1xf32>
    %288 = vector.broadcast %287 : vector<48x1xf32> to vector<48x48xf32>
    %289 = arith.mulf %284, %288 : vector<48x48xf32>
    %290 = arith.truncf %289 : vector<48x48xf32> to vector<48x48xbf16>
    %291 = vector.broadcast %20 : vector<1x128xbf16> to vector<48x128xbf16>
    %292 = arith.mulf %263, %291 : vector<48x128xbf16>
    %cst_75 = arith.constant dense<0.000000e+00> : vector<48x128xf32>
    %293 = tpu.matmul %290, %292, %cst_75 {dimension_numbers = #tpu.dot_dimension_numbers<[1], [0], [0], [1], [0, 0, 1, 1], [], []>} : vector<48x48xbf16>, vector<48x128xbf16>, vector<48x128xf32> -> vector<48x128xf32>
    %294 = arith.addf %279, %293 : vector<48x128xf32>
    %295 = vector.broadcast %28 : vector<1x128xbf16> to vector<48x128xbf16>
    %296 = arith.mulf %261, %295 : vector<48x128xbf16>
    %cst_76 = arith.constant dense<0.000000e+00> : vector<48x48xf32>
    %297 = tpu.matmul %259, %296, %cst_76 {dimension_numbers = #tpu.dot_dimension_numbers<[1], [1], [0], [0], [0, 0, 1, 0], [], []>} : vector<48x128xbf16>, vector<48x128xbf16>, vector<48x48xf32> -> vector<48x48xf32>
    %298 = math.exp %297 : vector<48x48xf32>
    %299 = arith.mulf %298, %37 : vector<48x48xf32>
    %cst_77 = arith.constant dense<0.000000e+00> : vector<48xf32>
    %300 = vector.multi_reduction <add>, %299, %cst_77 [1] : vector<48x48xf32> to vector<48xf32>
    %301 = vector.shape_cast %300 : vector<48xf32> to vector<48x1xf32>
    %302 = tpu.reciprocal %301 {approx = true} : vector<48x1xf32> -> vector<48x1xf32>
    %303 = vector.broadcast %302 : vector<48x1xf32> to vector<48x48xf32>
    %304 = arith.mulf %299, %303 : vector<48x48xf32>
    %305 = arith.truncf %304 : vector<48x48xf32> to vector<48x48xbf16>
    %306 = vector.broadcast %28 : vector<1x128xbf16> to vector<48x128xbf16>
    %307 = arith.mulf %263, %306 : vector<48x128xbf16>
    %cst_78 = arith.constant dense<0.000000e+00> : vector<48x128xf32>
    %308 = tpu.matmul %305, %307, %cst_78 {dimension_numbers = #tpu.dot_dimension_numbers<[1], [0], [0], [1], [0, 0, 1, 1], [], []>} : vector<48x48xbf16>, vector<48x128xbf16>, vector<48x128xf32> -> vector<48x128xf32>
    %309 = arith.addf %294, %308 : vector<48x128xf32>
    %310 = vector.broadcast %36 : vector<1x128xbf16> to vector<48x128xbf16>
    %311 = arith.mulf %261, %310 : vector<48x128xbf16>
    %cst_79 = arith.constant dense<0.000000e+00> : vector<48x48xf32>
    %312 = tpu.matmul %259, %311, %cst_79 {dimension_numbers = #tpu.dot_dimension_numbers<[1], [1], [0], [0], [0, 0, 1, 0], [], []>} : vector<48x128xbf16>, vector<48x128xbf16>, vector<48x48xf32> -> vector<48x48xf32>
    %313 = math.exp %312 : vector<48x48xf32>
    %314 = arith.mulf %313, %37 : vector<48x48xf32>
    %cst_80 = arith.constant dense<0.000000e+00> : vector<48xf32>
    %315 = vector.multi_reduction <add>, %314, %cst_80 [1] : vector<48x48xf32> to vector<48xf32>
    %316 = vector.shape_cast %315 : vector<48xf32> to vector<48x1xf32>
    %317 = tpu.reciprocal %316 {approx = true} : vector<48x1xf32> -> vector<48x1xf32>
    %318 = vector.broadcast %317 : vector<48x1xf32> to vector<48x48xf32>
    %319 = arith.mulf %314, %318 : vector<48x48xf32>
    %320 = arith.truncf %319 : vector<48x48xf32> to vector<48x48xbf16>
    %321 = vector.broadcast %36 : vector<1x128xbf16> to vector<48x128xbf16>
    %322 = arith.mulf %263, %321 : vector<48x128xbf16>
    %cst_81 = arith.constant dense<0.000000e+00> : vector<48x128xf32>
    %323 = tpu.matmul %320, %322, %cst_81 {dimension_numbers = #tpu.dot_dimension_numbers<[1], [0], [0], [1], [0, 0, 1, 1], [], []>} : vector<48x48xbf16>, vector<48x128xbf16>, vector<48x128xf32> -> vector<48x128xf32>
    %324 = arith.addf %309, %323 : vector<48x128xf32>
    %325 = arith.truncf %324 : vector<48x128xf32> to vector<48x128xbf16>
    %326 = arith.index_cast %c1_i32 : i32 to index
    %c0_82 = arith.constant 0 : index
    %c0_83 = arith.constant 0 : index
    %327 = vector.load %arg7[%326, %c0_82, %c0_83] : memref<2x128x128xbf16, #tpu.memory_space<vmem>>, vector<1x128x128xbf16>
    %328 = vector.shape_cast %327 : vector<1x128x128xbf16> to vector<128x128xbf16>
    %cst_84 = arith.constant dense<0.000000e+00> : vector<48x128xf32>
    %329 = tpu.matmul %325, %328, %cst_84 {dimension_numbers = #tpu.dot_dimension_numbers<[1], [0], [0], [1], [0, 0, 1, 1], [], []>} : vector<48x128xbf16>, vector<128x128xbf16>, vector<48x128xf32> -> vector<48x128xf32>
    %330 = arith.index_cast %c1_i32 : i32 to index
    %c0_85 = arith.constant 0 : index
    %c0_86 = arith.constant 0 : index
    %331 = vector.load %arg8[%330, %c0_85, %c0_86] : memref<2x1x128xf32, #tpu.memory_space<vmem>>, vector<1x1x128xf32>
    %332 = vector.shape_cast %331 : vector<1x1x128xf32> to vector<1x128xf32>
    %333 = vector.broadcast %332 : vector<1x128xf32> to vector<48x128xf32>
    %334 = arith.addf %329, %333 : vector<48x128xf32>
    %335 = arith.addf %218, %334 : vector<48x128xf32>
    %336 = vector.extract_strided_slice %221 {offsets = [2, 0], sizes = [1, 128], strides = [1, 1]} : vector<4x128xf32> to vector<1x128xf32>
    %337 = vector.extract_strided_slice %221 {offsets = [3, 0], sizes = [1, 128], strides = [1, 1]} : vector<4x128xf32> to vector<1x128xf32>
    %cst_87 = arith.constant dense<0.000000e+00> : vector<48xf32>
    %338 = vector.multi_reduction <add>, %335, %cst_87 [1] : vector<48x128xf32> to vector<48xf32>
    %339 = vector.shape_cast %338 : vector<48xf32> to vector<48x1xf32>
    %340 = vector.broadcast %cst_11 : f32 to vector<48x1xf32>
    %341 = arith.mulf %339, %340 : vector<48x1xf32>
    %342 = vector.broadcast %341 : vector<48x1xf32> to vector<48x128xf32>
    %343 = arith.subf %335, %342 : vector<48x128xf32>
    %344 = vector.broadcast %4 : vector<1x128xf32> to vector<48x128xf32>
    %345 = arith.mulf %343, %344 : vector<48x128xf32>
    %346 = arith.mulf %345, %345 : vector<48x128xf32>
    %cst_88 = arith.constant dense<0.000000e+00> : vector<48xf32>
    %347 = vector.multi_reduction <add>, %346, %cst_88 [1] : vector<48x128xf32> to vector<48xf32>
    %348 = vector.shape_cast %347 : vector<48xf32> to vector<48x1xf32>
    %349 = vector.broadcast %cst_11 : f32 to vector<48x1xf32>
    %350 = arith.mulf %348, %349 : vector<48x1xf32>
    %cst_89 = arith.constant 9.99999997E-7 : f32
    %351 = vector.broadcast %cst_89 : f32 to vector<48x1xf32>
    %352 = arith.addf %350, %351 : vector<48x1xf32>
    %353 = math.rsqrt %352 : vector<48x1xf32>
    %354 = vector.broadcast %353 : vector<48x1xf32> to vector<48x128xf32>
    %355 = arith.mulf %345, %354 : vector<48x128xf32>
    %356 = vector.broadcast %336 : vector<1x128xf32> to vector<48x128xf32>
    %357 = arith.mulf %355, %356 : vector<48x128xf32>
    %358 = vector.broadcast %337 : vector<1x128xf32> to vector<48x128xf32>
    %359 = arith.addf %357, %358 : vector<48x128xf32>
    %360 = arith.truncf %359 : vector<48x128xf32> to vector<48x128xbf16>
    %361 = arith.index_cast %c1_i32 : i32 to index
    %c0_90 = arith.constant 0 : index
    %c0_91 = arith.constant 0 : index
    %362 = vector.load %arg9[%361, %c0_90, %c0_91] : memref<2x128x128xbf16, #tpu.memory_space<vmem>>, vector<1x128x128xbf16>
    %363 = vector.shape_cast %362 : vector<1x128x128xbf16> to vector<128x128xbf16>
    %cst_92 = arith.constant dense<0.000000e+00> : vector<48x128xf32>
    %364 = tpu.matmul %360, %363, %cst_92 {dimension_numbers = #tpu.dot_dimension_numbers<[1], [0], [0], [1], [0, 0, 1, 1], [], []>} : vector<48x128xbf16>, vector<128x128xbf16>, vector<48x128xf32> -> vector<48x128xf32>
    %365 = arith.index_cast %c1_i32 : i32 to index
    %c0_93 = arith.constant 0 : index
    %c0_94 = arith.constant 0 : index
    %366 = vector.load %arg10[%365, %c0_93, %c0_94] : memref<2x1x128xf32, #tpu.memory_space<vmem>>, vector<1x1x128xf32>
    %367 = vector.shape_cast %366 : vector<1x1x128xf32> to vector<1x128xf32>
    %368 = vector.broadcast %367 : vector<1x128xf32> to vector<48x128xf32>
    %369 = arith.addf %364, %368 : vector<48x128xf32>
    %cst_95 = arith.constant 5.000000e-01 : f32
    %370 = vector.broadcast %cst_95 : f32 to vector<48x128xf32>
    %371 = arith.mulf %370, %369 : vector<48x128xf32>
    %cst_96 = arith.constant 4.471500e-02 : f32
    %372 = vector.broadcast %cst_96 : f32 to vector<48x128xf32>
    %373 = arith.mulf %372, %369 : vector<48x128xf32>
    %374 = arith.mulf %373, %369 : vector<48x128xf32>
    %375 = arith.mulf %374, %369 : vector<48x128xf32>
    %376 = arith.addf %369, %375 : vector<48x128xf32>
    %cst_97 = arith.constant 0.797884583 : f32
    %377 = vector.broadcast %cst_97 : f32 to vector<48x128xf32>
    %378 = arith.mulf %377, %376 : vector<48x128xf32>
    %379 = math.tanh %378 : vector<48x128xf32>
    %cst_98 = arith.constant 1.000000e+00 : f32
    %380 = vector.broadcast %cst_98 : f32 to vector<48x128xf32>
    %381 = arith.addf %380, %379 : vector<48x128xf32>
    %382 = arith.mulf %371, %381 : vector<48x128xf32>
    %383 = arith.truncf %382 : vector<48x128xf32> to vector<48x128xbf16>
    %384 = arith.index_cast %c1_i32 : i32 to index
    %c0_99 = arith.constant 0 : index
    %c0_100 = arith.constant 0 : index
    %385 = vector.load %arg11[%384, %c0_99, %c0_100] : memref<2x128x128xbf16, #tpu.memory_space<vmem>>, vector<1x128x128xbf16>
    %386 = vector.shape_cast %385 : vector<1x128x128xbf16> to vector<128x128xbf16>
    %cst_101 = arith.constant dense<0.000000e+00> : vector<48x128xf32>
    %387 = tpu.matmul %383, %386, %cst_101 {dimension_numbers = #tpu.dot_dimension_numbers<[1], [0], [0], [1], [0, 0, 1, 1], [], []>} : vector<48x128xbf16>, vector<128x128xbf16>, vector<48x128xf32> -> vector<48x128xf32>
    %388 = arith.index_cast %c1_i32 : i32 to index
    %c0_102 = arith.constant 0 : index
    %c0_103 = arith.constant 0 : index
    %389 = vector.load %arg12[%388, %c0_102, %c0_103] : memref<2x1x128xf32, #tpu.memory_space<vmem>>, vector<1x1x128xf32>
    %390 = vector.shape_cast %389 : vector<1x1x128xf32> to vector<1x128xf32>
    %391 = vector.broadcast %390 : vector<1x128xf32> to vector<48x128xf32>
    %392 = arith.addf %387, %391 : vector<48x128xf32>
    %393 = arith.addf %335, %392 : vector<48x128xf32>
    %c2_i32 = arith.constant 2 : i32
    %c0_104 = arith.constant 0 : index
    %c0_105 = arith.constant 0 : index
    %394 = vector.load %arg13[%c0_104, %c0_105] : memref<1x128xf32, #tpu.memory_space<vmem>>, vector<1x128xf32>
    %c0_106 = arith.constant 0 : index
    %c0_107 = arith.constant 0 : index
    %395 = vector.load %arg14[%c0_106, %c0_107] : memref<1x128xf32, #tpu.memory_space<vmem>>, vector<1x128xf32>
    %cst_108 = arith.constant dense<0.000000e+00> : vector<48xf32>
    %396 = vector.multi_reduction <add>, %393, %cst_108 [1] : vector<48x128xf32> to vector<48xf32>
    %397 = vector.shape_cast %396 : vector<48xf32> to vector<48x1xf32>
    %cst_109 = arith.constant 3.125000e-02 : f32
    %398 = vector.broadcast %cst_109 : f32 to vector<48x1xf32>
    %399 = arith.mulf %397, %398 : vector<48x1xf32>
    %400 = vector.broadcast %399 : vector<48x1xf32> to vector<48x128xf32>
    %401 = arith.subf %393, %400 : vector<48x128xf32>
    %402 = vector.broadcast %4 : vector<1x128xf32> to vector<48x128xf32>
    %403 = arith.mulf %401, %402 : vector<48x128xf32>
    %404 = arith.mulf %403, %403 : vector<48x128xf32>
    %cst_110 = arith.constant dense<0.000000e+00> : vector<48xf32>
    %405 = vector.multi_reduction <add>, %404, %cst_110 [1] : vector<48x128xf32> to vector<48xf32>
    %406 = vector.shape_cast %405 : vector<48xf32> to vector<48x1xf32>
    %cst_111 = arith.constant 3.125000e-02 : f32
    %407 = vector.broadcast %cst_111 : f32 to vector<48x1xf32>
    %408 = arith.mulf %406, %407 : vector<48x1xf32>
    %cst_112 = arith.constant 9.99999997E-7 : f32
    %409 = vector.broadcast %cst_112 : f32 to vector<48x1xf32>
    %410 = arith.addf %408, %409 : vector<48x1xf32>
    %411 = math.rsqrt %410 : vector<48x1xf32>
    %412 = vector.broadcast %411 : vector<48x1xf32> to vector<48x128xf32>
    %413 = arith.mulf %403, %412 : vector<48x128xf32>
    %414 = vector.broadcast %394 : vector<1x128xf32> to vector<48x128xf32>
    %415 = arith.mulf %413, %414 : vector<48x128xf32>
    %416 = vector.broadcast %395 : vector<1x128xf32> to vector<48x128xf32>
    %417 = arith.addf %415, %416 : vector<48x128xf32>
    %418 = arith.truncf %417 : vector<48x128xf32> to vector<48x128xbf16>
    %c0_113 = arith.constant 0 : index
    %c0_114 = arith.constant 0 : index
    %419 = vector.load %arg15[%c0_113, %c0_114] : memref<128x128xbf16, #tpu.memory_space<vmem>>, vector<128x128xbf16>
    %cst_115 = arith.constant dense<0.000000e+00> : vector<48x128xf32>
    %420 = tpu.matmul %418, %419, %cst_115 {dimension_numbers = #tpu.dot_dimension_numbers<[1], [0], [0], [1], [0, 0, 1, 1], [], []>} : vector<48x128xbf16>, vector<128x128xbf16>, vector<48x128xf32> -> vector<48x128xf32>
    %c0_116 = arith.constant 0 : index
    %c0_117 = arith.constant 0 : index
    %421 = vector.load %arg16[%c0_116, %c0_117] : memref<1x128xf32, #tpu.memory_space<vmem>>, vector<1x128xf32>
    %422 = vector.broadcast %421 : vector<1x128xf32> to vector<48x128xf32>
    %423 = arith.addf %420, %422 : vector<48x128xf32>
    %c0_118 = arith.constant 0 : index
    %c0_119 = arith.constant 0 : index
    %424 = vector.load %arg17[%c0_118, %c0_119] : memref<48x128xf32, #tpu.memory_space<vmem>>, vector<48x128xf32>
    tpu.vector_store %arg17[%c0_118, %c0_119], %423 {strides = array<i32>} : memref<48x128xf32, #tpu.memory_space<vmem>>, vector<48x128xf32>,
    return
  }
}

</mosaic_0001>

<bundles_post_ra>
// kernel: vit_forward.1
= control target key start
LH: loop header
LB: loop body
LE: loop exit
PB: predicated region body
PF: predicated region fallthrough
CT: control target
= control target key end

     0   :  { %v5315_v0 = vmov 0.0   ;;  %vm5316_vm0 = vmmov 0   ;;  %vm138_vm1 = vcmask 523264   ;;  %v57_v42 = vlaneseq  ;;  %s7001_s3 = inlined_call_operand.vmem [shape: bf16[64,128], index: 3, kind: input, shape index: {}]   ;;  %s7002_s0 = inlined_call_operand.vmem [shape: f32[48,64], index: 0, kind: input, shape index: {}]   ;;  %s7003_s1 = inlined_call_operand.vmem [shape: f32[48,128], index: 1, kind: input, shape index: {}]   ;;  %s7004_s5 = inlined_call_operand.vmem [shape: bf16[2,128,384], index: 5, kind: input, shape index: {}]   ;;  %s7005_s4 = inlined_call_operand.vmem [shape: f32[2,4,128], index: 4, kind: input, shape index: {}]   ;;  %s7006_s6 = inlined_call_operand.vmem [shape: f32[2,1,384], index: 6, kind: input, shape index: {}]   ;;  %s7007_s2 = inlined_call_operand.vmem [shape: f32[48,48], index: 2, kind: input, shape index: {}]   ;;  %s7008_s7 = inlined_call_operand.vmem [shape: bf16[2,128,128], index: 7, kind: input, shape index: {}]   ;;  %s7009_s8 = inlined_call_operand.vmem [shape: f32[2,1,128], index: 8, kind: input, shape index: {}]   ;;  %s7010_s9 = inlined_call_operand.vmem [shape: bf16[2,128,128], index: 9, kind: input, shape index: {}]   ;;  %s7011_s11 = inlined_call_operand.vmem [shape: bf16[2,128,128], index: 11, kind: input, shape index: {}]   ;;  %s7012_s10 = inlined_call_operand.vmem [shape: f32[2,1,128], index: 10, kind: input, shape index: {}]   ;;  %s7013_s12 = inlined_call_operand.vmem [shape: f32[2,1,128], index: 12, kind: input, shape index: {}]   ;;  %s7014_s15 = inlined_call_operand.vmem [shape: bf16[128,128], index: 15, kind: input, shape index: {}]   ;;  %s7015_s13 = inlined_call_operand.vmem [shape: f32[1,128], index: 13, kind: input, shape index: {}]   ;;  %s7016_s14 = inlined_call_operand.vmem [shape: f32[1,128], index: 14, kind: input, shape index: {}]   ;;  %s7017_s16 = inlined_call_operand.vmem [shape: f32[1,128], index: 16, kind: input, shape index: {}]   ;;  %s7018_s17 = inlined_call_operand.vmem [shape: f32[48,128], index: 17, kind: output, shape index: {}]  }
   0x1   :  { %7021 = sst [smem:[#allocation2_spill]] %s7001_s3  ;;  %4272 = vmatprep.subr.bf16.mxu0 %v5315_v0  ;;  %4280 = vmatprep.mubr.msk.bf16.mxu0 %vm5316_vm0, %v5315_v0  ;;  %v108_v14 = vld [vmem:[%s7003_s1] sm:$0xff]  ;;  %v109_v18 = vld [vmem:[%s7003_s1 + $0x8] sm:$0xff]  ;;  %v110_v22 = vld [vmem:[%s7003_s1 + $0x10] sm:$0xff]  ;;  %vm691_vm10 = vcmask 392192  }
   0x2   :  { %7022 = sst [smem:[#allocation3_spill]] %s7002_s0  ;;  %s7023_s26 = sld [smem:[#allocation2_spill]]  ;;  %v111_v26 = vld [vmem:[%s7003_s1 + $0x18] sm:$0xff]  ;;  %v112_v30 = vld [vmem:[%s7003_s1 + $0x20] sm:$0xff]  ;;  %v113_v32 = vld [vmem:[%s7003_s1 + $0x28] sm:$0xff]  ;;  %v5501_v43 = vand.u32 127, %v57_v42 }
   0x3   :  { %s7024_s20 = sld [smem:[#allocation3_spill]]  ;;  %v4911_v38 = vld [vmem:[%s7004_s5 + $0x4] ss:$12 sps:$4 sm:$0xff]   ;;  %v4913_v39 = vld [vmem:[%s7004_s5] ss:$12 sps:$4 sm:$0xff]  }
   0x4   :  { %478 = vmatprep.subr.bf16.mxu1 %v4911_v38  ;;  %v4914_v40 = vld [vmem:[%s7004_s5 + $0x8] ss:$12 sps:$4 sm:$0xff]   ;;  %vm59_vm2 = vcmp.lt.s32.totalorder %v5501_v43, 32  ;;  %v5317_v38 = vmov 0   ;;  %vm67_vm3 = vcmp.ge.s32.totalorder %v5501_v43, 32  ;;  %vm68_vm4 = vcmp.lt.s32.totalorder %v5501_v43, 64 }
   0x5   :  { %479 = vmatpush1.bf16.msra.mxu1 %v4913_v39  ;;  %v4915_v41 = vld [vmem:[%s7004_s5 + $0x1c] ss:$12 sps:$4 sm:$0xff]   ;;  %v5505_v46 = vsel %vm59_vm2, 1.0, %v5315_v0  ;;  %510 = vmatprep.mubr.bf16.mxu1 %v5317_v38  ;;  %vm69_vm5 = vmand %vm67_vm3, %vm68_vm4  ;;  %vm73_vm6 = vcmp.ge.s32.totalorder %v5501_v43, 64  ;;  %vm74_vm7 = vcmp.lt.s32.totalorder %v5501_v43, 96  ;;  %vm79_vm9 = vcmp.ge.s32.totalorder %v5501_v43, 96 }
   0x6   :  { %480 = vmatprep.subr.bf16.mxu1 %v4915_v41  ;;  %vm75_vm8 = vmand %vm73_vm6, %vm74_vm7 }
   0x8   :  { %v4907_v1 = vld [vmem:[%s7023_s26] sm:$0xff]   ;;  %v4908_v2 = vld [vmem:[%s7023_s26 + $0x8] sm:$0xff]   ;;  %v4909_v3 = vld [vmem:[%s7023_s26 + $0x10] sm:$0xff]  }
   0x9   :  { %4273 = vmatpush3.bf16.msra.mxu0 %v4907_v1  ;;  %v4910_v4 = vld [vmem:[%s7023_s26 + $0x18] sm:$0xff]   ;;  %v91_v5 = vld [vmem:[%s7024_s20] sm:$0xff]  ;;  %v92_v6 = vld [vmem:[%s7024_s20 + $0x8] sm:$0xff] }
   0xa   :  { %4274 = vmatprep.subr.bf16.mxu0 %v5315_v0  ;;  %v97_v7 = vpack.c.bf16 %v92_v6, %v91_v5  ;;  %v93_v8 = vld [vmem:[%s7024_s20 + $0x10] sm:$0xff]  ;;  %v94_v9 = vld [vmem:[%s7024_s20 + $0x18] sm:$0xff]  ;;  %v95_v11 = vld [vmem:[%s7024_s20 + $0x20] sm:$0xff] }
   0xb   :  { %v98_v10 = vpack.c.bf16 %v94_v9, %v93_v8  ;;  %v96_v12 = vld [vmem:[%s7024_s20 + $0x28] sm:$0xff]  ;;  %v4917_v9 = vld [vmem:[%s7004_s5 + $0x18] ss:$12 sps:$4 sm:$0xff]  }
   0xc   :  { %v99_v13 = vpack.c.bf16 %v96_v12, %v95_v11  ;;  %481 = vmatpush1.bf16.msra.mxu1 %v4917_v9 }
   0xd   :  { %4275 = vmatpush3.bf16.msra.mxu0 %v4908_v2 }
   0xe   :  { %4276 = vmatprep.subr.bf16.mxu0 %v5315_v0 }
  0x11   :  { %4277 = vmatpush3.bf16.msra.mxu0 %v4909_v3 }
  0x12   :  { %4278 = vmatprep.subr.bf16.mxu0 %v5315_v0 }
  0x15   :  { %4279 = vmatpush3.bf16.msra.mxu0 %v4910_v4 }
  0x16   :  { %4292 = vmatprep.subr.bf16.mxu0 %v5315_v0 }
  0x18   :  { %4281 = vmatmul.mubr.msk.bf16.vlgmr.msra.gmra.mrb[0].mxu0 %vm138_vm1, %v97_v7 }
  0x19   :  { %4284 = vmatprep.mubr.msk.bf16.mxu0 %vm5316_vm0, %v5315_v0  ;;  %4293 = vmatpush3.bf16.msra.mxu0 %v4914_v40 }
  0x1a   :  { %4294 = vmatprep.subr.bf16.mxu0 %v5315_v0 }
  0x20   :  { %4285 = vmatmul.mubr.msk.bf16.gmra.mrb[4].mxu0 %vm138_vm1, %v98_v10  ;;  %v4918_v10 = vld [vmem:[%s7004_s5 + $0x20] ss:$12 sps:$4 sm:$0xff]  }
  0x21   :  { %4288 = vmatprep.mubr.msk.bf16.mxu0 %vm5316_vm0, %v5315_v0  ;;  %4295 = vmatpush3.bf16.msra.mxu0 %v4918_v10 }
  0x22   :  { %4296 = vmatprep.subr.bf16.mxu0 %v5315_v0 }
  0x28   :  { %4289 = vmatmul.mubr.msk.bf16.gmra.mrb[8].mxu0 %vm138_vm1, %v99_v13  ;;  %v4919_v13 = vld [vmem:[%s7004_s5 + $0x34] ss:$12 sps:$4 sm:$0xff]  }
  0x29   :  { %4308 = vmatprep.mubr.msk.bf16.mxu0 %vm5316_vm0, %v5315_v0  ;;  %482 = vmatprep.subr.bf16.mxu1 %v4919_v13 }
  0xeb   :  { %v182_v15 = vpop.f32.mrb[0].mxu0 }
  0xec   :  { %v5454_v16 = vadd.f32 %v182_v15, %v108_v14  ;;  %v4282_v17 = vpop.f32.mrb[1].mxu0  ;;  %v4921_v15 = vld [vmem:[%s7004_s5 + $0x30] ss:$12 sps:$4 sm:$0xff]  }
  0xed   :  { %v185_v19 = vpop.f32.mrb[2].mxu0  ;;  %v4922_v17 = vld [vmem:[%s7004_s5 + $0x38] ss:$12 sps:$4 sm:$0xff]   ;;  %483 = vmatpush1.bf16.msra.mxu1 %v4921_v15 }
  0xee   :  { %206 = vadd.xlane.f32.xlu0 %v5454_v16  ;;  %v4283_v20 = vpop.f32.mrb[3].mxu0  ;;  %v5460_v21 = vadd.f32 %v185_v19, %v109_v18  ;;  %4297 = vmatpush3.bf16.msra.mxu0 %v4922_v17  ;;  %v4923_v18 = vld [vmem:[%s7004_s5 + $0x4c] ss:$12 sps:$4 sm:$0xff]   ;;  %v4925_v19 = vld [vmem:[%s7004_s5 + $0x48] ss:$12 sps:$4 sm:$0xff]  }
  0xef   :  { %4298 = vmatprep.subr.bf16.mxu0 %v5315_v0  ;;  %v4926_v20 = vld [vmem:[%s7004_s5 + $0x50] ss:$12 sps:$4 sm:$0xff]   ;;  %484 = vmatprep.subr.bf16.mxu1 %v4923_v18 }
  0xf1   :  { %485 = vmatpush1.bf16.msra.mxu1 %v4925_v19 }
  0xf2   :  { %208 = vadd.xlane.f32.xlu0 %v5460_v21  ;;  %4299 = vmatpush3.bf16.msra.mxu0 %v4926_v20 }
  0xf3   :  { %v190_v23 = vpop.f32.mrb[4].mxu0  ;;  %4300 = vmatprep.subr.bf16.mxu0 %v5315_v0 }
  0xf4   :  { %v5466_v24 = vadd.f32 %v190_v23, %v110_v22  ;;  %v4286_v25 = vpop.f32.mrb[5].mxu0  ;;  %v4927_v22 = vld [vmem:[%s7004_s5 + $0x64] ss:$12 sps:$4 sm:$0xff]   ;;  %v4929_v23 = vld [vmem:[%s7004_s5 + $0x60] ss:$12 sps:$4 sm:$0xff]  }
  0xf5   :  { %v193_v27 = vpop.f32.mrb[6].mxu0  ;;  %v4930_v25 = vld [vmem:[%s7004_s5 + $0x68] ss:$12 sps:$4 sm:$0xff]   ;;  %486 = vmatprep.subr.bf16.mxu1 %v4927_v22 }
  0xf6   :  { %210 = vadd.xlane.f32.xlu1 %v5466_v24  ;;  %v4287_v28 = vpop.f32.mrb[7].mxu0  ;;  %v5472_v29 = vadd.f32 %v193_v27, %v111_v26  ;;  %487 = vmatpush1.bf16.msra.mxu1 %v4929_v23  ;;  %v4931_v26 = vld [vmem:[%s7004_s5 + $0x7c] ss:$12 sps:$4 sm:$0xff]   ;;  %v4933_v27 = vld [vmem:[%s7004_s5 + $0x78] ss:$12 sps:$4 sm:$0xff]  }
  0xf7   :  { %4301 = vmatpush3.bf16.msra.mxu0 %v4930_v25  ;;  %v4934_v28 = vld [vmem:[%s7004_s5 + $0x80] ss:$12 sps:$4 sm:$0xff]   ;;  %488 = vmatprep.subr.bf16.mxu1 %v4931_v26 }
  0xf8   :  { %4302 = vmatprep.subr.bf16.mxu0 %v5315_v0 }
  0xfa   :  { %212 = vadd.xlane.f32.xlu1 %v5472_v29  ;;  %489 = vmatpush1.bf16.msra.mxu1 %v4933_v27 }
  0xfb   :  { %v198_v31 = vpop.f32.mrb[8].mxu0  ;;  %4303 = vmatpush3.bf16.msra.mxu0 %v4934_v28 }
  0xfc   :  { %v5481_v33 = vadd.f32 %v198_v31, %v112_v30  ;;  %v4290_v34 = vpop.f32.mrb[9].mxu0  ;;  %v4935_v30 = vld [vmem:[%s7004_s5 + $0x94] ss:$12 sps:$4 sm:$0xff]   ;;  %4304 = vmatprep.subr.bf16.mxu0 %v5315_v0  ;;  %v4937_v31 = vld [vmem:[%s7004_s5 + $0x90] ss:$12 sps:$4 sm:$0xff]  }
  0xfd   :  { %v201_v35 = vpop.f32.mrb[10].mxu0  ;;  %490 = vmatprep.subr.bf16.mxu1 %v4935_v30  ;;  %v4939_v34 = vld [vmem:[%s7004_s5 + $0xac] ss:$12 sps:$4 sm:$0xff]  }
  0xfe   :  { %v5483_v36 = vadd.f32 %v201_v35, %v113_v32  ;;  %214 = vadd.xlane.f32.xlu0 %v5481_v33  ;;  %v4291_v37 = vpop.f32.mrb[11].mxu0  ;;  %v4938_v32 = vld [vmem:[%s7004_s5 + $0x98] ss:$12 sps:$4 sm:$0xff]   ;;  %491 = vmatpush1.bf16.msra.mxu1 %v4937_v31  ;;  %v4941_v35 = vld [vmem:[%s7004_s5 + $0xa8] ss:$12 sps:$4 sm:$0xff]  }
  0xff   :  { %4305 = vmatpush3.bf16.msra.mxu0 %v4938_v32  ;;  %v4942_v37 = vld [vmem:[%s7004_s5 + $0xb0] ss:$12 sps:$4 sm:$0xff]   ;;  %492 = vmatprep.subr.bf16.mxu1 %v4939_v34 }
 0x100   :  { %216 = vadd.xlane.f32.xlu1 %v5483_v36  ;;  %4306 = vmatprep.subr.bf16.mxu0 %v5315_v0 }
 0x102   :  { %493 = vmatpush1.bf16.msra.mxu1 %v4941_v35 }
 0x103   :  { %4307 = vmatpush3.bf16.msra.mxu0 %v4942_v37  ;;  %4320 = vmatprep.subr.bf16.mxu1 %v5315_v0 }
 0x104   :  { %4338 = vmatprep.subr.bf16.mxu0 %v5315_v0 }
 0x17b   :  { %v207_v44 = vpop.xlane.xlu0 %206 }
 0x17c   :  { %v218_v45 = vmul.f32 0.03125, %v207_v44 }
 0x17e   :  { %v224_v47 = vsub.f32 %v5454_v16, %v218_v45 }
 0x17f   :  { %v209_v48 = vpop.xlane.xlu0 %208 }
 0x180   :  { %v219_v49 = vmul.f32 0.03125, %v209_v48  ;;  %v5509_v50 = vmul.f32 %v5505_v46, %v224_v47 }
 0x182   :  { %v225_v51 = vsub.f32 %v5460_v21, %v219_v49  ;;  %v236_v52 = vmul.f32 %v5509_v50, %v5509_v50  ;;  %v5613_v49 = vshrl.u32 %v57_v42, 7 }
 0x183   :  { %v211_v53 = vpop.xlane.xlu1 %210 }
 0x184   :  { %v220_v54 = vmul.f32 0.03125, %v211_v53  ;;  %242 = vadd.xlane.f32.xlu0 %v236_v52  ;;  %v5515_v55 = vmul.f32 %v5505_v46, %v225_v51 }
 0x186   :  { %v226_v56 = vsub.f32 %v5466_v24, %v220_v54  ;;  %v237_v57 = vmul.f32 %v5515_v55, %v5515_v55  ;;  %v5616_v54 = vsub.s32 0, %v5613_v49 }
 0x187   :  { %v213_v58 = vpop.xlane.xlu1 %212 }
 0x188   :  { %v221_v59 = vmul.f32 0.03125, %v213_v58  ;;  %244 = vadd.xlane.f32.xlu1 %v237_v57  ;;  %v5521_v60 = vmul.f32 %v5505_v46, %v226_v56  ;;  %v205_v57 = vld [vmem:[%s7005_s4] sm:$0xf] }
 0x189   :  { %v281_v42 = vrot.slane %v205_v57, %v5616_v54 }
 0x18a   :  { %v227_v61 = vsub.f32 %v5472_v29, %v221_v59  ;;  %v238_v62 = vmul.f32 %v5521_v60, %v5521_v60 }
 0x18b   :  { %v215_v63 = vpop.xlane.xlu0 %214 }
 0x18c   :  { %v222_v1 = vmul.f32 0.03125, %v215_v63  ;;  %246 = vadd.xlane.f32.xlu0 %v238_v62  ;;  %v5527_v2 = vmul.f32 %v5505_v46, %v227_v61  ;;  %v5624_v63 = vsub.s32 1, %v5613_v49 }
 0x18d   :  { %v217_v3 = vpop.xlane.xlu1 %216 }
 0x18e   :  { %v228_v4 = vsub.f32 %v5481_v33, %v222_v1  ;;  %v223_v5 = vmul.f32 0.03125, %v217_v3  ;;  %v239_v6 = vmul.f32 %v5527_v2, %v5527_v2  ;;  %v291_v10 = vrot.slane %v205_v57, %v5624_v63 }
 0x190   :  { %v229_v7 = vsub.f32 %v5483_v36, %v223_v5  ;;  %248 = vadd.xlane.f32.xlu1 %v239_v6  ;;  %v5534_v8 = vmul.f32 %v5505_v46, %v228_v4 }
 0x192   :  { %v240_v11 = vmul.f32 %v5534_v8, %v5534_v8  ;;  %v5545_v12 = vmul.f32 %v5505_v46, %v229_v7 }
 0x194   :  { %250 = vadd.xlane.f32.xlu0 %v240_v11  ;;  %v241_v14 = vmul.f32 %v5545_v12, %v5545_v12 }
 0x196   :  { %252 = vadd.xlane.f32.xlu1 %v241_v14 }
 0x211   :  { %v243_v39 = vpop.xlane.xlu0 %242 }
 0x212   :  { %v254_v40 = vmul.f32 0.03125, %v243_v39 }
 0x214   :  { %v260_v41 = vadd.f32 1e-06, %v254_v40 }
 0x215   :  { %v245_v44 = vpop.xlane.xlu1 %244 }
 0x216   :  { %5031 = vrsqrt.f32 %v260_v41  ;;  %v255_v45 = vmul.f32 0.03125, %v245_v44 }
 0x218   :  { %v261_v47 = vadd.f32 1e-06, %v255_v45 }
 0x219   :  { %v247_v48 = vpop.xlane.xlu0 %246 }
 0x21a   :  { %5033 = vrsqrt.f32 %v261_v47  ;;  %v256_v51 = vmul.f32 0.03125, %v247_v48 }
 0x21c   :  { %v262_v52 = vadd.f32 1e-06, %v256_v51  ;;  %v3838_v51 = vsel %vm69_vm5, 1.0, %v5315_v0 }
 0x21d   :  { %v249_v53 = vpop.xlane.xlu1 %248 }
 0x21e   :  { %5035 = vrsqrt.f32 %v262_v52  ;;  %v257_v56 = vmul.f32 0.03125, %v249_v53 }
 0x220   :  { %v5032_v58 = vpop.eup %5031  ;;  %v263_v59 = vadd.f32 1e-06, %v257_v56 }
 0x221   :  { %v251_v61 = vpop.xlane.xlu0 %250  ;;  %v272_v62 = vmul.f32 %v5032_v58, %v5509_v50 }
 0x222   :  { %5037 = vrsqrt.f32 %v263_v59  ;;  %v258_v1 = vmul.f32 0.03125, %v251_v61 }
 0x223   :  { %v253_v3 = vpop.xlane.xlu1 %252  ;;  %v282_v9 = vmul.f32 %v281_v42, %v272_v62 }
 0x224   :  { %v5034_v4 = vpop.eup %5033  ;;  %v264_v5 = vadd.f32 1e-06, %v258_v1  ;;  %v259_v6 = vmul.f32 0.03125, %v253_v3  ;;  %v5668_v1 = vpack.c.bf16 %v5505_v46, %v5505_v46  ;;  %v5670_v3 = vpack.c.bf16 %v3838_v51, %v3838_v51 }
 0x225   :  { %v273_v7 = vmul.f32 %v5034_v4, %v5515_v55  ;;  %v292_v14 = vadd.f32 %v291_v10, %v282_v9 }
 0x226   :  { %5039 = vrsqrt.f32 %v264_v5  ;;  %v265_v11 = vadd.f32 1e-06, %v259_v6 }
 0x227   :  { %v283_v13 = vmul.f32 %v281_v42, %v273_v7 }
 0x228   :  { %v5036_v50 = vpop.eup %5035  ;;  %5041 = vrsqrt.f32 %v265_v11 }
 0x229   :  { %v293_v15 = vadd.f32 %v291_v10, %v283_v13  ;;  %v274_v17 = vmul.f32 %v5036_v50, %v5521_v60 }
 0x22b   :  { %v298_v18 = vpack.c.bf16 %v293_v15, %v292_v14  ;;  %v284_v22 = vmul.f32 %v281_v42, %v274_v17 }
 0x22c   :  { %v5038_v19 = vpop.eup %5037 }
 0x22d   :  { %511 = vmatmul.mubr.bf16.vlgmr.msra.gmra.mrb[0].mxu1 %v298_v18  ;;  %4309 = vmatmul.mubr.bf16.vlgmr.msra.gmra.mrb[12].mxu0 %v298_v18  ;;  %v275_v20 = vmul.f32 %v5038_v19, %v5527_v2  ;;  %v294_v25 = vadd.f32 %v291_v10, %v284_v22 }
 0x22e   :  { %520 = vmatprep.mubr.bf16.mxu1 %v5317_v38  ;;  %4312 = vmatprep.mubr.msk.bf16.mxu0 %vm5316_vm0, %v5315_v0 }
 0x22f   :  { %v285_v55 = vmul.f32 %v281_v42, %v275_v20 }
 0x230   :  { %v5040_v23 = vpop.eup %5039 }
 0x231   :  { %v295_v26 = vadd.f32 %v291_v10, %v285_v55  ;;  %v276_v27 = vmul.f32 %v5040_v23, %v5534_v8  ;;  %v333_v8 = vld [vmem:[%s7006_s6] sm:$0x7] }
 0x232   :  { %v5042_v28 = vpop.eup %5041  ;;  %v5651_v37 = vrot.slane %v333_v8, %v5616_v54  ;;  %v5657_v44 = vrot.slane %v333_v8, %v5624_v63 }
 0x233   :  { %v299_v60 = vpack.c.bf16 %v295_v26, %v294_v25  ;;  %v277_v30 = vmul.f32 %v5042_v28, %v5545_v12  ;;  %v286_v31 = vmul.f32 %v281_v42, %v276_v27  ;;  %v5646_v12 = vsub.s32 2, %v5613_v49 }
 0x235   :  { %521 = vmatmul.mubr.bf16.gmra.mrb[4].mxu1 %v299_v60  ;;  %4313 = vmatmul.mubr.bf16.gmra.mrb[16].mxu0 %v299_v60  ;;  %v287_v2 = vmul.f32 %v281_v42, %v277_v30  ;;  %v296_v34 = vadd.f32 %v291_v10, %v286_v31  ;;  %v5654_v39 = vrot.slane %v333_v8, %v5646_v12 }
 0x236   :  { %530 = vmatprep.mubr.bf16.mxu1 %v5317_v38  ;;  %4316 = vmatprep.mubr.msk.bf16.mxu0 %vm5316_vm0, %v5315_v0 }
 0x237   :  { %v297_v32 = vadd.f32 %v291_v10, %v287_v2 }
 0x239   :  { %v300_v35 = vpack.c.bf16 %v297_v32, %v296_v34 }
 0x23d   :  { %531 = vmatmul.mubr.bf16.gmra.mrb[8].mxu1 %v300_v35  ;;  %4317 = vmatmul.mubr.bf16.gmra.mrb[20].mxu0 %v300_v35 }
 0x23e   :  { %4326 = vmatprep.mubr.msk.bf16.mxu1 %vm5316_vm0, %v5315_v0  ;;  %4344 = vmatprep.mubr.msk.bf16.mxu0 %vm5316_vm0, %v5315_v0 }
 0x300   :  { %v512_v40 = vpop.f32.mrb[0].mxu1  ;;  %v575_v41 = vpop.f32.mrb[12].mxu0 }
 0x301   :  { %v513_v45 = vadd.f32 %v512_v40, %v5651_v37  ;;  %v514_v47 = vpop.f32.mrb[1].mxu1  ;;  %v4310_v48 = vpop.f32.mrb[13].mxu0  ;;  %v576_v56 = vadd.f32 %v575_v41, %v5654_v39 }
 0x302   :  { %v516_v52 = vpop.f32.mrb[2].mxu1  ;;  %v578_v53 = vpop.f32.mrb[14].mxu0  ;;  %v515_v62 = vadd.f32 %v514_v47, %v5657_v44 }
 0x303   :  { %v517_v57 = vadd.f32 %v516_v52, %v5651_v37  ;;  %v579_v58 = vadd.f32 %v578_v53, %v5654_v39  ;;  %v518_v59 = vpop.f32.mrb[3].mxu1  ;;  %v4311_v61 = vpop.f32.mrb[15].mxu0  ;;  %v598_v4 = vmul.f32 0.35355338, %v513_v45 }
 0x304   :  { %v519_v42 = vadd.f32 %v518_v59, %v5657_v44 }
 0x305   :  { %v599_v5 = vmul.f32 0.35355338, %v517_v57  ;;  %v5672_v6 = vpack.c.bf16 %v579_v58, %v576_v56 }
 0x306   :  { %v5674_v7 = vpack.c.bf16 %v519_v42, %v515_v62 }
 0x307   :  { %v5676_v9 = vpack.c.bf16 %v599_v5, %v598_v4 }
 0x308   :  { %v522_v10 = vpop.f32.mrb[4].mxu1  ;;  %v583_v11 = vpop.f32.mrb[16].mxu0  ;;  %v613_v13 = vmul.bf16 %v5674_v7, %v5668_v1  ;;  %v728_v50 = vmul.bf16 %v5674_v7, %v5670_v3 }
 0x309   :  { %v523_v14 = vadd.f32 %v522_v10, %v5651_v37  ;;  %v524_v15 = vpop.f32.mrb[5].mxu1  ;;  %v4314_v17 = vpop.f32.mrb[17].mxu0  ;;  %v584_v20 = vadd.f32 %v583_v11, %v5654_v39  ;;  %v3839_v10 = vsel %vm75_vm8, 1.0, %v5315_v0  ;;  %v839_v11 = vmul.bf16 %v5672_v6, %v5670_v3 }
 0x30a   :  { %v526_v18 = vpop.f32.mrb[6].mxu1  ;;  %v586_v19 = vpop.f32.mrb[18].mxu0  ;;  %4321 = vmatpush3.bf16.xpose.msra.mxu1 %v613_v13  ;;  %4339 = vmatpush3.bf16.xpose.msra.mxu0 %v728_v50  ;;  %v525_v26 = vadd.f32 %v524_v15, %v5657_v44 }
 0x30b   :  { %v527_v22 = vadd.f32 %v526_v18, %v5651_v37  ;;  %v587_v55 = vadd.f32 %v586_v19, %v5654_v39  ;;  %v528_v23 = vpop.f32.mrb[7].mxu1  ;;  %v4315_v25 = vpop.f32.mrb[19].mxu0  ;;  %4322 = vmatprep.subr.bf16.mxu1 %v5315_v0  ;;  %4340 = vmatprep.subr.bf16.mxu0 %v5315_v0  ;;  %v600_v28 = vmul.f32 0.35355338, %v523_v14  ;;  %v3840_v18 = vsel %vm79_vm9, 1.0, %v5315_v0 }
 0x30c   :  { %v529_v27 = vadd.f32 %v528_v23, %v5657_v44  ;;  %v5756_v19 = vpack.c.bf16 %v3840_v18, %v3840_v18 }
 0x30d   :  { %v601_v60 = vmul.f32 0.35355338, %v527_v22  ;;  %v5690_v30 = vpack.c.bf16 %v587_v55, %v584_v20 }
 0x30e   :  { %v5692_v31 = vpack.c.bf16 %v529_v27, %v525_v26  ;;  %v1160_v43 = vmul.bf16 %v5674_v7, %v5756_v19 }
 0x30f   :  { %v5694_v2 = vpack.c.bf16 %v601_v60, %v600_v28  ;;  %v840_v50 = vmul.bf16 %v5690_v30, %v5670_v3 }
 0x310   :  { %v532_v32 = vpop.f32.mrb[8].mxu1  ;;  %v591_v34 = vpop.f32.mrb[20].mxu0  ;;  %v614_v35 = vmul.bf16 %v5692_v31, %v5668_v1  ;;  %v729_v8 = vmul.bf16 %v5692_v31, %v5670_v3  ;;  %v1161_v20 = vmul.bf16 %v5692_v31, %v5756_v19 }
 0x311   :  { %v533_v40 = vadd.f32 %v532_v32, %v5651_v37  ;;  %v534_v41 = vpop.f32.mrb[9].mxu1  ;;  %v4318_v45 = vpop.f32.mrb[21].mxu0  ;;  %v592_v51 = vadd.f32 %v591_v34, %v5654_v39 }
 0x312   :  { %v536_v47 = vpop.f32.mrb[10].mxu1  ;;  %v594_v48 = vpop.f32.mrb[22].mxu0  ;;  %4323 = vmatpush3.bf16.xpose.msra.mxu1 %v614_v35  ;;  %4341 = vmatpush3.bf16.xpose.msra.mxu0 %v729_v8  ;;  %v535_v58 = vadd.f32 %v534_v41, %v5657_v44 }
 0x313   :  { %v537_v52 = vadd.f32 %v536_v47, %v5651_v37  ;;  %v595_v53 = vadd.f32 %v594_v48, %v5654_v39  ;;  %v538_v56 = vpop.f32.mrb[11].mxu1  ;;  %v4319_v57 = vpop.f32.mrb[23].mxu0  ;;  %4324 = vmatprep.subr.bf16.mxu1 %v5315_v0  ;;  %4342 = vmatprep.subr.bf16.mxu0 %v5315_v0  ;;  %v602_v61 = vmul.f32 0.35355338, %v533_v40 }
 0x314   :  { %v539_v59 = vadd.f32 %v538_v56, %v5657_v44  ;;  %v5719_v44 = vpack.c.bf16 %v3839_v10, %v3839_v10 }
 0x315   :  { %v603_v62 = vmul.f32 0.35355338, %v537_v52  ;;  %v5710_v42 = vpack.c.bf16 %v595_v53, %v592_v51  ;;  %v5785_v51 = vld [vmem:[%s7007_s2] sm:$0xff]  ;;  %v5790_v53 = vld [vmem:[%s7007_s2 + $0x8] sm:$0xff] }
 0x316   :  { %v609_v4 = vpack.c.bf16 %v539_v59, %v535_v58  ;;  %v974_v13 = vmul.bf16 %v5674_v7, %v5719_v44  ;;  %v975_v15 = vmul.bf16 %v5692_v31, %v5719_v44 }
 0x317   :  { %v606_v37 = vpack.c.bf16 %v603_v62, %v602_v61  ;;  %v841_v14 = vmul.bf16 %v5710_v42, %v5670_v3 }
 0x318   :  { %v615_v39 = vmul.bf16 %v609_v4, %v5668_v1  ;;  %v730_v5 = vmul.bf16 %v609_v4, %v5670_v3  ;;  %v976_v17 = vmul.bf16 %v609_v4, %v5719_v44  ;;  %v1162_v7 = vmul.bf16 %v609_v4, %v5756_v19 }
 0x31a   :  { %4325 = vmatpush3.bf16.xpose.msra.mxu1 %v615_v39  ;;  %4343 = vmatpush3.bf16.xpose.msra.mxu0 %v730_v5 }
 0x31b   :  { %4356 = vmatprep.subr.bf16.mxu1 %v5315_v0  ;;  %4392 = vmatprep.subr.bf16.mxu0 %v5315_v0 }
 0x321   :  { %4327 = vmatmul.mubr.bf16.vlgmr.msra.gmra.mrb[12].mxu1 %v5676_v9  ;;  %4345 = vmatmul.mubr.bf16.vlgmr.msra.gmra.mrb[24].mxu0 %v5676_v9 }
 0x322   :  { %4357 = vmatpush3.bf16.msra.mxu1 %v839_v11  ;;  %4393 = vmatpush3.bf16.xpose.msra.mxu0 %v974_v13 }
 0x323   :  { %4358 = vmatprep.subr.bf16.mxu1 %v5315_v0  ;;  %4330 = vmatprep.mubr.msk.bf16.mxu1 %vm5316_vm0, %v5315_v0 }
 0x324   :  { %4348 = vmatprep.mubr.msk.bf16.mxu0 %vm5316_vm0, %v5315_v0  ;;  %4394 = vmatprep.subr.bf16.mxu0 %v5315_v0 }
 0x326   :  { %4359 = vmatpush3.bf16.msra.mxu1 %v840_v50 }
 0x327   :  { %4360 = vmatprep.subr.bf16.mxu1 %v5315_v0 }
 0x329   :  { %4331 = vmatmul.mubr.bf16.gmra.mrb[16].mxu1 %v5694_v2  ;;  %4349 = vmatmul.mubr.bf16.gmra.mrb[28].mxu0 %v5694_v2 }
 0x32a   :  { %4361 = vmatpush3.bf16.msra.mxu1 %v841_v14  ;;  %4395 = vmatpush3.bf16.xpose.msra.mxu0 %v975_v15 }
 0x32b   :  { %4334 = vmatprep.mubr.msk.bf16.mxu1 %vm5316_vm0, %v5315_v0  ;;  %4352 = vmatprep.mubr.msk.bf16.mxu0 %vm5316_vm0, %v5315_v0 }
 0x32c   :  { %4396 = vmatprep.subr.bf16.mxu0 %v5315_v0  ;;  %4374 = vmatprep.subr.bf16.mxu1 %v5315_v0 }
 0x331   :  { %4335 = vmatmul.mubr.bf16.gmra.mrb[20].mxu1 %v606_v37  ;;  %4353 = vmatmul.mubr.bf16.gmra.mrb[32].mxu0 %v606_v37 }
 0x332   :  { %4397 = vmatpush3.bf16.xpose.msra.mxu0 %v976_v17  ;;  %4398 = vmatprep.mubr.msk.bf16.mxu0 %vm5316_vm0, %v5315_v0 }
 0x333   :  { %4428 = vmatprep.subr.bf16.mxu0 %v5315_v0  ;;  %4362 = vmatprep.mubr.msk.bf16.mxu1 %vm5316_vm0, %v5315_v0 }
 0x339   :  { %4399 = vmatmul.mubr.bf16.vlgmr.msra.gmra.mrb[36].mxu0 %v5676_v9 }
 0x33a   :  { %4429 = vmatpush3.bf16.xpose.msra.mxu0 %v1160_v43  ;;  %4402 = vmatprep.mubr.msk.bf16.mxu0 %vm5316_vm0, %v5315_v0  ;;  %v5805_v43 = vld [vmem:[%s7007_s2 + $0x10] sm:$0xff] }
 0x33b   :  { %4430 = vmatprep.subr.bf16.mxu0 %v5315_v0 }
 0x341   :  { %4403 = vmatmul.mubr.bf16.gmra.mrb[40].mxu0 %v5694_v2 }
 0x342   :  { %4431 = vmatpush3.bf16.xpose.msra.mxu0 %v1161_v20  ;;  %4406 = vmatprep.mubr.msk.bf16.mxu0 %vm5316_vm0, %v5315_v0 }
 0x343   :  { %4432 = vmatprep.subr.bf16.mxu0 %v5315_v0 }
 0x349   :  { %4407 = vmatmul.mubr.bf16.gmra.mrb[44].mxu0 %v606_v37 }
 0x34a   :  { %4433 = vmatpush3.bf16.xpose.msra.mxu0 %v1162_v7  ;;  %4434 = vmatprep.mubr.msk.bf16.mxu0 %vm5316_vm0, %v5315_v0 }
 0x34b   :  { %4464 = vmatprep.subr.bf16.mxu0 %v5315_v0 }
 0x351   :  { %4435 = vmatmul.mubr.bf16.vlgmr.msra.gmra.mrb[48].mxu0 %v5676_v9 }
 0x352   :  { %4438 = vmatprep.mubr.msk.bf16.mxu0 %vm5316_vm0, %v5315_v0 }
 0x359   :  { %4439 = vmatmul.mubr.bf16.gmra.mrb[52].mxu0 %v5694_v2 }
 0x35a   :  { %4442 = vmatprep.mubr.msk.bf16.mxu0 %vm5316_vm0, %v5315_v0 }
 0x361   :  { %4443 = vmatmul.mubr.bf16.gmra.mrb[56].mxu0 %v606_v37 }
 0x362   :  { %4480 = vmatprep.mubr.msk.bf16.mxu0 %vm5316_vm0, %v5315_v0 }
 0x3f4   :  { %v650_v22 = vpop.f32.mrb[12].mxu1  ;;  %v765_v55 = vpop.f32.mrb[24].mxu0 }
 0x3f5   :  { %v788_v23 = vmul.f32 1.442695, %v765_v55  ;;  %v4328_v25 = vpop.f32.mrb[13].mxu1  ;;  %v4346_v26 = vpop.f32.mrb[25].mxu0  ;;  %v673_v56 = vmul.f32 1.442695, %v650_v22 }
 0x3f6   :  { %v653_v27 = vpop.f32.mrb[14].mxu1  ;;  %v768_v28 = vpop.f32.mrb[26].mxu0  ;;  %v5810_v22 = vld [vmem:[%s7007_s2 + $0x18] sm:$0xff] }
 0x3f7   :  { %v790_v9 = vmul.f32 1.442695, %v768_v28  ;;  %v4329_v60 = vpop.f32.mrb[15].mxu1  ;;  %v4347_v31 = vpop.f32.mrb[27].mxu0  ;;  %5043 = vpow2.f32 %v788_v23  ;;  %v675_v62 = vmul.f32 1.442695, %v653_v27 }
 0x3f9   :  { %5045 = vpow2.f32 %v790_v9 }
 0x3fc   :  { %v658_v2 = vpop.f32.mrb[16].mxu1  ;;  %v773_v32 = vpop.f32.mrb[28].mxu0 }
 0x3fd   :  { %v792_v34 = vmul.f32 1.442695, %v773_v32  ;;  %v4332_v35 = vpop.f32.mrb[17].mxu1  ;;  %v4350_v8 = vpop.f32.mrb[29].mxu0  ;;  %v677_v15 = vmul.f32 1.442695, %v658_v2 }
 0x3fe   :  { %v661_v40 = vpop.f32.mrb[18].mxu1  ;;  %v776_v41 = vpop.f32.mrb[30].mxu0  ;;  %v5825_v35 = vld [vmem:[%s7007_s2 + $0x20] sm:$0xff] }
 0x3ff   :  { %v794_v45 = vmul.f32 1.442695, %v776_v41  ;;  %v4333_v47 = vpop.f32.mrb[19].mxu1  ;;  %v4351_v48 = vpop.f32.mrb[31].mxu0  ;;  %5047 = vpow2.f32 %v792_v34  ;;  %v679_v7 = vmul.f32 1.442695, %v661_v40 }
 0x401   :  { %v5044_v52 = vpop.eup %5043  ;;  %5049 = vpow2.f32 %v794_v45  ;;  %v5830_v45 = vld [vmem:[%s7007_s2 + $0x28] sm:$0xff] }
 0x402   :  { %v5793_v57 = vmul.f32 %v5044_v52, %v5785_v51  ;;  %5051 = vpow2.f32 %v673_v56 }
 0x403   :  { %v5046_v58 = vpop.eup %5045 }
 0x404   :  { %v666_v59 = vpop.f32.mrb[20].mxu1  ;;  %v781_v61 = vpop.f32.mrb[32].mxu0  ;;  %v806_v39 = vsel %vm691_vm10, %v5793_v57, 0.0  ;;  %v5798_v5 = vmul.f32 %v5046_v58, %v5790_v53 }
 0x405   :  { %v796_v4 = vmul.f32 1.442695, %v781_v61  ;;  %v4336_v37 = vpop.f32.mrb[21].mxu1  ;;  %807 = vadd.xlane.f32.xlu0 %v806_v39  ;;  %v4354_v10 = vpop.f32.mrb[33].mxu0  ;;  %v681_v25 = vmul.f32 1.442695, %v666_v59 }
 0x406   :  { %v669_v11 = vpop.f32.mrb[22].mxu1  ;;  %v784_v13 = vpop.f32.mrb[34].mxu0  ;;  %v809_v14 = vsel %vm691_vm10, %v5798_v5, 0.0 }
 0x407   :  { %v4337_v50 = vpop.f32.mrb[23].mxu1  ;;  %5053 = vpow2.f32 %v796_v4  ;;  %v798_v17 = vmul.f32 1.442695, %v784_v13  ;;  %810 = vadd.xlane.f32.xlu1 %v809_v14  ;;  %v4355_v18 = vpop.f32.mrb[35].mxu0  ;;  %v683_v60 = vmul.f32 1.442695, %v669_v11 }
 0x408   :  { %5055 = vpow2.f32 %v675_v62 }
 0x409   :  { %v5048_v20 = vpop.eup %5047  ;;  %5057 = vpow2.f32 %v798_v17 }
 0x40a   :  { %v5813_v55 = vmul.f32 %v5048_v20, %v5805_v43  ;;  %5059 = vpow2.f32 %v677_v15 }
 0x40b   :  { %v5050_v23 = vpop.eup %5049  ;;  %5061 = vpow2.f32 %v679_v7 }
 0x40c   :  { %v1011_v26 = vpop.f32.mrb[36].mxu0  ;;  %v812_v27 = vsel %vm691_vm10, %v5813_v55, 0.0  ;;  %v5818_v9 = vmul.f32 %v5050_v23, %v5810_v22  ;;  %5063 = vpow2.f32 %v681_v25  ;;  %v5052_v8 = vpop.eup %5051 }
 0x40d   :  { %v4400_v28 = vpop.f32.mrb[37].mxu0  ;;  %813 = vadd.xlane.f32.xlu0 %v812_v27  ;;  %v1034_v34 = vmul.f32 1.442695, %v1011_v26  ;;  %5065 = vpow2.f32 %v683_v60  ;;  %v5841_v4 = vmul.f32 %v5052_v8, %v5785_v51 }
 0x40e   :  { %v1014_v31 = vpop.f32.mrb[38].mxu0  ;;  %v815_v2 = vsel %vm691_vm10, %v5818_v9, 0.0 }
 0x40f   :  { %v4401_v32 = vpop.f32.mrb[39].mxu0  ;;  %816 = vadd.xlane.f32.xlu1 %v815_v2  ;;  %v1036_v41 = vmul.f32 1.442695, %v1014_v31  ;;  %5067 = vpow2.f32 %v1034_v34  ;;  %v692_v15 = vsel %vm691_vm10, %v5841_v4, 0.0 }
 0x411   :  { %v5054_v40 = vpop.eup %5053  ;;  %5069 = vpow2.f32 %v1036_v41 }
 0x412   :  { %v5056_v47 = vpop.eup %5055  ;;  %v5833_v48 = vmul.f32 %v5054_v40, %v5825_v35 }
 0x413   :  { %v5058_v52 = vpop.eup %5057  ;;  %v5846_v50 = vmul.f32 %v5056_v47, %v5790_v53 }
 0x414   :  { %v1019_v56 = vpop.f32.mrb[40].mxu0  ;;  %v818_v59 = vsel %vm691_vm10, %v5833_v48, 0.0  ;;  %v5838_v62 = vmul.f32 %v5058_v52, %v5830_v45  ;;  %v5060_v37 = vpop.eup %5059 }
 0x415   :  { %v1038_v58 = vmul.f32 1.442695, %v1019_v56  ;;  %v4404_v61 = vpop.f32.mrb[41].mxu0  ;;  %819 = vadd.xlane.f32.xlu0 %v818_v59  ;;  %v5062_v14 = vpop.eup %5061  ;;  %v5851_v17 = vmul.f32 %v5060_v37, %v5805_v43  ;;  %v695_v20 = vsel %vm691_vm10, %v5846_v50, 0.0 }
 0x416   :  { %v1022_v39 = vpop.f32.mrb[42].mxu0  ;;  %v821_v11 = vsel %vm691_vm10, %v5838_v62, 0.0  ;;  %v5064_v18 = vpop.eup %5063  ;;  %v5856_v7 = vmul.f32 %v5062_v14, %v5810_v22 }
 0x417   :  { %v1040_v10 = vmul.f32 1.442695, %v1022_v39  ;;  %v4405_v13 = vpop.f32.mrb[43].mxu0  ;;  %5071 = vpow2.f32 %v1038_v58  ;;  %822 = vadd.xlane.f32.xlu1 %v821_v11  ;;  %v5066_v23 = vpop.eup %5065  ;;  %v698_v27 = vsel %vm691_vm10, %v5851_v17, 0.0  ;;  %v5861_v60 = vmul.f32 %v5064_v18, %v5825_v35 }
 0x418   :  { %v701_v34 = vsel %vm691_vm10, %v5856_v7, 0.0  ;;  %v5866_v40 = vmul.f32 %v5066_v23, %v5830_v45 }
 0x419   :  { %5073 = vpow2.f32 %v1040_v10  ;;  %693 = vadd.xlane.f32.xlu0 %v692_v15  ;;  %v5068_v31 = vpop.eup %5067  ;;  %v704_v47 = vsel %vm691_vm10, %v5861_v60, 0.0 }
 0x41a   :  { %v5871_v52 = vmul.f32 %v5068_v31, %v5785_v51  ;;  %v707_v58 = vsel %vm691_vm10, %v5866_v40, 0.0 }
 0x41b   :  { %696 = vadd.xlane.f32.xlu1 %v695_v20  ;;  %v5070_v41 = vpop.eup %5069 }
 0x41c   :  { %v1027_v25 = vpop.f32.mrb[44].mxu0  ;;  %v5876_v59 = vmul.f32 %v5070_v41, %v5790_v53  ;;  %v1052_v10 = vsel %vm691_vm10, %v5871_v52, 0.0 }
 0x41d   :  { %v1042_v26 = vmul.f32 1.442695, %v1027_v25  ;;  %v4408_v28 = vpop.f32.mrb[45].mxu0  ;;  %699 = vadd.xlane.f32.xlu0 %v698_v27 }
 0x41e   :  { %v1030_v2 = vpop.f32.mrb[46].mxu0  ;;  %v1055_v18 = vsel %vm691_vm10, %v5876_v59, 0.0 }
 0x41f   :  { %5075 = vpow2.f32 %v1042_v26  ;;  %v1044_v32 = vmul.f32 1.442695, %v1030_v2  ;;  %v4409_v8 = vpop.f32.mrb[47].mxu0  ;;  %702 = vadd.xlane.f32.xlu1 %v701_v34 }
 0x421   :  { %5077 = vpow2.f32 %v1044_v32  ;;  %v5072_v56 = vpop.eup %5071  ;;  %705 = vadd.xlane.f32.xlu0 %v704_v47 }
 0x422   :  { %v5881_v13 = vmul.f32 %v5072_v56, %v5805_v43 }
 0x423   :  { %v5074_v61 = vpop.eup %5073  ;;  %708 = vadd.xlane.f32.xlu1 %v707_v58 }
 0x424   :  { %v1197_v37 = vpop.f32.mrb[48].mxu0  ;;  %v5886_v23 = vmul.f32 %v5074_v61, %v5810_v22  ;;  %v1058_v26 = vsel %vm691_vm10, %v5881_v13, 0.0 }
 0x425   :  { %v1220_v39 = vmul.f32 1.442695, %v1197_v37  ;;  %v4436_v11 = vpop.f32.mrb[49].mxu0  ;;  %1053 = vadd.xlane.f32.xlu0 %v1052_v10 }
 0x426   :  { %v1200_v14 = vpop.f32.mrb[50].mxu0  ;;  %v1061_v31 = vsel %vm691_vm10, %v5886_v23, 0.0 }
 0x427   :  { %5079 = vpow2.f32 %v1220_v39  ;;  %v1222_v15 = vmul.f32 1.442695, %v1200_v14  ;;  %v4437_v20 = vpop.f32.mrb[51].mxu0  ;;  %1056 = vadd.xlane.f32.xlu1 %v1055_v18 }
 0x429   :  { %v5076_v25 = vpop.eup %5075  ;;  %5081 = vpow2.f32 %v1222_v15  ;;  %1059 = vadd.xlane.f32.xlu0 %v1058_v26 }
 0x42a   :  { %v5891_v27 = vmul.f32 %v5076_v25, %v5825_v35 }
 0x42b   :  { %v5078_v28 = vpop.eup %5077  ;;  %1062 = vadd.xlane.f32.xlu1 %v1061_v31 }
 0x42c   :  { %v1205_v2 = vpop.f32.mrb[52].mxu0  ;;  %v1064_v32 = vsel %vm691_vm10, %v5891_v27, 0.0  ;;  %v5898_v34 = vmul.f32 %v5078_v28, %v5830_v45 }
 0x42d   :  { %v1224_v8 = vmul.f32 1.442695, %v1205_v2  ;;  %v4440_v41 = vpop.f32.mrb[53].mxu0  ;;  %1065 = vadd.xlane.f32.xlu0 %v1064_v32 }
 0x42e   :  { %v1208_v47 = vpop.f32.mrb[54].mxu0  ;;  %v1067_v56 = vsel %vm691_vm10, %v5898_v34, 0.0 }
 0x42f   :  { %5083 = vpow2.f32 %v1224_v8  ;;  %v1226_v58 = vmul.f32 1.442695, %v1208_v47  ;;  %v4441_v61 = vpop.f32.mrb[55].mxu0  ;;  %1068 = vadd.xlane.f32.xlu1 %v1067_v56 }
 0x431   :  { %v5080_v37 = vpop.eup %5079  ;;  %5085 = vpow2.f32 %v1226_v58 }
 0x432   :  { %v5903_v39 = vmul.f32 %v5080_v37, %v5785_v51  ;;  %v4943_v37 = vld [vmem:[%s7008_s7] sm:$0xff]  }
 0x433   :  { %v5082_v10 = vpop.eup %5081  ;;  %4465 = vmatpush3.bf16.msra.mxu0 %v4943_v37 }
 0x434   :  { %v1213_v11 = vpop.f32.mrb[56].mxu0  ;;  %v1238_v14 = vsel %vm691_vm10, %v5903_v39, 0.0  ;;  %v5908_v15 = vmul.f32 %v5082_v10, %v5790_v53  ;;  %4466 = vmatprep.subr.bf16.mxu0 %v5315_v0  ;;  %v4946_v10 = vld [vmem:[%s7008_s7 + $0x18] sm:$0xff]  }
 0x435   :  { %v1228_v18 = vmul.f32 1.442695, %v1213_v11  ;;  %1239 = vadd.xlane.f32.xlu0 %v1238_v14  ;;  %v4444_v20 = vpop.f32.mrb[57].mxu0  ;;  %v4947_v11 = vld [vmem:[%s7008_s7 + $0x20] sm:$0xff]   ;;  %v4948_v14 = vld [vmem:[%s7008_s7 + $0x28] sm:$0xff]  }
 0x436   :  { %v1216_v25 = vpop.f32.mrb[58].mxu0  ;;  %v1241_v26 = vsel %vm691_vm10, %v5908_v15, 0.0  ;;  %v4949_v20 = vld [vmem:[%s7008_s7 + $0x30] sm:$0xff]  }
 0x437   :  { %5087 = vpow2.f32 %v1228_v18  ;;  %v1230_v28 = vmul.f32 1.442695, %v1216_v25  ;;  %1242 = vadd.xlane.f32.xlu1 %v1241_v26  ;;  %v4445_v51 = vpop.f32.mrb[59].mxu0 }
 0x439   :  { %v5084_v31 = vpop.eup %5083  ;;  %5089 = vpow2.f32 %v1230_v28 }
 0x43a   :  { %v5913_v2 = vmul.f32 %v5084_v31, %v5805_v43 }
 0x43b   :  { %v5086_v32 = vpop.eup %5085 }
 0x43c   :  { %v1244_v53 = vsel %vm691_vm10, %v5913_v2, 0.0  ;;  %v5918_v8 = vmul.f32 %v5086_v32, %v5810_v22 }
 0x43d   :  { %1245 = vadd.xlane.f32.xlu0 %v1244_v53 }
 0x43e   :  { %v1247_v41 = vsel %vm691_vm10, %v5918_v8, 0.0 }
 0x43f   :  { %1248 = vadd.xlane.f32.xlu1 %v1247_v41 }
 0x441   :  { %v5088_v47 = vpop.eup %5087 }
 0x442   :  { %v5923_v56 = vmul.f32 %v5088_v47, %v5825_v35  ;;  %v4944_v35 = vld [vmem:[%s7008_s7 + $0x8] sm:$0xff]  }
 0x443   :  { %v5090_v58 = vpop.eup %5089  ;;  %4467 = vmatpush3.bf16.msra.mxu0 %v4944_v35 }
 0x444   :  { %v1250_v43 = vsel %vm691_vm10, %v5923_v56, 0.0  ;;  %v5928_v61 = vmul.f32 %v5090_v58, %v5830_v45  ;;  %v4945_v45 = vld [vmem:[%s7008_s7 + $0x10] sm:$0xff]   ;;  %4468 = vmatprep.subr.bf16.mxu0 %v5315_v0  ;;  %v725_v58 = vmul.bf16 %v5672_v6, %v5668_v1 }
 0x445   :  { %1251 = vadd.xlane.f32.xlu0 %v1250_v43 }
 0x446   :  { %v1253_v22 = vsel %vm691_vm10, %v5928_v61, 0.0 }
 0x447   :  { %1254 = vadd.xlane.f32.xlu1 %v1253_v22  ;;  %4469 = vmatpush3.bf16.msra.mxu0 %v4945_v45 }
 0x448   :  { %4470 = vmatprep.subr.bf16.mxu0 %v5315_v0 }
 0x44b   :  { %4471 = vmatpush3.bf16.msra.mxu0 %v4946_v10 }
 0x44c   :  { %4472 = vmatprep.subr.bf16.mxu0 %v5315_v0 }
 0x44f   :  { %4473 = vmatpush3.bf16.msra.mxu0 %v4947_v11 }
 0x450   :  { %4474 = vmatprep.subr.bf16.mxu0 %v5315_v0 }
 0x453   :  { %4475 = vmatpush3.bf16.msra.mxu0 %v4948_v14  ;;  %v727_v14 = vmul.bf16 %v5710_v42, %v5668_v1 }
 0x454   :  { %4476 = vmatprep.subr.bf16.mxu0 %v5315_v0 }
 0x457   :  { %4477 = vmatpush3.bf16.msra.mxu0 %v4949_v20 }
 0x458   :  { %4478 = vmatprep.subr.bf16.mxu0 %v5315_v0 }
 0x492   :  { %v808_v18 = vpop.xlane.xlu0 %807 }
 0x493   :  { %5091 = vrcp.f32 %v808_v18 }
 0x494   :  { %v811_v25 = vpop.xlane.xlu1 %810 }
 0x495   :  { %5093 = vrcp.f32 %v811_v25 }
 0x49a   :  { %v814_v26 = vpop.xlane.xlu0 %813 }
 0x49b   :  { %5095 = vrcp.f32 %v814_v26 }
 0x49c   :  { %v817_v28 = vpop.xlane.xlu1 %816 }
 0x49d   :  { %v5092_v51 = vpop.eup %5091  ;;  %5097 = vrcp.f32 %v817_v28 }
 0x49e   :  { %v830_v32 = vmul.f32 %v5092_v51, %v5793_v57 }
 0x49f   :  { %v5094_v31 = vpop.eup %5093 }
 0x4a0   :  { %v831_v53 = vmul.f32 %v5094_v31, %v5798_v5  ;;  %v726_v5 = vmul.bf16 %v5690_v30, %v5668_v1 }
 0x4a2   :  { %v836_v41 = vpack.c.bf16 %v831_v53, %v830_v32  ;;  %v820_v47 = vpop.xlane.xlu0 %819 }
 0x4a3   :  { %5099 = vrcp.f32 %v820_v47 }
 0x4a4   :  { %4363 = vmatmul.mubr.msk.bf16.vlgmr.msra.gmra.mrb[24].mxu1 %vm691_vm10, %v836_v41  ;;  %v823_v43 = vpop.xlane.xlu1 %822 }
 0x4a5   :  { %v5096_v22 = vpop.eup %5095  ;;  %4375 = vmatpush3.bf16.msra.mxu1 %v725_v58  ;;  %5101 = vrcp.f32 %v823_v43  ;;  %4366 = vmatprep.mubr.msk.bf16.mxu1 %vm5316_vm0, %v5315_v0 }
 0x4a6   :  { %4376 = vmatprep.subr.bf16.mxu1 %v5315_v0  ;;  %v694_v37 = vpop.xlane.xlu0 %693  ;;  %v832_v45 = vmul.f32 %v5096_v22, %v5813_v55 }
 0x4a7   :  { %v5098_v57 = vpop.eup %5097 }
 0x4a8   :  { %v697_v35 = vpop.xlane.xlu1 %696  ;;  %v833_v10 = vmul.f32 %v5098_v57, %v5818_v9 }
 0x4a9   :  { %4377 = vmatpush3.bf16.msra.mxu1 %v726_v5  ;;  %5103 = vrcp.f32 %v697_v35 }
 0x4aa   :  { %4378 = vmatprep.subr.bf16.mxu1 %v5315_v0  ;;  %v837_v11 = vpack.c.bf16 %v833_v10, %v832_v45  ;;  %5105 = vrcp.f32 %v694_v37  ;;  %v700_v9 = vpop.xlane.xlu0 %699  ;;  %v1087_v45 = vmul.bf16 %v5710_v42, %v5719_v44 }
 0x4ac   :  { %4367 = vmatmul.mubr.msk.bf16.gmra.mrb[28].mxu1 %vm691_vm10, %v837_v11  ;;  %v703_v20 = vpop.xlane.xlu1 %702 }
 0x4ad   :  { %v5100_v18 = vpop.eup %5099  ;;  %4379 = vmatpush3.bf16.msra.mxu1 %v727_v14  ;;  %4370 = vmatprep.mubr.msk.bf16.mxu1 %vm5316_vm0, %v5315_v0  ;;  %5107 = vrcp.f32 %v703_v20 }
 0x4ae   :  { %4410 = vmatprep.subr.bf16.mxu1 %v5315_v0  ;;  %v834_v25 = vmul.f32 %v5100_v18, %v5833_v48  ;;  %5109 = vrcp.f32 %v700_v9  ;;  %v706_v47 = vpop.xlane.xlu0 %705 }
 0x4af   :  { %v5102_v55 = vpop.eup %5101 }
 0x4b0   :  { %v835_v26 = vmul.f32 %v5102_v55, %v5838_v62  ;;  %v709_v53 = vpop.xlane.xlu1 %708  ;;  %v1085_v62 = vmul.bf16 %v5672_v6, %v5719_v44 }
 0x4b1   :  { %5111 = vrcp.f32 %v709_v53 }
 0x4b2   :  { %v838_v28 = vpack.c.bf16 %v835_v26, %v834_v25  ;;  %5113 = vrcp.f32 %v706_v47  ;;  %v1054_v57 = vpop.xlane.xlu0 %1053 }
 0x4b3   :  { %v5104_v51 = vpop.eup %5103 }
 0x4b4   :  { %4371 = vmatmul.mubr.msk.bf16.gmra.mrb[32].mxu1 %vm691_vm10, %v838_v28  ;;  %v5106_v31 = vpop.eup %5105  ;;  %v717_v32 = vmul.f32 %v5104_v51, %v5846_v50  ;;  %v1057_v22 = vpop.xlane.xlu1 %1056  ;;  %v1086_v50 = vmul.bf16 %v5690_v30, %v5719_v44 }
 0x4b5   :  { %4380 = vmatprep.mubr.msk.bf16.mxu1 %vm5316_vm0, %v5315_v0  ;;  %v716_v41 = vmul.f32 %v5106_v31, %v5841_v4  ;;  %5115 = vrcp.f32 %v1057_v22 }
 0x4b6   :  { %5117 = vrcp.f32 %v1054_v57  ;;  %v1060_v11 = vpop.xlane.xlu0 %1059 }
 0x4b7   :  { %v722_v48 = vpack.c.bf16 %v717_v32, %v716_v41  ;;  %v5108_v58 = vpop.eup %5107 }
 0x4b8   :  { %v5110_v43 = vpop.eup %5109  ;;  %v719_v4 = vmul.f32 %v5108_v58, %v5856_v7  ;;  %v1063_v7 = vpop.xlane.xlu1 %1062 }
 0x4b9   :  { %v718_v5 = vmul.f32 %v5110_v43, %v5851_v17  ;;  %5119 = vrcp.f32 %v1063_v7 }
 0x4ba   :  { %5121 = vrcp.f32 %v1060_v11  ;;  %v1066_v26 = vpop.xlane.xlu0 %1065 }
 0x4bb   :  { %v723_v37 = vpack.c.bf16 %v719_v4, %v718_v5  ;;  %v5112_v35 = vpop.eup %5111 }
 0x4bc   :  { %4381 = vmatmul.mubr.msk.bf16.vlgmr.msra.gmra.mrb[24].mxu1 %vm691_vm10, %v722_v48  ;;  %v5114_v10 = vpop.eup %5113  ;;  %v721_v17 = vmul.f32 %v5112_v35, %v5866_v40  ;;  %v1069_v25 = vpop.xlane.xlu1 %1068  ;;  %v1273_v48 = vmul.bf16 %v5710_v42, %v5756_v19 }
 0x4bd   :  { %4411 = vmatpush3.bf16.msra.mxu1 %v1085_v62  ;;  %4384 = vmatprep.mubr.msk.bf16.mxu1 %vm5316_vm0, %v5315_v0  ;;  %v720_v14 = vmul.f32 %v5114_v10, %v5861_v60  ;;  %5123 = vrcp.f32 %v1069_v25  ;;  %v1271_v60 = vmul.bf16 %v5672_v6, %v5756_v19 }
 0x4be   :  { %4412 = vmatprep.subr.bf16.mxu1 %v5315_v0  ;;  %5125 = vrcp.f32 %v1066_v26 }
 0x4bf   :  { %v724_v18 = vpack.c.bf16 %v721_v17, %v720_v14  ;;  %v5116_v20 = vpop.eup %5115 }
 0x4c0   :  { %v5118_v55 = vpop.eup %5117  ;;  %v1077_v9 = vmul.f32 %v5116_v20, %v5876_v59  ;;  %v1272_v59 = vmul.bf16 %v5690_v30, %v5756_v19 }
 0x4c1   :  { %4413 = vmatpush3.bf16.msra.mxu1 %v1086_v50  ;;  %v1076_v40 = vmul.f32 %v5118_v55, %v5871_v52 }
 0x4c2   :  { %4414 = vmatprep.subr.bf16.mxu1 %v5315_v0  ;;  %v1240_v53 = vpop.xlane.xlu0 %1239 }
 0x4c3   :  { %v1082_v28 = vpack.c.bf16 %v1077_v9, %v1076_v40  ;;  %v5120_v51 = vpop.eup %5119 }
 0x4c4   :  { %4385 = vmatmul.mubr.msk.bf16.gmra.mrb[28].mxu1 %vm691_vm10, %v723_v37  ;;  %v5122_v31 = vpop.eup %5121  ;;  %v1243_v32 = vpop.xlane.xlu1 %1242  ;;  %v1079_v52 = vmul.f32 %v5120_v51, %v5886_v23 }
 0x4c5   :  { %4415 = vmatpush3.bf16.msra.mxu1 %v1087_v45  ;;  %4388 = vmatprep.mubr.msk.bf16.mxu1 %vm5316_vm0, %v5315_v0  ;;  %v1078_v41 = vmul.f32 %v5122_v31, %v5881_v13  ;;  %5127 = vrcp.f32 %v1243_v32  ;;  %v3884_v32 = vld [vmem:[%s7009_s8] ss:$0 sm:$0xff] }
 0x4c6   :  { %4446 = vmatprep.subr.bf16.mxu1 %v5315_v0  ;;  %5129 = vrcp.f32 %v1240_v53 }
 0x4c7   :  { %v1083_v6 = vpack.c.bf16 %v1079_v52, %v1078_v41  ;;  %v5124_v47 = vpop.eup %5123 }
 0x4c8   :  { %v5126_v58 = vpop.eup %5125  ;;  %v1081_v13 = vmul.f32 %v5124_v47, %v5898_v34 }
 0x4c9   :  { %v1080_v62 = vmul.f32 %v5126_v58, %v5891_v27 }
 0x4ca   :  { %v1246_v23 = vpop.xlane.xlu0 %1245 }
 0x4cb   :  { %v1084_v43 = vpack.c.bf16 %v1081_v13, %v1080_v62 }
 0x4cc   :  { %4389 = vmatmul.mubr.msk.bf16.gmra.mrb[32].mxu1 %vm691_vm10, %v724_v18  ;;  %v1249_v30 = vpop.xlane.xlu1 %1248 }
 0x4cd   :  { %4416 = vmatprep.mubr.msk.bf16.mxu1 %vm5316_vm0, %v5315_v0  ;;  %5131 = vrcp.f32 %v1249_v30 }
 0x4ce   :  { %5133 = vrcp.f32 %v1246_v23 }
 0x4cf   :  { %v5128_v22 = vpop.eup %5127 }
 0x4d0   :  { %v5130_v42 = vpop.eup %5129  ;;  %v1263_v4 = vmul.f32 %v5128_v22, %v5908_v15 }
 0x4d1   :  { %v1262_v34 = vmul.f32 %v5130_v42, %v5903_v39 }
 0x4d2   :  { %v1252_v57 = vpop.xlane.xlu0 %1251 }
 0x4d3   :  { %v1268_v5 = vpack.c.bf16 %v1263_v4, %v1262_v34 }
 0x4d4   :  { %4417 = vmatmul.mubr.msk.bf16.vlgmr.msra.gmra.mrb[24].mxu1 %vm691_vm10, %v1082_v28  ;;  %v1255_v50 = vpop.xlane.xlu1 %1254 }
 0x4d5   :  { %4447 = vmatpush3.bf16.msra.mxu1 %v1271_v60  ;;  %4420 = vmatprep.mubr.msk.bf16.mxu1 %vm5316_vm0, %v5315_v0  ;;  %5135 = vrcp.f32 %v1255_v50 }
 0x4d6   :  { %4448 = vmatprep.subr.bf16.mxu1 %v5315_v0  ;;  %5137 = vrcp.f32 %v1252_v57 }
 0x4d7   :  { %v5132_v37 = vpop.eup %5131 }
 0x4d8   :  { %v5134_v27 = vpop.eup %5133  ;;  %v1265_v35 = vmul.f32 %v5132_v37, %v5918_v8 }
 0x4d9   :  { %4449 = vmatpush3.bf16.msra.mxu1 %v1272_v59  ;;  %v1264_v45 = vmul.f32 %v5134_v27, %v5913_v2  ;;  %v4950_v2 = vld [vmem:[%s7008_s7 + $0x38] sm:$0xff]   ;;  %v4952_v27 = vld [vmem:[%s7010_s9 + $0x8] sm:$0xff]  }
 0x4da   :  { %4450 = vmatprep.subr.bf16.mxu1 %v5315_v0  ;;  %4479 = vmatpush3.bf16.msra.mxu0 %v4950_v2 }
 0x4db   :  { %v1269_v10 = vpack.c.bf16 %v1265_v35, %v1264_v45  ;;  %4492 = vmatprep.subr.bf16.mxu0 %v5315_v0 }
 0x4dc   :  { %4421 = vmatmul.mubr.msk.bf16.gmra.mrb[28].mxu1 %vm691_vm10, %v1083_v6 }
 0x4dd   :  { %4451 = vmatpush3.bf16.msra.mxu1 %v1273_v48  ;;  %4424 = vmatprep.mubr.msk.bf16.mxu1 %vm5316_vm0, %v5315_v0 }
 0x4de   :  { %4520 = vmatprep.subr.bf16.mxu1 %v5315_v0 }
 0x4df   :  { %v5136_v15 = vpop.eup %5135 }
 0x4e0   :  { %v5138_v39 = vpop.eup %5137  ;;  %v1267_v7 = vmul.f32 %v5136_v15, %v5928_v61 }
 0x4e1   :  { %v1266_v17 = vmul.f32 %v5138_v39, %v5923_v56 }
 0x4e3   :  { %v1270_v11 = vpack.c.bf16 %v1267_v7, %v1266_v17 }
 0x4e4   :  { %4425 = vmatmul.mubr.msk.bf16.gmra.mrb[32].mxu1 %vm691_vm10, %v1084_v43 }
 0x4e5   :  { %4452 = vmatprep.mubr.msk.bf16.mxu1 %vm5316_vm0, %v5315_v0 }
 0x4ec   :  { %4453 = vmatmul.mubr.msk.bf16.vlgmr.msra.gmra.mrb[24].mxu1 %vm691_vm10, %v1268_v5 }
 0x4ed   :  { %4456 = vmatprep.mubr.msk.bf16.mxu1 %vm5316_vm0, %v5315_v0 }
 0x4f4   :  { %4457 = vmatmul.mubr.msk.bf16.gmra.mrb[28].mxu1 %vm691_vm10, %v1269_v10 }
 0x4f5   :  { %4460 = vmatprep.mubr.msk.bf16.mxu1 %vm5316_vm0, %v5315_v0 }
 0x4fc   :  { %4461 = vmatmul.mubr.msk.bf16.gmra.mrb[32].mxu1 %vm691_vm10, %v1270_v11 }
 0x4fd   :  { %4536 = vmatprep.mubr.msk.bf16.mxu1 %vm5316_vm0, %v5315_v0 }
 0x5bf   :  { %v1317_v8 = vpop.f32.mrb[24].mxu1 }
 0x5c0   :  { %v4454_v14 = vpop.f32.mrb[25].mxu1 }
 0x5c1   :  { %v1320_v18 = vpop.f32.mrb[26].mxu1 }
 0x5c2   :  { %v1346_v20 = vpack.c.bf16 %v1320_v18, %v1317_v8  ;;  %v4455_v61 = vpop.f32.mrb[27].mxu1 }
 0x5c4   :  { %4481 = vmatmul.mubr.bf16.vlgmr.msra.gmra.mrb[60].mxu0 %v1346_v20 }
 0x5c5   :  { %4484 = vmatprep.mubr.msk.bf16.mxu0 %vm5316_vm0, %v5315_v0 }
 0x5c7   :  { %v1325_v56 = vpop.f32.mrb[28].mxu1 }
 0x5c8   :  { %v4458_v55 = vpop.f32.mrb[29].mxu1 }
 0x5c9   :  { %v1328_v9 = vpop.f32.mrb[30].mxu1 }
 0x5ca   :  { %v1347_v25 = vpack.c.bf16 %v1328_v9, %v1325_v56  ;;  %v4459_v40 = vpop.f32.mrb[31].mxu1 }
 0x5cc   :  { %4485 = vmatmul.mubr.bf16.gmra.mrb[64].mxu0 %v1347_v25 }
 0x5cd   :  { %4488 = vmatprep.mubr.msk.bf16.mxu0 %vm5316_vm0, %v5315_v0 }
 0x5cf   :  { %v1333_v26 = vpop.f32.mrb[32].mxu1 }
 0x5d0   :  { %v4462_v28 = vpop.f32.mrb[33].mxu1 }
 0x5d1   :  { %v1336_v51 = vpop.f32.mrb[34].mxu1 }
 0x5d2   :  { %v1348_v60 = vpack.c.bf16 %v1336_v51, %v1333_v26  ;;  %v4463_v31 = vpop.f32.mrb[35].mxu1 }
 0x5d4   :  { %4489 = vmatmul.mubr.bf16.gmra.mrb[68].mxu0 %v1348_v60 }
 0x5d5   :  { %4508 = vmatprep.mubr.msk.bf16.mxu0 %vm5316_vm0, %v5315_v0 }
 0x697   :  { %v1454_v52 = vpop.f32.mrb[60].mxu0 }
 0x698   :  { %v1455_v59 = vadd.f32 %v3884_v32, %v1454_v52  ;;  %v4482_v53 = vpop.f32.mrb[61].mxu0 }
 0x699   :  { %v1457_v41 = vpop.f32.mrb[62].mxu0  ;;  %v4953_v53 = vld [vmem:[%s7010_s9 + $0x10] sm:$0xff]  }
 0x69a   :  { %v6061_v6 = vadd.f32 %v1455_v59, %v5454_v16  ;;  %v1458_v47 = vadd.f32 %v3884_v32, %v1457_v41  ;;  %v4483_v48 = vpop.f32.mrb[63].mxu0 }
 0x69b   :  { %v4955_v48 = vld [vmem:[%s7010_s9 + $0x20] sm:$0xff]  }
 0x69c   :  { %v6064_v58 = vadd.f32 %v1458_v47, %v5460_v21  ;;  %1483 = vadd.xlane.f32.xlu0 %v6061_v6  ;;  %v4954_v47 = vld [vmem:[%s7010_s9 + $0x18] sm:$0xff]  }
 0x69e   :  { %1485 = vadd.xlane.f32.xlu1 %v6064_v58 }
 0x69f   :  { %v1462_v30 = vpop.f32.mrb[64].mxu0 }
 0x6a0   :  { %v1463_v13 = vadd.f32 %v3884_v32, %v1462_v30  ;;  %v4486_v23 = vpop.f32.mrb[65].mxu0  ;;  %v4956_v30 = vld [vmem:[%s7010_s9 + $0x28] sm:$0xff]  }
 0x6a1   :  { %v1465_v62 = vpop.f32.mrb[66].mxu0  ;;  %v4958_v23 = vld [vmem:[%s7010_s9 + $0x38] sm:$0xff]  }
 0x6a2   :  { %v6069_v43 = vadd.f32 %v1463_v13, %v5466_v24  ;;  %v1466_v22 = vadd.f32 %v3884_v32, %v1465_v62  ;;  %v4487_v42 = vpop.f32.mrb[67].mxu0  ;;  %v4957_v13 = vld [vmem:[%s7010_s9 + $0x30] sm:$0xff]  }
 0x6a4   :  { %v6072_v16 = vadd.f32 %v1466_v22, %v5472_v29  ;;  %1487 = vadd.xlane.f32.xlu0 %v6069_v43  ;;  %v4951_v29 = vld [vmem:[%s7010_s9] sm:$0xff]  }
 0x6a5   :  { %4493 = vmatpush3.bf16.msra.mxu0 %v4951_v29 }
 0x6a6   :  { %1489 = vadd.xlane.f32.xlu1 %v6072_v16  ;;  %4494 = vmatprep.subr.bf16.mxu0 %v5315_v0 }
 0x6a7   :  { %v1470_v21 = vpop.f32.mrb[68].mxu0 }
 0x6a8   :  { %v1471_v4 = vadd.f32 %v3884_v32, %v1470_v21  ;;  %v4490_v50 = vpop.f32.mrb[69].mxu0 }
 0x6a9   :  { %v1473_v34 = vpop.f32.mrb[70].mxu0  ;;  %4495 = vmatpush3.bf16.msra.mxu0 %v4952_v27 }
 0x6aa   :  { %v6077_v57 = vadd.f32 %v1471_v4, %v5481_v33  ;;  %v1474_v5 = vadd.f32 %v3884_v32, %v1473_v34  ;;  %v4491_v37 = vpop.f32.mrb[71].mxu0  ;;  %4496 = vmatprep.subr.bf16.mxu0 %v5315_v0 }
 0x6ac   :  { %v6080_v24 = vadd.f32 %v1474_v5, %v5483_v36  ;;  %1491 = vadd.xlane.f32.xlu0 %v6077_v57 }
 0x6ad   :  { %4497 = vmatpush3.bf16.msra.mxu0 %v4953_v53 }
 0x6ae   :  { %1493 = vadd.xlane.f32.xlu1 %v6080_v24  ;;  %4498 = vmatprep.subr.bf16.mxu0 %v5315_v0 }
 0x6b1   :  { %4499 = vmatpush3.bf16.msra.mxu0 %v4954_v47 }
 0x6b2   :  { %4500 = vmatprep.subr.bf16.mxu0 %v5315_v0 }
 0x6b5   :  { %4501 = vmatpush3.bf16.msra.mxu0 %v4955_v48 }
 0x6b6   :  { %4502 = vmatprep.subr.bf16.mxu0 %v5315_v0 }
 0x6b9   :  { %4503 = vmatpush3.bf16.msra.mxu0 %v4956_v30 }
 0x6ba   :  { %4504 = vmatprep.subr.bf16.mxu0 %v5315_v0 }
 0x6bd   :  { %4505 = vmatpush3.bf16.msra.mxu0 %v4957_v13 }
 0x6be   :  { %4506 = vmatprep.subr.bf16.mxu0 %v5315_v0 }
 0x6c1   :  { %4507 = vmatpush3.bf16.msra.mxu0 %v4958_v23 }
 0x729   :  { %v1484_v33 = vpop.xlane.xlu0 %1483 }
 0x72a   :  { %v1495_v36 = vmul.f32 0.03125, %v1484_v33 }
 0x72b   :  { %v1486_v35 = vpop.xlane.xlu1 %1485 }
 0x72c   :  { %v1501_v45 = vsub.f32 %v6061_v6, %v1495_v36  ;;  %v1496_v10 = vmul.f32 0.03125, %v1486_v35  ;;  %v5307_v36 = vld [vmem:[%s7005_s4] sm:$0xf] }
 0x72d   :  { %v1558_v35 = vrot.slane %v5307_v36, %v5646_v12 }
 0x72e   :  { %v1502_v15 = vsub.f32 %v6064_v58, %v1496_v10  ;;  %v6095_v39 = vmul.f32 %v5505_v46, %v1501_v45  ;;  %v1567_v45 = vsub.s32 3, %v5613_v49 }
 0x730   :  { %v1513_v7 = vmul.f32 %v6095_v39, %v6095_v39  ;;  %v6100_v17 = vmul.f32 %v5505_v46, %v1502_v15 }
 0x731   :  { %v1488_v11 = vpop.xlane.xlu0 %1487 }
 0x732   :  { %v1497_v2 = vmul.f32 0.03125, %v1488_v11  ;;  %1519 = vadd.xlane.f32.xlu0 %v1513_v7  ;;  %v1514_v8 = vmul.f32 %v6100_v17, %v6100_v17 }
 0x733   :  { %v1490_v14 = vpop.xlane.xlu1 %1489 }
 0x734   :  { %v1503_v18 = vsub.f32 %v6069_v43, %v1497_v2  ;;  %v1498_v20 = vmul.f32 0.03125, %v1490_v14  ;;  %1521 = vadd.xlane.f32.xlu1 %v1514_v8 }
 0x736   :  { %v1504_v61 = vsub.f32 %v6072_v16, %v1498_v20  ;;  %v6107_v56 = vmul.f32 %v5505_v46, %v1503_v18  ;;  %v1568_v20 = vrot.slane %v5307_v36, %v1567_v45 }
 0x738   :  { %v1515_v55 = vmul.f32 %v6107_v56, %v6107_v56  ;;  %v6112_v9 = vmul.f32 %v5505_v46, %v1504_v61 }
 0x739   :  { %v1492_v25 = vpop.xlane.xlu0 %1491 }
 0x73a   :  { %v1499_v40 = vmul.f32 0.03125, %v1492_v25  ;;  %1523 = vadd.xlane.f32.xlu0 %v1515_v55  ;;  %v1516_v26 = vmul.f32 %v6112_v9, %v6112_v9 }
 0x73b   :  { %v1494_v28 = vpop.xlane.xlu1 %1493 }
 0x73c   :  { %v1505_v51 = vsub.f32 %v6077_v57, %v1499_v40  ;;  %v1500_v60 = vmul.f32 0.03125, %v1494_v28  ;;  %1525 = vadd.xlane.f32.xlu1 %v1516_v26 }
 0x73e   :  { %v1506_v31 = vsub.f32 %v6080_v24, %v1500_v60  ;;  %v6119_v32 = vmul.f32 %v5505_v46, %v1505_v51 }
 0x740   :  { %v1517_v52 = vmul.f32 %v6119_v32, %v6119_v32  ;;  %v6124_v59 = vmul.f32 %v5505_v46, %v1506_v31 }
 0x742   :  { %1527 = vadd.xlane.f32.xlu0 %v1517_v52  ;;  %v1518_v41 = vmul.f32 %v6124_v59, %v6124_v59 }
 0x744   :  { %1529 = vadd.xlane.f32.xlu1 %v1518_v41 }
 0x7bf   :  { %v1520_v62 = vpop.xlane.xlu0 %1519 }
 0x7c0   :  { %v1531_v22 = vmul.f32 0.03125, %v1520_v62 }
 0x7c1   :  { %v1522_v42 = vpop.xlane.xlu1 %1521 }
 0x7c2   :  { %v1537_v21 = vadd.f32 1e-06, %v1531_v22  ;;  %v1532_v4 = vmul.f32 0.03125, %v1522_v42 }
 0x7c4   :  { %5139 = vrsqrt.f32 %v1537_v21  ;;  %v1538_v50 = vadd.f32 1e-06, %v1532_v4  ;;  %v4959_v4 = vld [vmem:[%s7011_s11] sm:$0xff]  }
 0x7c5   :  { %4521 = vmatpush3.bf16.msra.mxu1 %v4959_v4 }
 0x7c6   :  { %5141 = vrsqrt.f32 %v1538_v50  ;;  %4522 = vmatprep.subr.bf16.mxu1 %v5315_v0  ;;  %v4962_v50 = vld [vmem:[%s7011_s11 + $0x18] sm:$0xff]  }
 0x7c7   :  { %v1524_v34 = vpop.xlane.xlu0 %1523 }
 0x7c8   :  { %v1533_v5 = vmul.f32 0.03125, %v1524_v34  ;;  %v4963_v34 = vld [vmem:[%s7011_s11 + $0x20] sm:$0xff]  }
 0x7c9   :  { %v1526_v37 = vpop.xlane.xlu1 %1525 }
 0x7ca   :  { %v1539_v29 = vadd.f32 1e-06, %v1533_v5  ;;  %v1534_v27 = vmul.f32 0.03125, %v1526_v37  ;;  %v4964_v5 = vld [vmem:[%s7011_s11 + $0x28] sm:$0xff]   ;;  %v4965_v37 = vld [vmem:[%s7011_s11 + $0x30] sm:$0xff]  }
 0x7cc   :  { %5143 = vrsqrt.f32 %v1539_v29  ;;  %v1540_v33 = vadd.f32 1e-06, %v1534_v27  ;;  %v4966_v29 = vld [vmem:[%s7011_s11 + $0x38] sm:$0xff]   ;;  %v3893_v27 = vld [vmem:[%s7012_s10] ss:$0 sm:$0xff] }
 0x7ce   :  { %v5140_v10 = vpop.eup %5139  ;;  %5145 = vrsqrt.f32 %v1540_v33 }
 0x7cf   :  { %v1549_v15 = vmul.f32 %v5140_v10, %v6095_v39  ;;  %v1528_v7 = vpop.xlane.xlu0 %1527 }
 0x7d0   :  { %v5142_v11 = vpop.eup %5141  ;;  %v1535_v2 = vmul.f32 0.03125, %v1528_v7 }
 0x7d1   :  { %v1559_v8 = vmul.f32 %v1558_v35, %v1549_v15  ;;  %v1550_v14 = vmul.f32 %v5142_v11, %v6100_v17  ;;  %v1530_v18 = vpop.xlane.xlu1 %1529 }
 0x7d2   :  { %v1541_v61 = vadd.f32 1e-06, %v1535_v2  ;;  %v1536_v55 = vmul.f32 0.03125, %v1530_v18 }
 0x7d3   :  { %v1560_v25 = vmul.f32 %v1558_v35, %v1550_v14  ;;  %v1569_v26 = vadd.f32 %v1568_v20, %v1559_v8 }
 0x7d4   :  { %5147 = vrsqrt.f32 %v1541_v61  ;;  %v1542_v40 = vadd.f32 1e-06, %v1536_v55 }
 0x7d5   :  { %v1570_v28 = vadd.f32 %v1568_v20, %v1560_v25 }
 0x7d6   :  { %v5144_v51 = vpop.eup %5143  ;;  %5149 = vrsqrt.f32 %v1542_v40 }
 0x7d7   :  { %v1575_v39 = vpack.c.bf16 %v1570_v28, %v1569_v26  ;;  %v1551_v60 = vmul.f32 %v5144_v51, %v6107_v56 }
 0x7d8   :  { %v5146_v31 = vpop.eup %5145 }
 0x7d9   :  { %4509 = vmatmul.mubr.bf16.vlgmr.msra.gmra.mrb[72].mxu0 %v1575_v39  ;;  %v1552_v17 = vmul.f32 %v5146_v31, %v6112_v9  ;;  %v1561_v52 = vmul.f32 %v1558_v35, %v1551_v60 }
 0x7da   :  { %4512 = vmatprep.mubr.msk.bf16.mxu0 %vm5316_vm0, %v5315_v0 }
 0x7db   :  { %v1562_v53 = vmul.f32 %v1558_v35, %v1552_v17  ;;  %v1571_v41 = vadd.f32 %v1568_v20, %v1561_v52 }
 0x7dd   :  { %v1572_v47 = vadd.f32 %v1568_v20, %v1562_v53 }
 0x7de   :  { %v5148_v48 = vpop.eup %5147 }
 0x7df   :  { %v1576_v30 = vpack.c.bf16 %v1572_v47, %v1571_v41  ;;  %v1553_v13 = vmul.f32 %v5148_v48, %v6119_v32  ;;  %v4960_v32 = vld [vmem:[%s7011_s11 + $0x8] sm:$0xff]  }
 0x7e0   :  { %v5150_v23 = vpop.eup %5149  ;;  %4523 = vmatpush3.bf16.msra.mxu1 %v4960_v32 }
 0x7e1   :  { %4513 = vmatmul.mubr.bf16.gmra.mrb[76].mxu0 %v1576_v30  ;;  %v1554_v62 = vmul.f32 %v5150_v23, %v6124_v59  ;;  %v1563_v56 = vmul.f32 %v1558_v35, %v1553_v13  ;;  %4524 = vmatprep.subr.bf16.mxu1 %v5315_v0  ;;  %v4961_v59 = vld [vmem:[%s7011_s11 + $0x10] sm:$0xff]  }
 0x7e2   :  { %4516 = vmatprep.mubr.msk.bf16.mxu0 %vm5316_vm0, %v5315_v0 }
 0x7e3   :  { %v1564_v9 = vmul.f32 %v1558_v35, %v1554_v62  ;;  %v1573_v22 = vadd.f32 %v1568_v20, %v1563_v56 }
 0x7e4   :  { %4525 = vmatpush3.bf16.msra.mxu1 %v4961_v59 }
 0x7e5   :  { %v1574_v42 = vadd.f32 %v1568_v20, %v1564_v9  ;;  %4526 = vmatprep.subr.bf16.mxu1 %v5315_v0 }
 0x7e7   :  { %v1577_v21 = vpack.c.bf16 %v1574_v42, %v1573_v22 }
 0x7e8   :  { %4527 = vmatpush3.bf16.msra.mxu1 %v4962_v50 }
 0x7e9   :  { %4517 = vmatmul.mubr.bf16.gmra.mrb[80].mxu0 %v1577_v21  ;;  %4528 = vmatprep.subr.bf16.mxu1 %v5315_v0 }
 0x7ea   :  { %2205 = vmatprep.mubr.bf16.mxu0 %v5317_v38 }
 0x7ec   :  { %4529 = vmatpush3.bf16.msra.mxu1 %v4963_v34 }
 0x7ed   :  { %4530 = vmatprep.subr.bf16.mxu1 %v5315_v0 }
 0x7f0   :  { %4531 = vmatpush3.bf16.msra.mxu1 %v4964_v5 }
 0x7f1   :  { %4532 = vmatprep.subr.bf16.mxu1 %v5315_v0 }
 0x7f4   :  { %4533 = vmatpush3.bf16.msra.mxu1 %v4965_v37 }
 0x7f5   :  { %4534 = vmatprep.subr.bf16.mxu1 %v5315_v0 }
 0x7f8   :  { %4535 = vmatpush3.bf16.msra.mxu1 %v4966_v29 }
 0x7f9   :  { %4548 = vmatprep.subr.bf16.mxu1 %v5315_v0 }
 0x8ac   :  { %v1683_v33 = vpop.f32.mrb[72].mxu0 }
 0x8ad   :  { %v1684_v36 = vadd.f32 %v3893_v27, %v1683_v33  ;;  %v4510_v35 = vpop.f32.mrb[73].mxu0 }
 0x8ae   :  { %v1686_v10 = vpop.f32.mrb[74].mxu0 }
 0x8af   :  { %v1712_v15 = vmul.f32 0.044715, %v1684_v36  ;;  %v1687_v7 = vadd.f32 %v3893_v27, %v1686_v10  ;;  %v4511_v11 = vpop.f32.mrb[75].mxu0 }
 0x8b1   :  { %v1718_v2 = vmul.f32 %v1712_v15, %v1684_v36  ;;  %v1713_v8 = vmul.f32 0.044715, %v1687_v7  ;;  %v1706_v15 = vmul.f32 0.5, %v1684_v36  ;;  %v1707_v11 = vmul.f32 0.5, %v1687_v7 }
 0x8b3   :  { %v1724_v14 = vmul.f32 %v1718_v2, %v1684_v36  ;;  %v1719_v18 = vmul.f32 %v1713_v8, %v1687_v7 }
 0x8b4   :  { %v1691_v20 = vpop.f32.mrb[76].mxu0 }
 0x8b5   :  { %v1730_v61 = vadd.f32 %v1724_v14, %v1684_v36  ;;  %v1725_v55 = vmul.f32 %v1719_v18, %v1687_v7  ;;  %v1692_v25 = vadd.f32 %v3893_v27, %v1691_v20  ;;  %v4514_v40 = vpop.f32.mrb[77].mxu0 }
 0x8b6   :  { %v1694_v26 = vpop.f32.mrb[78].mxu0 }
 0x8b7   :  { %v1736_v28 = vmul.f32 0.7978846, %v1730_v61  ;;  %v1731_v51 = vadd.f32 %v1725_v55, %v1687_v7  ;;  %v1714_v39 = vmul.f32 0.044715, %v1692_v25  ;;  %v1695_v60 = vadd.f32 %v3893_v27, %v1694_v26  ;;  %v4515_v31 = vpop.f32.mrb[79].mxu0 }
 0x8b9   :  { %5151 = vtanh.f32 %v1736_v28  ;;  %v1737_v17 = vmul.f32 0.7978846, %v1731_v51  ;;  %v1720_v52 = vmul.f32 %v1714_v39, %v1692_v25  ;;  %v1715_v53 = vmul.f32 0.044715, %v1695_v60 }
 0x8ba   :  { %v1708_v28 = vmul.f32 0.5, %v1692_v25  ;;  %v1709_v51 = vmul.f32 0.5, %v1695_v60 }
 0x8bb   :  { %5153 = vtanh.f32 %v1737_v17  ;;  %v1726_v41 = vmul.f32 %v1720_v52, %v1692_v25  ;;  %v1721_v47 = vmul.f32 %v1715_v53, %v1695_v60 }
 0x8bc   :  { %v1699_v48 = vpop.f32.mrb[80].mxu0 }
 0x8bd   :  { %v1727_v30 = vmul.f32 %v1721_v47, %v1695_v60  ;;  %v1700_v13 = vadd.f32 %v3893_v27, %v1699_v48  ;;  %v4518_v23 = vpop.f32.mrb[81].mxu0  ;;  %v1732_v62 = vadd.f32 %v1726_v41, %v1692_v25  ;;  %v3902_v25 = vld [vmem:[%s7013_s12] ss:$0 sm:$0xff] }
 0x8be   :  { %v1702_v56 = vpop.f32.mrb[82].mxu0 }
 0x8bf   :  { %v1716_v9 = vmul.f32 0.044715, %v1700_v13  ;;  %v1703_v22 = vadd.f32 %v3893_v27, %v1702_v56  ;;  %v4519_v42 = vpop.f32.mrb[83].mxu0  ;;  %v1733_v21 = vadd.f32 %v1727_v30, %v1695_v60  ;;  %v1738_v4 = vmul.f32 0.7978846, %v1732_v62 }
 0x8c0   :  { %v1710_v41 = vmul.f32 0.5, %v1700_v13 }
 0x8c1   :  { %v1722_v32 = vmul.f32 %v1716_v9, %v1700_v13  ;;  %v1717_v59 = vmul.f32 0.044715, %v1703_v22  ;;  %v1739_v50 = vmul.f32 0.7978846, %v1733_v21  ;;  %5155 = vtanh.f32 %v1738_v4 }
 0x8c2   :  { %v1711_v47 = vmul.f32 0.5, %v1703_v22 }
 0x8c3   :  { %v5152_v34 = vpop.eup %5151  ;;  %v1728_v5 = vmul.f32 %v1722_v32, %v1700_v13  ;;  %v1723_v37 = vmul.f32 %v1717_v59, %v1703_v22  ;;  %5157 = vtanh.f32 %v1739_v50 }
 0x8c4   :  { %v1748_v29 = vadd.f32 1.0, %v5152_v34 }
 0x8c5   :  { %v5154_v33 = vpop.eup %5153  ;;  %v1729_v35 = vmul.f32 %v1723_v37, %v1703_v22  ;;  %v1734_v10 = vadd.f32 %v1728_v5, %v1700_v13 }
 0x8c6   :  { %v1749_v2 = vadd.f32 1.0, %v5154_v33  ;;  %v1754_v14 = vmul.f32 %v1748_v29, %v1706_v15 }
 0x8c7   :  { %v1735_v8 = vadd.f32 %v1729_v35, %v1703_v22  ;;  %v1740_v27 = vmul.f32 0.7978846, %v1734_v10 }
 0x8c8   :  { %v1755_v18 = vmul.f32 %v1749_v2, %v1707_v11 }
 0x8c9   :  { %v1741_v20 = vmul.f32 0.7978846, %v1735_v8  ;;  %5159 = vtanh.f32 %v1740_v27  ;;  %v4969_v8 = vld [vmem:[%s7004_s5 + $0xc4] ss:$12 sps:$4 sm:$0xff]   ;;  %v4974_v27 = vld [vmem:[%s7004_s5 + $0xe0] ss:$12 sps:$4 sm:$0xff]  }
 0x8ca   :  { %v1760_v61 = vpack.c.bf16 %v1755_v18, %v1754_v14  ;;  %2173 = vmatprep.subr.bf16.mxu0 %v4969_v8  ;;  %v4971_v14 = vld [vmem:[%s7004_s5 + $0xd8] ss:$12 sps:$4 sm:$0xff]   ;;  %v4990_v8 = vld [vmem:[%s7004_s5 + $0x140] ss:$12 sps:$4 sm:$0xff]  }
 0x8cb   :  { %v5156_v55 = vpop.eup %5155  ;;  %5161 = vtanh.f32 %v1741_v20 }
 0x8cc   :  { %4537 = vmatmul.mubr.bf16.vlgmr.msra.gmra.mrb[36].mxu1 %v1760_v61  ;;  %v1750_v40 = vadd.f32 1.0, %v5156_v55 }
 0x8cd   :  { %v5158_v26 = vpop.eup %5157  ;;  %4540 = vmatprep.mubr.msk.bf16.mxu1 %vm5316_vm0, %v5315_v0 }
 0x8ce   :  { %v1751_v36 = vadd.f32 1.0, %v5158_v26  ;;  %v1756_v7 = vmul.f32 %v1750_v40, %v1708_v28 }
 0x8d0   :  { %v1757_v39 = vmul.f32 %v1751_v36, %v1709_v51 }
 0x8d2   :  { %v1761_v31 = vpack.c.bf16 %v1757_v39, %v1756_v7 }
 0x8d3   :  { %v5160_v17 = vpop.eup %5159 }
 0x8d4   :  { %4541 = vmatmul.mubr.bf16.gmra.mrb[40].mxu1 %v1761_v31  ;;  %v1752_v52 = vadd.f32 1.0, %v5160_v17 }
 0x8d5   :  { %v5162_v53 = vpop.eup %5161  ;;  %4544 = vmatprep.mubr.msk.bf16.mxu1 %vm5316_vm0, %v5315_v0 }
 0x8d6   :  { %v1753_v48 = vadd.f32 1.0, %v5162_v53  ;;  %v1758_v30 = vmul.f32 %v1752_v52, %v1710_v41 }
 0x8d8   :  { %v1759_v23 = vmul.f32 %v1753_v48, %v1711_v47 }
 0x8da   :  { %v1762_v62 = vpack.c.bf16 %v1759_v23, %v1758_v30 }
 0x8dc   :  { %4545 = vmatmul.mubr.bf16.gmra.mrb[44].mxu1 %v1762_v62 }
 0x8dd   :  { %4564 = vmatprep.mubr.msk.bf16.mxu1 %vm5316_vm0, %v5315_v0 }
 0x99f   :  { %v1868_v60 = vpop.f32.mrb[36].mxu1 }
 0x9a0   :  { %v1869_v56 = vadd.f32 %v3902_v25, %v1868_v60  ;;  %v4538_v9 = vpop.f32.mrb[37].mxu1 }
 0x9a1   :  { %v1871_v42 = vpop.f32.mrb[38].mxu1 }
 0x9a2   :  { %v6214_v21 = vadd.f32 %v1869_v56, %v6061_v6  ;;  %v1872_v13 = vadd.f32 %v3902_v25, %v1871_v42  ;;  %v4539_v22 = vpop.f32.mrb[39].mxu1 }
 0x9a4   :  { %v6217_v4 = vadd.f32 %v1872_v13, %v6064_v58  ;;  %1899 = vadd.xlane.f32.xlu0 %v6214_v21 }
 0x9a6   :  { %1901 = vadd.xlane.f32.xlu1 %v6217_v4 }
 0x9a7   :  { %v1876_v32 = vpop.f32.mrb[40].mxu1 }
 0x9a8   :  { %v1877_v59 = vadd.f32 %v3902_v25, %v1876_v32  ;;  %v4542_v50 = vpop.f32.mrb[41].mxu1 }
 0x9a9   :  { %v1879_v34 = vpop.f32.mrb[42].mxu1  ;;  %v4975_v50 = vld [vmem:[%s7004_s5 + $0xf0] ss:$12 sps:$4 sm:$0xff]  }
 0x9aa   :  { %v6222_v5 = vadd.f32 %v1877_v59, %v6069_v43  ;;  %v1880_v37 = vadd.f32 %v3902_v25, %v1879_v34  ;;  %v4543_v29 = vpop.f32.mrb[43].mxu1  ;;  %v4977_v59 = vld [vmem:[%s7004_s5 + $0xf4] ss:$12 sps:$4 sm:$0xff]   ;;  %v4978_v34 = vld [vmem:[%s7004_s5 + $0xf8] ss:$12 sps:$4 sm:$0xff]  }
 0x9ab   :  { %v4981_v29 = vld [vmem:[%s7004_s5 + $0x10c] ss:$12 sps:$4 sm:$0xff]  }
 0x9ac   :  { %v6225_v6 = vadd.f32 %v1880_v37, %v6072_v16  ;;  %1903 = vadd.xlane.f32.xlu0 %v6222_v5  ;;  %v4967_v16 = vld [vmem:[%s7004_s5 + $0xc0] ss:$12 sps:$4 sm:$0xff]  }
 0x9ad   :  { %2174 = vmatpush1.bf16.msra.mxu0 %v4967_v16  ;;  %v4987_v16 = vld [vmem:[%s7004_s5 + $0x138] ss:$12 sps:$4 sm:$0xff]  }
 0x9ae   :  { %1905 = vadd.xlane.f32.xlu1 %v6225_v6 }
 0x9af   :  { %v1884_v58 = vpop.f32.mrb[44].mxu1 }
 0x9b0   :  { %v1885_v33 = vadd.f32 %v3902_v25, %v1884_v58  ;;  %v4546_v35 = vpop.f32.mrb[45].mxu1  ;;  %v4979_v58 = vld [vmem:[%s7004_s5 + $0x108] ss:$12 sps:$4 sm:$0xff]  }
 0x9b1   :  { %v1887_v10 = vpop.f32.mrb[46].mxu1  ;;  %v4985_v35 = vld [vmem:[%s7004_s5 + $0x124] ss:$12 sps:$4 sm:$0xff]  }
 0x9b2   :  { %v6230_v15 = vadd.f32 %v1885_v33, %v6077_v57  ;;  %v1888_v11 = vadd.f32 %v3902_v25, %v1887_v10  ;;  %v4547_v2 = vpop.f32.mrb[47].mxu1  ;;  %v4970_v57 = vld [vmem:[%s7004_s5 + $0xc8] ss:$12 sps:$4 sm:$0xff]   ;;  %v4982_v33 = vld [vmem:[%s7004_s5 + $0x110] ss:$12 sps:$4 sm:$0xff]  }
 0x9b3   :  { %4549 = vmatpush3.bf16.msra.mxu1 %v4970_v57  ;;  %v4983_v10 = vld [vmem:[%s7004_s5 + $0x120] ss:$12 sps:$4 sm:$0xff]   ;;  %v4989_v2 = vld [vmem:[%s7004_s5 + $0x13c] ss:$12 sps:$4 sm:$0xff]  }
 0x9b4   :  { %v6233_v43 = vadd.f32 %v1888_v11, %v6080_v24  ;;  %1907 = vadd.xlane.f32.xlu0 %v6230_v15  ;;  %v4973_v24 = vld [vmem:[%s7004_s5 + $0xdc] ss:$12 sps:$4 sm:$0xff]   ;;  %4550 = vmatprep.subr.bf16.mxu1 %v5315_v0  ;;  %v4993_v57 = vld [vmem:[%s7004_s5 + $0x154] ss:$12 sps:$4 sm:$0xff]  }
 0x9b5   :  { %2175 = vmatprep.subr.bf16.mxu0 %v4973_v24  ;;  %v4986_v11 = vld [vmem:[%s7004_s5 + $0x128] ss:$12 sps:$4 sm:$0xff]   ;;  %v4991_v24 = vld [vmem:[%s7004_s5 + $0x150] ss:$12 sps:$4 sm:$0xff]  }
 0x9b6   :  { %1909 = vadd.xlane.f32.xlu1 %v6233_v43  ;;  %2176 = vmatpush1.bf16.msra.mxu0 %v4971_v14  ;;  %v4997_v14 = vld [vmem:[%s7004_s5 + $0x16c] ss:$12 sps:$4 sm:$0xff]  }
 0x9b7   :  { %4551 = vmatpush3.bf16.msra.mxu1 %v4974_v27  ;;  %2177 = vmatprep.subr.bf16.mxu0 %v4977_v59  ;;  %v4994_v27 = vld [vmem:[%s7004_s5 + $0x158] ss:$12 sps:$4 sm:$0xff]  }
 0x9b8   :  { %4552 = vmatprep.subr.bf16.mxu1 %v5315_v0 }
 0x9ba   :  { %2178 = vmatpush1.bf16.msra.mxu0 %v4975_v50 }
 0x9bb   :  { %4553 = vmatpush3.bf16.msra.mxu1 %v4978_v34  ;;  %2179 = vmatprep.subr.bf16.mxu0 %v4981_v29 }
 0x9bc   :  { %4554 = vmatprep.subr.bf16.mxu1 %v5315_v0 }
 0x9be   :  { %2180 = vmatpush1.bf16.msra.mxu0 %v4979_v58 }
 0x9bf   :  { %4555 = vmatpush3.bf16.msra.mxu1 %v4982_v33  ;;  %2181 = vmatprep.subr.bf16.mxu0 %v4985_v35 }
 0x9c0   :  { %4556 = vmatprep.subr.bf16.mxu1 %v5315_v0 }
 0x9c2   :  { %2182 = vmatpush1.bf16.msra.mxu0 %v4983_v10 }
 0x9c3   :  { %4557 = vmatpush3.bf16.msra.mxu1 %v4986_v11  ;;  %2183 = vmatprep.subr.bf16.mxu0 %v4989_v2 }
 0x9c4   :  { %4558 = vmatprep.subr.bf16.mxu1 %v5315_v0 }
 0x9c6   :  { %2184 = vmatpush1.bf16.msra.mxu0 %v4987_v16 }
 0x9c7   :  { %4559 = vmatpush3.bf16.msra.mxu1 %v4990_v8  ;;  %2185 = vmatprep.subr.bf16.mxu0 %v4993_v57 }
 0x9c8   :  { %4560 = vmatprep.subr.bf16.mxu1 %v5315_v0 }
 0x9ca   :  { %2186 = vmatpush1.bf16.msra.mxu0 %v4991_v24 }
 0x9cb   :  { %4561 = vmatpush3.bf16.msra.mxu1 %v4994_v27  ;;  %2187 = vmatprep.subr.bf16.mxu0 %v4997_v14 }
 0x9cc   :  { %4562 = vmatprep.subr.bf16.mxu1 %v5315_v0 }
 0xa31   :  { %v1900_v18 = vpop.xlane.xlu0 %1899 }
 0xa32   :  { %v1911_v20 = vmul.f32 0.03125, %v1900_v18  ;;  %v4995_v18 = vld [vmem:[%s7004_s5 + $0x168] ss:$12 sps:$4 sm:$0xff]  }
 0xa33   :  { %v1902_v61 = vpop.xlane.xlu1 %1901  ;;  %2188 = vmatpush1.bf16.msra.mxu0 %v4995_v18 }
 0xa34   :  { %v1917_v55 = vsub.f32 %v6214_v21, %v1911_v20  ;;  %v1912_v40 = vmul.f32 0.03125, %v1902_v61  ;;  %v4998_v20 = vld [vmem:[%s7004_s5 + $0x170] ss:$12 sps:$4 sm:$0xff]   ;;  %4576 = vmatprep.subr.bf16.mxu0 %v5315_v0 }
 0xa35   :  { %4563 = vmatpush3.bf16.msra.mxu1 %v4998_v20 }
 0xa36   :  { %v1918_v26 = vsub.f32 %v6217_v4, %v1912_v40  ;;  %v6260_v28 = vmul.f32 %v5505_v46, %v1917_v55  ;;  %4594 = vmatprep.subr.bf16.mxu1 %v5315_v0 }
 0xa38   :  { %v1929_v51 = vmul.f32 %v6260_v28, %v6260_v28  ;;  %v6265_v36 = vmul.f32 %v5505_v46, %v1918_v26 }
 0xa39   :  { %v1904_v7 = vpop.xlane.xlu0 %1903 }
 0xa3a   :  { %v1913_v39 = vmul.f32 0.03125, %v1904_v7  ;;  %1935 = vadd.xlane.f32.xlu0 %v1929_v51  ;;  %v1930_v31 = vmul.f32 %v6265_v36, %v6265_v36 }
 0xa3b   :  { %v1906_v17 = vpop.xlane.xlu1 %1905 }
 0xa3c   :  { %v1919_v52 = vsub.f32 %v6222_v5, %v1913_v39  ;;  %v1914_v53 = vmul.f32 0.03125, %v1906_v17  ;;  %1937 = vadd.xlane.f32.xlu1 %v1930_v31 }
 0xa3e   :  { %v1920_v41 = vsub.f32 %v6225_v6, %v1914_v53  ;;  %v6272_v47 = vmul.f32 %v5505_v46, %v1919_v52  ;;  %v3911_v52 = vld [vmem:[%s7005_s4 + $0x4] sm:$0xf] }
 0xa3f   :  { %v1984_v50 = vrot.slane %v3911_v52, %v5624_v63 }
 0xa40   :  { %v1931_v48 = vmul.f32 %v6272_v47, %v6272_v47  ;;  %v6277_v30 = vmul.f32 %v5505_v46, %v1920_v41 }
 0xa41   :  { %v1908_v23 = vpop.xlane.xlu0 %1907 }
 0xa42   :  { %v1915_v62 = vmul.f32 0.03125, %v1908_v23  ;;  %1939 = vadd.xlane.f32.xlu0 %v1931_v48  ;;  %v1932_v25 = vmul.f32 %v6277_v30, %v6277_v30  ;;  %v1974_v23 = vrot.slane %v3911_v52, %v5616_v54 }
 0xa43   :  { %v1910_v60 = vpop.xlane.xlu1 %1909 }
 0xa44   :  { %v1921_v56 = vsub.f32 %v6230_v15, %v1915_v62  ;;  %v1916_v9 = vmul.f32 0.03125, %v1910_v60  ;;  %1941 = vadd.xlane.f32.xlu1 %v1932_v25 }
 0xa46   :  { %v1922_v42 = vsub.f32 %v6233_v43, %v1916_v9  ;;  %v6284_v13 = vmul.f32 %v5505_v46, %v1921_v56 }
 0xa48   :  { %v1933_v22 = vmul.f32 %v6284_v13, %v6284_v13  ;;  %v6289_v32 = vmul.f32 %v5505_v46, %v1922_v42 }
 0xa4a   :  { %1943 = vadd.xlane.f32.xlu0 %v1933_v22  ;;  %v1934_v37 = vmul.f32 %v6289_v32, %v6289_v32 }
 0xa4c   :  { %1945 = vadd.xlane.f32.xlu1 %v1934_v37 }
 0xac7   :  { %v1936_v61 = vpop.xlane.xlu0 %1935 }
 0xac8   :  { %v1947_v55 = vmul.f32 0.03125, %v1936_v61 }
 0xac9   :  { %v1938_v40 = vpop.xlane.xlu1 %1937 }
 0xaca   :  { %v1953_v26 = vadd.f32 1e-06, %v1947_v55  ;;  %v1948_v51 = vmul.f32 0.03125, %v1938_v40 }
 0xacc   :  { %5163 = vrsqrt.f32 %v1953_v26  ;;  %v1954_v7 = vadd.f32 1e-06, %v1948_v51 }
 0xace   :  { %5165 = vrsqrt.f32 %v1954_v7 }
 0xacf   :  { %v1940_v39 = vpop.xlane.xlu0 %1939 }
 0xad0   :  { %v1949_v31 = vmul.f32 0.03125, %v1940_v39 }
 0xad1   :  { %v1942_v17 = vpop.xlane.xlu1 %1941 }
 0xad2   :  { %v1955_v53 = vadd.f32 1e-06, %v1949_v31  ;;  %v1950_v41 = vmul.f32 0.03125, %v1942_v17 }
 0xad4   :  { %5167 = vrsqrt.f32 %v1955_v53  ;;  %v1956_v48 = vadd.f32 1e-06, %v1950_v41 }
 0xad6   :  { %v5164_v62 = vpop.eup %5163  ;;  %5169 = vrsqrt.f32 %v1956_v48 }
 0xad7   :  { %v1965_v25 = vmul.f32 %v5164_v62, %v6260_v28  ;;  %v1944_v60 = vpop.xlane.xlu0 %1943 }
 0xad8   :  { %v5166_v56 = vpop.eup %5165  ;;  %v1951_v9 = vmul.f32 0.03125, %v1944_v60 }
 0xad9   :  { %v1975_v42 = vmul.f32 %v1974_v23, %v1965_v25  ;;  %v1966_v22 = vmul.f32 %v5166_v56, %v6265_v36  ;;  %v1946_v59 = vpop.xlane.xlu1 %1945 }
 0xada   :  { %v1957_v34 = vadd.f32 1e-06, %v1951_v9  ;;  %v1952_v37 = vmul.f32 0.03125, %v1946_v59 }
 0xadb   :  { %v1976_v29 = vmul.f32 %v1974_v23, %v1966_v22  ;;  %v1985_v33 = vadd.f32 %v1984_v50, %v1975_v42 }
 0xadc   :  { %5171 = vrsqrt.f32 %v1957_v34  ;;  %v1958_v58 = vadd.f32 1e-06, %v1952_v37 }
 0xadd   :  { %v1986_v35 = vadd.f32 %v1984_v50, %v1976_v29 }
 0xade   :  { %v5168_v10 = vpop.eup %5167  ;;  %5173 = vrsqrt.f32 %v1958_v58 }
 0xadf   :  { %v1991_v11 = vpack.c.bf16 %v1986_v35, %v1985_v33  ;;  %v1967_v28 = vmul.f32 %v5168_v10, %v6272_v47 }
 0xae0   :  { %v5170_v2 = vpop.eup %5169 }
 0xae1   :  { %2206 = vmatmul.mubr.bf16.vlgmr.msra.gmra.mrb[84].mxu0 %v1991_v11  ;;  %4565 = vmatmul.mubr.bf16.vlgmr.msra.gmra.mrb[48].mxu1 %v1991_v11  ;;  %v1968_v36 = vmul.f32 %v5170_v2, %v6277_v30  ;;  %v1977_v16 = vmul.f32 %v1974_v23, %v1967_v28 }
 0xae2   :  { %2215 = vmatprep.mubr.bf16.mxu0 %v5317_v38  ;;  %4568 = vmatprep.mubr.msk.bf16.mxu1 %vm5316_vm0, %v5315_v0 }
 0xae3   :  { %v1978_v8 = vmul.f32 %v1974_v23, %v1968_v36  ;;  %v1987_v57 = vadd.f32 %v1984_v50, %v1977_v16 }
 0xae5   :  { %v1988_v24 = vadd.f32 %v1984_v50, %v1978_v8 }
 0xae6   :  { %v5172_v27 = vpop.eup %5171 }
 0xae7   :  { %v1992_v14 = vpack.c.bf16 %v1988_v24, %v1987_v57  ;;  %v1969_v18 = vmul.f32 %v5172_v27, %v6284_v13  ;;  %v3944_v13 = vld [vmem:[%s7006_s6 + $0x3] sm:$0x7] }
 0xae8   :  { %v5174_v20 = vpop.eup %5173  ;;  %v2037_v39 = vrot.slane %v3944_v13, %v5624_v63 }
 0xae9   :  { %2216 = vmatmul.mubr.bf16.gmra.mrb[88].mxu0 %v1992_v14  ;;  %4569 = vmatmul.mubr.bf16.gmra.mrb[52].mxu1 %v1992_v14  ;;  %v1970_v47 = vmul.f32 %v5174_v20, %v6289_v32  ;;  %v1979_v61 = vmul.f32 %v1974_v23, %v1969_v18  ;;  %v2041_v32 = vrot.slane %v3944_v13, %v5646_v12 }
 0xaea   :  { %2225 = vmatprep.mubr.bf16.mxu0 %v5317_v38  ;;  %4572 = vmatprep.mubr.msk.bf16.mxu1 %vm5316_vm0, %v5315_v0  ;;  %v2033_v38 = vrot.slane %v3944_v13, %v5616_v54 }
 0xaeb   :  { %v1980_v30 = vmul.f32 %v1974_v23, %v1970_v47  ;;  %v1989_v55 = vadd.f32 %v1984_v50, %v1979_v61 }
 0xaed   :  { %v1990_v40 = vadd.f32 %v1984_v50, %v1980_v30 }
 0xaef   :  { %v1993_v26 = vpack.c.bf16 %v1990_v40, %v1989_v55 }
 0xaf1   :  { %2226 = vmatmul.mubr.bf16.gmra.mrb[92].mxu0 %v1993_v26  ;;  %4573 = vmatmul.mubr.bf16.gmra.mrb[56].mxu1 %v1993_v26 }
 0xaf2   :  { %4582 = vmatprep.mubr.msk.bf16.mxu0 %vm5316_vm0, %v5315_v0  ;;  %4600 = vmatprep.mubr.msk.bf16.mxu1 %vm5316_vm0, %v5315_v0 }
 0xbb4   :  { %v2207_v51 = vpop.f32.mrb[84].mxu0  ;;  %v2270_v7 = vpop.f32.mrb[48].mxu1 }
 0xbb5   :  { %v2208_v31 = vadd.f32 %v2207_v51, %v2033_v38  ;;  %v2209_v17 = vpop.f32.mrb[85].mxu0  ;;  %v4566_v52 = vpop.f32.mrb[49].mxu1  ;;  %v2271_v48 = vadd.f32 %v2270_v7, %v2041_v32 }
 0xbb6   :  { %v2211_v53 = vpop.f32.mrb[86].mxu0  ;;  %v2273_v41 = vpop.f32.mrb[50].mxu1  ;;  %v2210_v56 = vadd.f32 %v2209_v17, %v2037_v39 }
 0xbb7   :  { %v2212_v23 = vadd.f32 %v2211_v53, %v2033_v38  ;;  %v2274_v62 = vadd.f32 %v2273_v41, %v2041_v32  ;;  %v2213_v25 = vpop.f32.mrb[87].mxu0  ;;  %v4567_v60 = vpop.f32.mrb[51].mxu1  ;;  %v2293_v42 = vmul.f32 0.35355338, %v2208_v31 }
 0xbb8   :  { %v2214_v9 = vadd.f32 %v2213_v25, %v2037_v39 }
 0xbb9   :  { %v2294_v54 = vmul.f32 0.35355338, %v2212_v23  ;;  %v6381_v22 = vpack.c.bf16 %v2274_v62, %v2271_v48 }
 0xbba   :  { %v6383_v59 = vpack.c.bf16 %v2214_v9, %v2210_v56 }
 0xbbb   :  { %v6385_v50 = vpack.c.bf16 %v2294_v54, %v2293_v42 }
 0xbbc   :  { %v2217_v63 = vpop.f32.mrb[88].mxu0  ;;  %v2278_v34 = vpop.f32.mrb[52].mxu1  ;;  %v2308_v37 = vmul.bf16 %v6383_v59, %v5668_v1  ;;  %v2422_v29 = vmul.bf16 %v6383_v59, %v5670_v3 }
 0xbbd   :  { %v2218_v58 = vadd.f32 %v2217_v63, %v2033_v38  ;;  %v2219_v33 = vpop.f32.mrb[89].mxu0  ;;  %v4570_v35 = vpop.f32.mrb[53].mxu1  ;;  %v2279_v28 = vadd.f32 %v2278_v34, %v2041_v32 }
 0xbbe   :  { %v2221_v10 = vpop.f32.mrb[90].mxu0  ;;  %v2281_v11 = vpop.f32.mrb[54].mxu1  ;;  %4577 = vmatpush3.bf16.xpose.msra.mxu0 %v2308_v37  ;;  %4595 = vmatpush3.bf16.xpose.msra.mxu1 %v2422_v29  ;;  %v2220_v57 = vadd.f32 %v2219_v33, %v2037_v39  ;;  %v2854_v29 = vmul.bf16 %v6383_v59, %v5756_v19 }
 0xbbf   :  { %v2222_v2 = vadd.f32 %v2221_v10, %v2033_v38  ;;  %v2282_v36 = vadd.f32 %v2281_v11, %v2041_v32  ;;  %v2223_v16 = vpop.f32.mrb[91].mxu0  ;;  %v4571_v8 = vpop.f32.mrb[55].mxu1  ;;  %4578 = vmatprep.subr.bf16.mxu0 %v5315_v0  ;;  %4596 = vmatprep.subr.bf16.mxu1 %v5315_v0  ;;  %v2295_v27 = vmul.f32 0.35355338, %v2218_v58 }
 0xbc0   :  { %v2224_v24 = vadd.f32 %v2223_v16, %v2037_v39 }
 0xbc1   :  { %v2296_v14 = vmul.f32 0.35355338, %v2222_v2  ;;  %v6393_v18 = vpack.c.bf16 %v2282_v36, %v2279_v28 }
 0xbc2   :  { %v6395_v20 = vpack.c.bf16 %v2224_v24, %v2220_v57 }
 0xbc3   :  { %v6397_v47 = vpack.c.bf16 %v2296_v14, %v2295_v27 }
 0xbc4   :  { %v2227_v61 = vpop.f32.mrb[92].mxu0  ;;  %v2286_v30 = vpop.f32.mrb[56].mxu1  ;;  %v2309_v55 = vmul.bf16 %v6395_v20, %v5668_v1  ;;  %v2423_v40 = vmul.bf16 %v6395_v20, %v5670_v3  ;;  %v2669_v37 = vmul.bf16 %v6395_v20, %v5719_v44  ;;  %v2855_v58 = vmul.bf16 %v6395_v20, %v5756_v19 }
 0xbc5   :  { %v2228_v26 = vadd.f32 %v2227_v61, %v2033_v38  ;;  %v2229_v13 = vpop.f32.mrb[93].mxu0  ;;  %v4574_v51 = vpop.f32.mrb[57].mxu1  ;;  %v2287_v17 = vadd.f32 %v2286_v30, %v2041_v32 }
 0xbc6   :  { %v2231_v7 = vpop.f32.mrb[94].mxu0  ;;  %v2289_v31 = vpop.f32.mrb[58].mxu1  ;;  %4579 = vmatpush3.bf16.xpose.msra.mxu0 %v2309_v55  ;;  %4597 = vmatpush3.bf16.xpose.msra.mxu1 %v2423_v40  ;;  %v2230_v23 = vadd.f32 %v2229_v13, %v2037_v39  ;;  %v6471_v51 = vld [vmem:[%s7007_s2] sm:$0xff] }
 0xbc7   :  { %v2232_v52 = vadd.f32 %v2231_v7, %v2033_v38  ;;  %v2290_v53 = vadd.f32 %v2289_v31, %v2041_v32  ;;  %v2233_v41 = vpop.f32.mrb[95].mxu0  ;;  %v4575_v48 = vpop.f32.mrb[59].mxu1  ;;  %4580 = vmatprep.subr.bf16.mxu0 %v5315_v0  ;;  %4598 = vmatprep.subr.bf16.mxu1 %v5315_v0  ;;  %v2297_v25 = vmul.f32 0.35355338, %v2228_v26  ;;  %v2533_v38 = vmul.bf16 %v6381_v22, %v5670_v3 }
 0xbc8   :  { %v2234_v62 = vadd.f32 %v2233_v41, %v2037_v39  ;;  %v2668_v32 = vmul.bf16 %v6383_v59, %v5719_v44  ;;  %v2534_v39 = vmul.bf16 %v6393_v18, %v5670_v3 }
 0xbc9   :  { %v2298_v60 = vmul.f32 0.35355338, %v2232_v52  ;;  %v6405_v56 = vpack.c.bf16 %v2290_v53, %v2287_v17 }
 0xbca   :  { %v2304_v9 = vpack.c.bf16 %v2234_v62, %v2230_v23  ;;  %v6481_v62 = vld [vmem:[%s7007_s2 + $0x8] sm:$0xff] }
 0xbcb   :  { %v2301_v42 = vpack.c.bf16 %v2298_v60, %v2297_v25  ;;  %v2535_v34 = vmul.bf16 %v6405_v56, %v5670_v3 }
 0xbcc   :  { %v2310_v54 = vmul.bf16 %v2304_v9, %v5668_v1  ;;  %v2424_v63 = vmul.bf16 %v2304_v9, %v5670_v3  ;;  %v2670_v3 = vmul.bf16 %v2304_v9, %v5719_v44  ;;  %v2856_v59 = vmul.bf16 %v2304_v9, %v5756_v19 }
 0xbce   :  { %4581 = vmatpush3.bf16.xpose.msra.mxu0 %v2310_v54  ;;  %4599 = vmatpush3.bf16.xpose.msra.mxu1 %v2424_v63 }
 0xbcf   :  { %4612 = vmatprep.subr.bf16.mxu0 %v5315_v0  ;;  %4648 = vmatprep.subr.bf16.mxu1 %v5315_v0 }
 0xbd5   :  { %4583 = vmatmul.mubr.bf16.vlgmr.msra.gmra.mrb[96].mxu0 %v6385_v50  ;;  %4601 = vmatmul.mubr.bf16.vlgmr.msra.gmra.mrb[60].mxu1 %v6385_v50 }
 0xbd6   :  { %4613 = vmatpush3.bf16.msra.mxu0 %v2533_v38  ;;  %4649 = vmatpush3.bf16.xpose.msra.mxu1 %v2668_v32 }
 0xbd7   :  { %4614 = vmatprep.subr.bf16.mxu0 %v5315_v0  ;;  %4586 = vmatprep.mubr.msk.bf16.mxu0 %vm5316_vm0, %v5315_v0 }
 0xbd8   :  { %4604 = vmatprep.mubr.msk.bf16.mxu1 %vm5316_vm0, %v5315_v0  ;;  %4650 = vmatprep.subr.bf16.mxu1 %v5315_v0 }
 0xbda   :  { %4615 = vmatpush3.bf16.msra.mxu0 %v2534_v39 }
 0xbdb   :  { %4616 = vmatprep.subr.bf16.mxu0 %v5315_v0 }
 0xbdd   :  { %4587 = vmatmul.mubr.bf16.gmra.mrb[100].mxu0 %v6397_v47  ;;  %4605 = vmatmul.mubr.bf16.gmra.mrb[64].mxu1 %v6397_v47 }
 0xbde   :  { %4617 = vmatpush3.bf16.msra.mxu0 %v2535_v34  ;;  %4651 = vmatpush3.bf16.xpose.msra.mxu1 %v2669_v37 }
 0xbdf   :  { %4590 = vmatprep.mubr.msk.bf16.mxu0 %vm5316_vm0, %v5315_v0  ;;  %4608 = vmatprep.mubr.msk.bf16.mxu1 %vm5316_vm0, %v5315_v0 }
 0xbe0   :  { %4652 = vmatprep.subr.bf16.mxu1 %v5315_v0  ;;  %4630 = vmatprep.subr.bf16.mxu0 %v5315_v0 }
 0xbe5   :  { %4591 = vmatmul.mubr.bf16.gmra.mrb[104].mxu0 %v2301_v42  ;;  %4609 = vmatmul.mubr.bf16.gmra.mrb[68].mxu1 %v2301_v42 }
 0xbe6   :  { %4653 = vmatpush3.bf16.xpose.msra.mxu1 %v2670_v3  ;;  %4654 = vmatprep.mubr.msk.bf16.mxu1 %vm5316_vm0, %v5315_v0  ;;  %v6491_v3 = vld [vmem:[%s7007_s2 + $0x10] sm:$0xff] }
 0xbe7   :  { %4684 = vmatprep.subr.bf16.mxu1 %v5315_v0  ;;  %4618 = vmatprep.mubr.msk.bf16.mxu0 %vm5316_vm0, %v5315_v0 }
 0xbed   :  { %4655 = vmatmul.mubr.bf16.vlgmr.msra.gmra.mrb[72].mxu1 %v6385_v50 }
 0xbee   :  { %4685 = vmatpush3.bf16.xpose.msra.mxu1 %v2854_v29  ;;  %4658 = vmatprep.mubr.msk.bf16.mxu1 %vm5316_vm0, %v5315_v0 }
 0xbef   :  { %4686 = vmatprep.subr.bf16.mxu1 %v5315_v0 }
 0xbf5   :  { %4659 = vmatmul.mubr.bf16.gmra.mrb[76].mxu1 %v6397_v47 }
 0xbf6   :  { %4687 = vmatpush3.bf16.xpose.msra.mxu1 %v2855_v58  ;;  %4662 = vmatprep.mubr.msk.bf16.mxu1 %vm5316_vm0, %v5315_v0 }
 0xbf7   :  { %4688 = vmatprep.subr.bf16.mxu1 %v5315_v0 }
 0xbfd   :  { %4663 = vmatmul.mubr.bf16.gmra.mrb[80].mxu1 %v2301_v42 }
 0xbfe   :  { %4689 = vmatpush3.bf16.xpose.msra.mxu1 %v2856_v59  ;;  %4690 = vmatprep.mubr.msk.bf16.mxu1 %vm5316_vm0, %v5315_v0 }
 0xbff   :  { %4720 = vmatprep.subr.bf16.mxu1 %v5315_v0 }
 0xc05   :  { %4691 = vmatmul.mubr.bf16.vlgmr.msra.gmra.mrb[84].mxu1 %v6385_v50 }
 0xc06   :  { %4694 = vmatprep.mubr.msk.bf16.mxu1 %vm5316_vm0, %v5315_v0 }
 0xc0d   :  { %4695 = vmatmul.mubr.bf16.gmra.mrb[88].mxu1 %v6397_v47 }
 0xc0e   :  { %4698 = vmatprep.mubr.msk.bf16.mxu1 %vm5316_vm0, %v5315_v0 }
 0xc15   :  { %4699 = vmatmul.mubr.bf16.gmra.mrb[92].mxu1 %v2301_v42 }
 0xc16   :  { %4736 = vmatprep.mubr.msk.bf16.mxu1 %vm5316_vm0, %v5315_v0 }
 0xca8   :  { %v2345_v33 = vpop.f32.mrb[96].mxu0  ;;  %v2459_v35 = vpop.f32.mrb[60].mxu1 }
 0xca9   :  { %v2482_v10 = vmul.f32 1.442695, %v2459_v35  ;;  %v4584_v11 = vpop.f32.mrb[97].mxu0  ;;  %v4602_v28 = vpop.f32.mrb[61].mxu1  ;;  %v2368_v13 = vmul.f32 1.442695, %v2345_v33 }
 0xcaa   :  { %v2348_v2 = vpop.f32.mrb[98].mxu0  ;;  %v2462_v36 = vpop.f32.mrb[62].mxu1  ;;  %v6501_v11 = vld [vmem:[%s7007_s2 + $0x18] sm:$0xff] }
 0xcab   :  { %v2484_v50 = vmul.f32 1.442695, %v2462_v36  ;;  %v4585_v16 = vpop.f32.mrb[99].mxu0  ;;  %v4603_v8 = vpop.f32.mrb[63].mxu1  ;;  %5175 = vpow2.f32 %v2482_v10  ;;  %v2370_v53 = vmul.f32 1.442695, %v2348_v2 }
 0xcad   :  { %5177 = vpow2.f32 %v2484_v50 }
 0xcb0   :  { %v2353_v57 = vpop.f32.mrb[100].mxu0  ;;  %v2467_v24 = vpop.f32.mrb[64].mxu1 }
 0xcb1   :  { %v2486_v27 = vmul.f32 1.442695, %v2467_v24  ;;  %v4588_v14 = vpop.f32.mrb[101].mxu0  ;;  %v4606_v20 = vpop.f32.mrb[65].mxu1  ;;  %v2372_v38 = vmul.f32 1.442695, %v2353_v57 }
 0xcb2   :  { %v2356_v47 = vpop.f32.mrb[102].mxu0  ;;  %v2470_v61 = vpop.f32.mrb[66].mxu1  ;;  %v6511_v20 = vld [vmem:[%s7007_s2 + $0x20] sm:$0xff] }
 0xcb3   :  { %v2488_v30 = vmul.f32 1.442695, %v2470_v61  ;;  %v4589_v55 = vpop.f32.mrb[103].mxu0  ;;  %v4607_v40 = vpop.f32.mrb[67].mxu1  ;;  %5179 = vpow2.f32 %v2486_v27  ;;  %v2374_v37 = vmul.f32 1.442695, %v2356_v47 }
 0xcb5   :  { %v5176_v26 = vpop.eup %5175  ;;  %5181 = vpow2.f32 %v2488_v30 }
 0xcb6   :  { %v6474_v7 = vmul.f32 %v6471_v51, %v5176_v26  ;;  %5183 = vpow2.f32 %v2368_v13  ;;  %v6521_v13 = vld [vmem:[%s7007_s2 + $0x28] sm:$0xff] }
 0xcb7   :  { %v5178_v31 = vpop.eup %5177 }
 0xcb8   :  { %v2361_v17 = vpop.f32.mrb[104].mxu0  ;;  %v2475_v52 = vpop.f32.mrb[68].mxu1  ;;  %v2500_v48 = vsel %vm691_vm10, %v6474_v7, 0.0  ;;  %v6484_v25 = vmul.f32 %v6481_v62, %v5178_v31 }
 0xcb9   :  { %v2490_v41 = vmul.f32 1.442695, %v2475_v52  ;;  %v4592_v23 = vpop.f32.mrb[105].mxu0  ;;  %2501 = vadd.xlane.f32.xlu0 %v2500_v48  ;;  %v4610_v60 = vpop.f32.mrb[69].mxu1  ;;  %v2376_v59 = vmul.f32 1.442695, %v2361_v17 }
 0xcba   :  { %v2364_v9 = vpop.f32.mrb[106].mxu0  ;;  %v2478_v42 = vpop.f32.mrb[70].mxu1  ;;  %v2503_v54 = vsel %vm691_vm10, %v6484_v25, 0.0 }
 0xcbb   :  { %v4593_v63 = vpop.f32.mrb[107].mxu0  ;;  %5185 = vpow2.f32 %v2490_v41  ;;  %v2492_v32 = vmul.f32 1.442695, %v2478_v42  ;;  %2504 = vadd.xlane.f32.xlu1 %v2503_v54  ;;  %v4611_v39 = vpop.f32.mrb[71].mxu1  ;;  %v2378_v2 = vmul.f32 1.442695, %v2364_v9 }
 0xcbc   :  { %5187 = vpow2.f32 %v2370_v53 }
 0xcbd   :  { %v5180_v34 = vpop.eup %5179  ;;  %5189 = vpow2.f32 %v2492_v32 }
 0xcbe   :  { %v6494_v29 = vmul.f32 %v6491_v3, %v5180_v34  ;;  %5191 = vpow2.f32 %v2372_v38 }
 0xcbf   :  { %v5182_v58 = vpop.eup %5181  ;;  %5193 = vpow2.f32 %v2374_v37 }
 0xcc0   :  { %v2705_v33 = vpop.f32.mrb[72].mxu1  ;;  %v2506_v35 = vsel %vm691_vm10, %v6494_v29, 0.0  ;;  %v6504_v28 = vmul.f32 %v6501_v11, %v5182_v58  ;;  %5195 = vpow2.f32 %v2376_v59  ;;  %v5184_v57 = vpop.eup %5183 }
 0xcc1   :  { %v4656_v10 = vpop.f32.mrb[73].mxu1  ;;  %2507 = vadd.xlane.f32.xlu0 %v2506_v35  ;;  %v2728_v8 = vmul.f32 1.442695, %v2705_v33  ;;  %5197 = vpow2.f32 %v2378_v2  ;;  %v6527_v17 = vmul.f32 %v6471_v51, %v5184_v57 }
 0xcc2   :  { %v2708_v36 = vpop.f32.mrb[74].mxu1  ;;  %v2509_v50 = vsel %vm691_vm10, %v6504_v28, 0.0 }
 0xcc3   :  { %v4657_v16 = vpop.f32.mrb[75].mxu1  ;;  %2510 = vadd.xlane.f32.xlu1 %v2509_v50  ;;  %v2730_v27 = vmul.f32 1.442695, %v2708_v36  ;;  %5199 = vpow2.f32 %v2728_v8  ;;  %v2386_v42 = vsel %vm691_vm10, %v6527_v17, 0.0 }
 0xcc5   :  { %v5186_v24 = vpop.eup %5185  ;;  %5201 = vpow2.f32 %v2730_v27 }
 0xcc6   :  { %v5188_v14 = vpop.eup %5187  ;;  %v6514_v47 = vmul.f32 %v6511_v20, %v5186_v24 }
 0xcc7   :  { %v5190_v61 = vpop.eup %5189  ;;  %v6532_v60 = vmul.f32 %v6481_v62, %v5188_v14 }
 0xcc8   :  { %v2713_v30 = vpop.f32.mrb[76].mxu1  ;;  %v2512_v40 = vsel %vm691_vm10, %v6514_v47, 0.0  ;;  %v6524_v31 = vmul.f32 %v6521_v13, %v5190_v61  ;;  %v5192_v52 = vpop.eup %5191 }
 0xcc9   :  { %v2732_v55 = vmul.f32 1.442695, %v2713_v30  ;;  %v4660_v26 = vpop.f32.mrb[77].mxu1  ;;  %2513 = vadd.xlane.f32.xlu0 %v2512_v40  ;;  %v5194_v9 = vpop.eup %5193  ;;  %v6537_v54 = vmul.f32 %v6491_v3, %v5192_v52  ;;  %v2389_v38 = vsel %vm691_vm10, %v6532_v60, 0.0 }
 0xcca   :  { %v2716_v53 = vpop.f32.mrb[78].mxu1  ;;  %v2515_v48 = vsel %vm691_vm10, %v6524_v31, 0.0  ;;  %v5196_v63 = vpop.eup %5195  ;;  %v6542_v32 = vmul.f32 %v6501_v11, %v5194_v9 }
 0xccb   :  { %v2734_v41 = vmul.f32 1.442695, %v2716_v53  ;;  %v4661_v23 = vpop.f32.mrb[79].mxu1  ;;  %5203 = vpow2.f32 %v2732_v55  ;;  %2516 = vadd.xlane.f32.xlu1 %v2515_v48  ;;  %v5198_v39 = vpop.eup %5197  ;;  %v2392_v59 = vsel %vm691_vm10, %v6537_v54, 0.0  ;;  %v6547_v33 = vmul.f32 %v6511_v20, %v5196_v63 }
 0xccc   :  { %v2395_v50 = vsel %vm691_vm10, %v6542_v32, 0.0  ;;  %v6552_v16 = vmul.f32 %v6521_v13, %v5198_v39 }
 0xccd   :  { %5205 = vpow2.f32 %v2734_v41  ;;  %2387 = vadd.xlane.f32.xlu0 %v2386_v42  ;;  %v5200_v35 = vpop.eup %5199  ;;  %v2398_v57 = vsel %vm691_vm10, %v6547_v33, 0.0 }
 0xcce   :  { %v6557_v24 = vmul.f32 %v6471_v51, %v5200_v35  ;;  %v2401_v14 = vsel %vm691_vm10, %v6552_v16, 0.0 }
 0xccf   :  { %2390 = vadd.xlane.f32.xlu1 %v2389_v38  ;;  %v5202_v8 = vpop.eup %5201 }
 0xcd0   :  { %v2721_v34 = vpop.f32.mrb[80].mxu1  ;;  %v6562_v61 = vmul.f32 %v6481_v62, %v5202_v8  ;;  %v2746_v52 = vsel %vm691_vm10, %v6557_v24, 0.0 }
 0xcd1   :  { %v2736_v37 = vmul.f32 1.442695, %v2721_v34  ;;  %v4664_v58 = vpop.f32.mrb[81].mxu1  ;;  %2393 = vadd.xlane.f32.xlu0 %v2392_v59 }
 0xcd2   :  { %v2724_v10 = vpop.f32.mrb[82].mxu1  ;;  %v2749_v9 = vsel %vm691_vm10, %v6562_v61, 0.0 }
 0xcd3   :  { %5207 = vpow2.f32 %v2736_v37  ;;  %v2738_v2 = vmul.f32 1.442695, %v2724_v10  ;;  %v4665_v36 = vpop.f32.mrb[83].mxu1  ;;  %2396 = vadd.xlane.f32.xlu1 %v2395_v50 }
 0xcd5   :  { %5209 = vpow2.f32 %v2738_v2  ;;  %v5204_v27 = vpop.eup %5203  ;;  %2399 = vadd.xlane.f32.xlu0 %v2398_v57 }
 0xcd6   :  { %v6567_v53 = vmul.f32 %v6491_v3, %v5204_v27 }
 0xcd7   :  { %v5206_v30 = vpop.eup %5205  ;;  %2402 = vadd.xlane.f32.xlu1 %v2401_v14 }
 0xcd8   :  { %v2891_v55 = vpop.f32.mrb[84].mxu1  ;;  %v6572_v42 = vmul.f32 %v6501_v11, %v5206_v30  ;;  %v2752_v38 = vsel %vm691_vm10, %v6567_v53, 0.0 }
 0xcd9   :  { %v2914_v40 = vmul.f32 1.442695, %v2891_v55  ;;  %v4692_v26 = vpop.f32.mrb[85].mxu1  ;;  %2747 = vadd.xlane.f32.xlu0 %v2746_v52 }
 0xcda   :  { %v2894_v41 = vpop.f32.mrb[86].mxu1  ;;  %v2755_v37 = vsel %vm691_vm10, %v6572_v42, 0.0 }
 0xcdb   :  { %5211 = vpow2.f32 %v2914_v40  ;;  %v2916_v48 = vmul.f32 1.442695, %v2894_v41  ;;  %v4693_v23 = vpop.f32.mrb[87].mxu1  ;;  %2750 = vadd.xlane.f32.xlu1 %v2749_v9 }
 0xcdd   :  { %v5208_v63 = vpop.eup %5207  ;;  %5213 = vpow2.f32 %v2916_v48  ;;  %2753 = vadd.xlane.f32.xlu0 %v2752_v38 }
 0xcde   :  { %v6577_v39 = vmul.f32 %v6511_v20, %v5208_v63 }
 0xcdf   :  { %v5210_v34 = vpop.eup %5209  ;;  %2756 = vadd.xlane.f32.xlu1 %v2755_v37 }
 0xce0   :  { %v2899_v58 = vpop.f32.mrb[88].mxu1  ;;  %v2758_v59 = vsel %vm691_vm10, %v6577_v39, 0.0  ;;  %v6584_v35 = vmul.f32 %v6521_v13, %v5210_v34 }
 0xce1   :  { %v2918_v10 = vmul.f32 1.442695, %v2899_v58  ;;  %v4696_v2 = vpop.f32.mrb[89].mxu1  ;;  %2759 = vadd.xlane.f32.xlu0 %v2758_v59 }
 0xce2   :  { %v2902_v36 = vpop.f32.mrb[90].mxu1  ;;  %v2761_v50 = vsel %vm691_vm10, %v6584_v35, 0.0 }
 0xce3   :  { %5215 = vpow2.f32 %v2918_v10  ;;  %v2920_v8 = vmul.f32 1.442695, %v2902_v36  ;;  %v4697_v57 = vpop.f32.mrb[91].mxu1  ;;  %2762 = vadd.xlane.f32.xlu1 %v2761_v50  ;;  %v4999_v50 = vld [vmem:[%s7008_s7 + $0x40] sm:$0xff]  }
 0xce4   :  { %4721 = vmatpush3.bf16.msra.mxu1 %v4999_v50  ;;  %v5003_v57 = vld [vmem:[%s7008_s7 + $0x60] sm:$0xff]  }
 0xce5   :  { %v5212_v27 = vpop.eup %5211  ;;  %5217 = vpow2.f32 %v2920_v8  ;;  %4722 = vmatprep.subr.bf16.mxu1 %v5315_v0  ;;  %v5002_v8 = vld [vmem:[%s7008_s7 + $0x58] sm:$0xff]  }
 0xce6   :  { %v6589_v14 = vmul.f32 %v6471_v51, %v5212_v27  ;;  %v5004_v27 = vld [vmem:[%s7008_s7 + $0x68] sm:$0xff]  }
 0xce7   :  { %v5214_v30 = vpop.eup %5213 }
 0xce8   :  { %v2907_v55 = vpop.f32.mrb[92].mxu1  ;;  %v2932_v40 = vsel %vm691_vm10, %v6589_v14, 0.0  ;;  %v6594_v26 = vmul.f32 %v6481_v62, %v5214_v30 }
 0xce9   :  { %v2922_v52 = vmul.f32 1.442695, %v2907_v55  ;;  %v4700_v41 = vpop.f32.mrb[93].mxu1  ;;  %2933 = vadd.xlane.f32.xlu0 %v2932_v40  ;;  %v5005_v55 = vld [vmem:[%s7008_s7 + $0x70] sm:$0xff]  }
 0xcea   :  { %v2910_v48 = vpop.f32.mrb[94].mxu1  ;;  %v2935_v23 = vsel %vm691_vm10, %v6594_v26, 0.0 }
 0xceb   :  { %5219 = vpow2.f32 %v2922_v52  ;;  %v2924_v9 = vmul.f32 1.442695, %v2910_v48  ;;  %v4701_v63 = vpop.f32.mrb[95].mxu1  ;;  %2936 = vadd.xlane.f32.xlu1 %v2935_v23 }
 0xced   :  { %v5216_v51 = vpop.eup %5215  ;;  %5221 = vpow2.f32 %v2924_v9 }
 0xcee   :  { %v6599_v38 = vmul.f32 %v6491_v3, %v5216_v51 }
 0xcef   :  { %v5218_v34 = vpop.eup %5217 }
 0xcf0   :  { %v2938_v62 = vsel %vm691_vm10, %v6599_v38, 0.0  ;;  %v6604_v37 = vmul.f32 %v6501_v11, %v5218_v34 }
 0xcf1   :  { %2939 = vadd.xlane.f32.xlu0 %v2938_v62  ;;  %v2419_v62 = vmul.bf16 %v6381_v22, %v5668_v1 }
 0xcf2   :  { %v2941_v58 = vsel %vm691_vm10, %v6604_v37, 0.0 }
 0xcf3   :  { %2942 = vadd.xlane.f32.xlu1 %v2941_v58 }
 0xcf5   :  { %v5220_v59 = vpop.eup %5219 }
 0xcf6   :  { %v6609_v10 = vmul.f32 %v6511_v20, %v5220_v59  ;;  %v5000_v20 = vld [vmem:[%s7008_s7 + $0x48] sm:$0xff]  }
 0xcf7   :  { %v5222_v2 = vpop.eup %5221  ;;  %4723 = vmatpush3.bf16.msra.mxu1 %v5000_v20 }
 0xcf8   :  { %v2944_v3 = vsel %vm691_vm10, %v6609_v10, 0.0  ;;  %v6614_v36 = vmul.f32 %v6521_v13, %v5222_v2  ;;  %v5001_v13 = vld [vmem:[%s7008_s7 + $0x50] sm:$0xff]   ;;  %4724 = vmatprep.subr.bf16.mxu1 %v5315_v0 }
 0xcf9   :  { %2945 = vadd.xlane.f32.xlu0 %v2944_v3 }
 0xcfa   :  { %v2947_v11 = vsel %vm691_vm10, %v6614_v36, 0.0 }
 0xcfb   :  { %2948 = vadd.xlane.f32.xlu1 %v2947_v11  ;;  %4725 = vmatpush3.bf16.msra.mxu1 %v5001_v13  ;;  %v2421_v13 = vmul.bf16 %v6405_v56, %v5668_v1 }
 0xcfc   :  { %4726 = vmatprep.subr.bf16.mxu1 %v5315_v0 }
 0xcff   :  { %4727 = vmatpush3.bf16.msra.mxu1 %v5002_v8 }
 0xd00   :  { %4728 = vmatprep.subr.bf16.mxu1 %v5315_v0 }
 0xd03   :  { %4729 = vmatpush3.bf16.msra.mxu1 %v5003_v57 }
 0xd04   :  { %4730 = vmatprep.subr.bf16.mxu1 %v5315_v0 }
 0xd07   :  { %4731 = vmatpush3.bf16.msra.mxu1 %v5004_v27 }
 0xd08   :  { %4732 = vmatprep.subr.bf16.mxu1 %v5315_v0 }
 0xd0b   :  { %4733 = vmatpush3.bf16.msra.mxu1 %v5005_v55 }
 0xd0c   :  { %4734 = vmatprep.subr.bf16.mxu1 %v5315_v0 }
 0xd46   :  { %v2502_v30 = vpop.xlane.xlu0 %2501 }
 0xd47   :  { %5223 = vrcp.f32 %v2502_v30 }
 0xd48   :  { %v2505_v40 = vpop.xlane.xlu1 %2504 }
 0xd49   :  { %5225 = vrcp.f32 %v2505_v40 }
 0xd4e   :  { %v2508_v52 = vpop.xlane.xlu0 %2507 }
 0xd4f   :  { %5227 = vrcp.f32 %v2508_v52 }
 0xd50   :  { %v2511_v41 = vpop.xlane.xlu1 %2510 }
 0xd51   :  { %v5224_v48 = vpop.eup %5223  ;;  %5229 = vrcp.f32 %v2511_v41 }
 0xd52   :  { %v2524_v9 = vmul.f32 %v5224_v48, %v6474_v7 }
 0xd53   :  { %v5226_v23 = vpop.eup %5225 }
 0xd54   :  { %v2525_v63 = vmul.f32 %v5226_v23, %v6484_v25  ;;  %v2420_v25 = vmul.bf16 %v6393_v18, %v5668_v1 }
 0xd56   :  { %v2530_v51 = vpack.c.bf16 %v2525_v63, %v2524_v9  ;;  %v2514_v34 = vpop.xlane.xlu0 %2513 }
 0xd57   :  { %5231 = vrcp.f32 %v2514_v34 }
 0xd58   :  { %v2517_v58 = vpop.xlane.xlu1 %2516  ;;  %4619 = vmatmul.mubr.msk.bf16.vlgmr.msra.gmra.mrb[108].mxu0 %vm691_vm10, %v2530_v51 }
 0xd59   :  { %v5228_v59 = vpop.eup %5227  ;;  %5233 = vrcp.f32 %v2517_v58  ;;  %4631 = vmatpush3.bf16.msra.mxu0 %v2419_v62  ;;  %4622 = vmatprep.mubr.msk.bf16.mxu0 %vm5316_vm0, %v5315_v0 }
 0xd5a   :  { %4632 = vmatprep.subr.bf16.mxu0 %v5315_v0  ;;  %v2388_v2 = vpop.xlane.xlu0 %2387  ;;  %v2526_v11 = vmul.f32 %v5228_v59, %v6494_v29 }
 0xd5b   :  { %v5230_v7 = vpop.eup %5229 }
 0xd5c   :  { %v2391_v3 = vpop.xlane.xlu1 %2390  ;;  %v2527_v50 = vmul.f32 %v5230_v7, %v6504_v28  ;;  %v2781_v7 = vmul.bf16 %v6405_v56, %v5719_v44 }
 0xd5d   :  { %4633 = vmatpush3.bf16.msra.mxu0 %v2420_v25  ;;  %5235 = vrcp.f32 %v2391_v3 }
 0xd5e   :  { %4634 = vmatprep.subr.bf16.mxu0 %v5315_v0  ;;  %v2531_v20 = vpack.c.bf16 %v2527_v50, %v2526_v11  ;;  %5237 = vrcp.f32 %v2388_v2  ;;  %v2394_v28 = vpop.xlane.xlu0 %2393 }
 0xd60   :  { %4623 = vmatmul.mubr.msk.bf16.gmra.mrb[112].mxu0 %vm691_vm10, %v2531_v20  ;;  %v2397_v57 = vpop.xlane.xlu1 %2396 }
 0xd61   :  { %v5232_v8 = vpop.eup %5231  ;;  %4635 = vmatpush3.bf16.msra.mxu0 %v2421_v13  ;;  %4626 = vmatprep.mubr.msk.bf16.mxu0 %vm5316_vm0, %v5315_v0  ;;  %5239 = vrcp.f32 %v2397_v57 }
 0xd62   :  { %4666 = vmatprep.subr.bf16.mxu0 %v5315_v0  ;;  %v2528_v27 = vmul.f32 %v5232_v8, %v6514_v47  ;;  %5241 = vrcp.f32 %v2394_v28  ;;  %v2400_v23 = vpop.xlane.xlu0 %2399 }
 0xd63   :  { %v5234_v29 = vpop.eup %5233 }
 0xd64   :  { %v2529_v30 = vmul.f32 %v5234_v29, %v6524_v31  ;;  %v2403_v41 = vpop.xlane.xlu1 %2402  ;;  %v2779_v31 = vmul.bf16 %v6381_v22, %v5719_v44 }
 0xd65   :  { %5243 = vrcp.f32 %v2403_v41 }
 0xd66   :  { %v2532_v55 = vpack.c.bf16 %v2529_v30, %v2528_v27  ;;  %5245 = vrcp.f32 %v2400_v23  ;;  %v2748_v34 = vpop.xlane.xlu0 %2747 }
 0xd67   :  { %v5236_v40 = vpop.eup %5235 }
 0xd68   :  { %4627 = vmatmul.mubr.msk.bf16.gmra.mrb[116].mxu0 %vm691_vm10, %v2532_v55  ;;  %v5238_v1 = vpop.eup %5237  ;;  %v2411_v52 = vmul.f32 %v5236_v40, %v6532_v60  ;;  %v2751_v51 = vpop.xlane.xlu1 %2750  ;;  %v2780_v60 = vmul.bf16 %v6393_v18, %v5719_v44 }
 0xd69   :  { %4636 = vmatprep.mubr.msk.bf16.mxu0 %vm5316_vm0, %v5315_v0  ;;  %v2410_v48 = vmul.f32 %v5238_v1, %v6527_v17  ;;  %5247 = vrcp.f32 %v2751_v51  ;;  %v2967_v1 = vmul.bf16 %v6405_v56, %v5756_v19 }
 0xd6a   :  { %5249 = vrcp.f32 %v2748_v34  ;;  %v2754_v2 = vpop.xlane.xlu0 %2753 }
 0xd6b   :  { %v2416_v47 = vpack.c.bf16 %v2411_v52, %v2410_v48  ;;  %v5240_v9 = vpop.eup %5239 }
 0xd6c   :  { %v5242_v63 = vpop.eup %5241  ;;  %v2413_v17 = vmul.f32 %v5240_v9, %v6542_v32  ;;  %v2757_v32 = vpop.xlane.xlu1 %2756 }
 0xd6d   :  { %v2412_v62 = vmul.f32 %v5242_v63, %v6537_v54  ;;  %5251 = vrcp.f32 %v2757_v32 }
 0xd6e   :  { %5253 = vrcp.f32 %v2754_v2  ;;  %v2760_v8 = vpop.xlane.xlu0 %2759 }
 0xd6f   :  { %v2417_v58 = vpack.c.bf16 %v2413_v17, %v2412_v62  ;;  %v5244_v59 = vpop.eup %5243 }
 0xd70   :  { %4637 = vmatmul.mubr.msk.bf16.vlgmr.msra.gmra.mrb[108].mxu0 %vm691_vm10, %v2416_v47  ;;  %v5246_v25 = vpop.eup %5245  ;;  %v2415_v54 = vmul.f32 %v5244_v59, %v6552_v16  ;;  %v2763_v13 = vpop.xlane.xlu1 %2762 }
 0xd71   :  { %4667 = vmatpush3.bf16.msra.mxu0 %v2779_v31  ;;  %4640 = vmatprep.mubr.msk.bf16.mxu0 %vm5316_vm0, %v5315_v0  ;;  %v2414_v3 = vmul.f32 %v5246_v25, %v6547_v33  ;;  %5255 = vrcp.f32 %v2763_v13  ;;  %v2965_v33 = vmul.bf16 %v6381_v22, %v5756_v19 }
 0xd72   :  { %4668 = vmatprep.subr.bf16.mxu0 %v5315_v0  ;;  %5257 = vrcp.f32 %v2760_v8 }
 0xd73   :  { %v2418_v11 = vpack.c.bf16 %v2415_v54, %v2414_v3  ;;  %v5248_v50 = vpop.eup %5247 }
 0xd74   :  { %v5250_v44 = vpop.eup %5249  ;;  %v2771_v20 = vmul.f32 %v5248_v50, %v6562_v61  ;;  %v2966_v61 = vmul.bf16 %v6393_v18, %v5756_v19 }
 0xd75   :  { %4669 = vmatpush3.bf16.msra.mxu0 %v2780_v60  ;;  %v2770_v16 = vmul.f32 %v5250_v44, %v6557_v24 }
 0xd76   :  { %4670 = vmatprep.subr.bf16.mxu0 %v5315_v0  ;;  %v2934_v30 = vpop.xlane.xlu0 %2933 }
 0xd77   :  { %v2776_v57 = vpack.c.bf16 %v2771_v20, %v2770_v16  ;;  %v5252_v29 = vpop.eup %5251  ;;  %v3998_v16 = vld [vmem:[%s7009_s8 + $0x1] ss:$0 sm:$0xff] }
 0xd78   :  { %4641 = vmatmul.mubr.msk.bf16.gmra.mrb[112].mxu0 %vm691_vm10, %v2417_v58  ;;  %v5254_v28 = vpop.eup %5253  ;;  %v2937_v27 = vpop.xlane.xlu1 %2936  ;;  %v2773_v24 = vmul.f32 %v5252_v29, %v6572_v42 }
 0xd79   :  { %4671 = vmatpush3.bf16.msra.mxu0 %v2781_v7  ;;  %4644 = vmatprep.mubr.msk.bf16.mxu0 %vm5316_vm0, %v5315_v0  ;;  %v2772_v55 = vmul.f32 %v5254_v28, %v6567_v53  ;;  %5259 = vrcp.f32 %v2937_v27 }
 0xd7a   :  { %4702 = vmatprep.subr.bf16.mxu0 %v5315_v0  ;;  %5261 = vrcp.f32 %v2934_v30 }
 0xd7b   :  { %v2777_v22 = vpack.c.bf16 %v2773_v24, %v2772_v55  ;;  %v5256_v40 = vpop.eup %5255 }
 0xd7c   :  { %v5258_v52 = vpop.eup %5257  ;;  %v2775_v53 = vmul.f32 %v5256_v40, %v6584_v35 }
 0xd7d   :  { %v2774_v41 = vmul.f32 %v5258_v52, %v6577_v39 }
 0xd7e   :  { %v2940_v42 = vpop.xlane.xlu0 %2939 }
 0xd7f   :  { %v2778_v48 = vpack.c.bf16 %v2775_v53, %v2774_v41 }
 0xd80   :  { %4645 = vmatmul.mubr.msk.bf16.gmra.mrb[116].mxu0 %vm691_vm10, %v2418_v11  ;;  %v2943_v18 = vpop.xlane.xlu1 %2942 }
 0xd81   :  { %4672 = vmatprep.mubr.msk.bf16.mxu0 %vm5316_vm0, %v5315_v0  ;;  %5263 = vrcp.f32 %v2943_v18 }
 0xd82   :  { %5265 = vrcp.f32 %v2940_v42 }
 0xd83   :  { %v5260_v23 = vpop.eup %5259 }
 0xd84   :  { %v5262_v19 = vpop.eup %5261  ;;  %v2957_v56 = vmul.f32 %v5260_v23, %v6594_v26 }
 0xd85   :  { %v2956_v35 = vmul.f32 %v5262_v19, %v6589_v14 }
 0xd86   :  { %v2946_v9 = vpop.xlane.xlu0 %2945 }
 0xd87   :  { %v2962_v31 = vpack.c.bf16 %v2957_v56, %v2956_v35  ;;  %v5008_v56 = vld [vmem:[%s7010_s9 + $0x48] sm:$0xff]  }
 0xd88   :  { %4673 = vmatmul.mubr.msk.bf16.vlgmr.msra.gmra.mrb[108].mxu0 %vm691_vm10, %v2776_v57  ;;  %v2949_v47 = vpop.xlane.xlu1 %2948 }
 0xd89   :  { %4703 = vmatpush3.bf16.msra.mxu0 %v2965_v33  ;;  %4676 = vmatprep.mubr.msk.bf16.mxu0 %vm5316_vm0, %v5315_v0  ;;  %5267 = vrcp.f32 %v2949_v47 }
 0xd8a   :  { %4704 = vmatprep.subr.bf16.mxu0 %v5315_v0  ;;  %5269 = vrcp.f32 %v2946_v9 }
 0xd8b   :  { %v5264_v63 = vpop.eup %5263 }
 0xd8c   :  { %v5266_v39 = vpop.eup %5265  ;;  %v2959_v51 = vmul.f32 %v5264_v63, %v6604_v37 }
 0xd8d   :  { %4705 = vmatpush3.bf16.msra.mxu0 %v2966_v61  ;;  %v2958_v17 = vmul.f32 %v5266_v39, %v6599_v38  ;;  %v5006_v38 = vld [vmem:[%s7008_s7 + $0x78] sm:$0xff]  }
 0xd8e   :  { %4706 = vmatprep.subr.bf16.mxu0 %v5315_v0  ;;  %4735 = vmatpush3.bf16.msra.mxu1 %v5006_v38 }
 0xd8f   :  { %v2963_v60 = vpack.c.bf16 %v2959_v51, %v2958_v17  ;;  %4748 = vmatprep.subr.bf16.mxu1 %v5315_v0 }
 0xd90   :  { %4677 = vmatmul.mubr.msk.bf16.gmra.mrb[112].mxu0 %vm691_vm10, %v2777_v22 }
 0xd91   :  { %4707 = vmatpush3.bf16.msra.mxu0 %v2967_v1  ;;  %4680 = vmatprep.mubr.msk.bf16.mxu0 %vm5316_vm0, %v5315_v0 }
 0xd92   :  { %4776 = vmatprep.subr.bf16.mxu0 %v5315_v0 }
 0xd93   :  { %v5268_v26 = vpop.eup %5267 }
 0xd94   :  { %v5270_v14 = vpop.eup %5269  ;;  %v2961_v34 = vmul.f32 %v5268_v26, %v6614_v36 }
 0xd95   :  { %v2960_v62 = vmul.f32 %v5270_v14, %v6609_v10 }
 0xd97   :  { %v2964_v58 = vpack.c.bf16 %v2961_v34, %v2960_v62 }
 0xd98   :  { %4681 = vmatmul.mubr.msk.bf16.gmra.mrb[116].mxu0 %vm691_vm10, %v2778_v48 }
 0xd99   :  { %4708 = vmatprep.mubr.msk.bf16.mxu0 %vm5316_vm0, %v5315_v0 }
 0xda0   :  { %4709 = vmatmul.mubr.msk.bf16.vlgmr.msra.gmra.mrb[108].mxu0 %vm691_vm10, %v2962_v31 }
 0xda1   :  { %4712 = vmatprep.mubr.msk.bf16.mxu0 %vm5316_vm0, %v5315_v0 }
 0xda8   :  { %4713 = vmatmul.mubr.msk.bf16.gmra.mrb[112].mxu0 %vm691_vm10, %v2963_v60 }
 0xda9   :  { %4716 = vmatprep.mubr.msk.bf16.mxu0 %vm5316_vm0, %v5315_v0 }
 0xdb0   :  { %4717 = vmatmul.mubr.msk.bf16.gmra.mrb[116].mxu0 %vm691_vm10, %v2964_v58 }
 0xdb1   :  { %4792 = vmatprep.mubr.msk.bf16.mxu0 %vm5316_vm0, %v5315_v0 }
 0xe73   :  { %v3011_v37 = vpop.f32.mrb[108].mxu0 }
 0xe74   :  { %v4710_v59 = vpop.f32.mrb[109].mxu0 }
 0xe75   :  { %v3014_v7 = vpop.f32.mrb[110].mxu0 }
 0xe76   :  { %v3040_v25 = vpack.c.bf16 %v3014_v7, %v3011_v37  ;;  %v4711_v36 = vpop.f32.mrb[111].mxu0 }
 0xe78   :  { %4737 = vmatmul.mubr.bf16.vlgmr.msra.gmra.mrb[96].mxu1 %v3040_v25 }
 0xe79   :  { %4740 = vmatprep.mubr.msk.bf16.mxu1 %vm5316_vm0, %v5315_v0 }
 0xe7b   :  { %v3019_v10 = vpop.f32.mrb[112].mxu0 }
 0xe7c   :  { %v4714_v32 = vpop.f32.mrb[113].mxu0 }
 0xe7d   :  { %v3022_v54 = vpop.f32.mrb[114].mxu0 }
 0xe7e   :  { %v3041_v2 = vpack.c.bf16 %v3022_v54, %v3019_v10  ;;  %v4715_v3 = vpop.f32.mrb[115].mxu0 }
 0xe80   :  { %4741 = vmatmul.mubr.bf16.gmra.mrb[100].mxu1 %v3041_v2 }
 0xe81   :  { %4744 = vmatprep.mubr.msk.bf16.mxu1 %vm5316_vm0, %v5315_v0 }
 0xe83   :  { %v3027_v11 = vpop.f32.mrb[116].mxu0 }
 0xe84   :  { %v4718_v50 = vpop.f32.mrb[117].mxu0 }
 0xe85   :  { %v3030_v44 = vpop.f32.mrb[118].mxu0 }
 0xe86   :  { %v3042_v20 = vpack.c.bf16 %v3030_v44, %v3027_v11  ;;  %v4719_v13 = vpop.f32.mrb[119].mxu0  ;;  %v5009_v44 = vld [vmem:[%s7010_s9 + $0x50] sm:$0xff]  }
 0xe87   :  { %v5010_v13 = vld [vmem:[%s7010_s9 + $0x58] sm:$0xff]  }
 0xe88   :  { %4745 = vmatmul.mubr.bf16.gmra.mrb[104].mxu1 %v3042_v20 }
 0xe89   :  { %4764 = vmatprep.mubr.msk.bf16.mxu1 %vm5316_vm0, %v5315_v0 }
 0xf4b   :  { %v3150_v8 = vpop.f32.mrb[96].mxu1 }
 0xf4c   :  { %v3151_v57 = vadd.f32 %v3998_v16, %v3150_v8  ;;  %v4738_v29 = vpop.f32.mrb[97].mxu1  ;;  %v5012_v8 = vld [vmem:[%s7010_s9 + $0x68] sm:$0xff]  }
 0xf4d   :  { %v3153_v33 = vpop.f32.mrb[98].mxu1  ;;  %v5014_v29 = vld [vmem:[%s7010_s9 + $0x78] sm:$0xff]  }
 0xf4e   :  { %v6747_v28 = vadd.f32 %v3151_v57, %v6214_v21  ;;  %v3154_v27 = vadd.f32 %v3998_v16, %v3153_v33  ;;  %v4739_v24 = vpop.f32.mrb[99].mxu1  ;;  %v5013_v57 = vld [vmem:[%s7010_s9 + $0x70] sm:$0xff]  }
 0xf50   :  { %v6750_v61 = vadd.f32 %v3154_v27, %v6217_v4  ;;  %3179 = vadd.xlane.f32.xlu0 %v6747_v28 }
 0xf52   :  { %3181 = vadd.xlane.f32.xlu1 %v6750_v61 }
 0xf53   :  { %v3158_v30 = vpop.f32.mrb[100].mxu1 }
 0xf54   :  { %v3159_v55 = vadd.f32 %v3998_v16, %v3158_v30  ;;  %v4742_v22 = vpop.f32.mrb[101].mxu1 }
 0xf55   :  { %v3161_v40 = vpop.f32.mrb[102].mxu1 }
 0xf56   :  { %v6755_v1 = vadd.f32 %v3159_v55, %v6222_v5  ;;  %v3162_v52 = vadd.f32 %v3998_v16, %v3161_v40  ;;  %v4743_v18 = vpop.f32.mrb[103].mxu1 }
 0xf58   :  { %v6758_v21 = vadd.f32 %v3162_v52, %v6225_v6  ;;  %3183 = vadd.xlane.f32.xlu0 %v6755_v1  ;;  %v5007_v6 = vld [vmem:[%s7010_s9 + $0x40] sm:$0xff]  }
 0xf59   :  { %4749 = vmatpush3.bf16.msra.mxu1 %v5007_v6 }
 0xf5a   :  { %3185 = vadd.xlane.f32.xlu1 %v6758_v21  ;;  %4750 = vmatprep.subr.bf16.mxu1 %v5315_v0 }
 0xf5b   :  { %v3166_v4 = vpop.f32.mrb[104].mxu1 }
 0xf5c   :  { %v3167_v53 = vadd.f32 %v3998_v16, %v3166_v4  ;;  %v4746_v42 = vpop.f32.mrb[105].mxu1 }
 0xf5d   :  { %v3169_v41 = vpop.f32.mrb[106].mxu1  ;;  %4751 = vmatpush3.bf16.msra.mxu1 %v5008_v56 }
 0xf5e   :  { %v6763_v48 = vadd.f32 %v3167_v53, %v6230_v15  ;;  %v3170_v23 = vadd.f32 %v3998_v16, %v3169_v41  ;;  %v4747_v19 = vpop.f32.mrb[107].mxu1  ;;  %4752 = vmatprep.subr.bf16.mxu1 %v5315_v0  ;;  %v5011_v16 = vld [vmem:[%s7010_s9 + $0x60] sm:$0xff]  }
 0xf5f   :  { %v5314_v41 = vld [vmem:[%s7005_s4 + $0x4] sm:$0xf] }
 0xf60   :  { %v6766_v5 = vadd.f32 %v3170_v23, %v6233_v43  ;;  %3187 = vadd.xlane.f32.xlu0 %v6763_v48  ;;  %v3254_v23 = vrot.slane %v5314_v41, %v5646_v12 }
 0xf61   :  { %4753 = vmatpush3.bf16.msra.mxu1 %v5009_v44 }
 0xf62   :  { %3189 = vadd.xlane.f32.xlu1 %v6766_v5  ;;  %4754 = vmatprep.subr.bf16.mxu1 %v5315_v0 }
 0xf65   :  { %4755 = vmatpush3.bf16.msra.mxu1 %v5010_v13  ;;  %v5018_v13 = vld [vmem:[%s7011_s11 + $0x58] sm:$0xff]  }
 0xf66   :  { %4756 = vmatprep.subr.bf16.mxu1 %v5315_v0 }
 0xf69   :  { %4757 = vmatpush3.bf16.msra.mxu1 %v5011_v16  ;;  %v5019_v16 = vld [vmem:[%s7011_s11 + $0x60] sm:$0xff]  }
 0xf6a   :  { %4758 = vmatprep.subr.bf16.mxu1 %v5315_v0 }
 0xf6d   :  { %4759 = vmatpush3.bf16.msra.mxu1 %v5012_v8  ;;  %v5020_v8 = vld [vmem:[%s7011_s11 + $0x68] sm:$0xff]  }
 0xf6e   :  { %4760 = vmatprep.subr.bf16.mxu1 %v5315_v0 }
 0xf71   :  { %4761 = vmatpush3.bf16.msra.mxu1 %v5013_v57  ;;  %v5021_v57 = vld [vmem:[%s7011_s11 + $0x70] sm:$0xff]  }
 0xf72   :  { %4762 = vmatprep.subr.bf16.mxu1 %v5315_v0 }
 0xf75   :  { %4763 = vmatpush3.bf16.msra.mxu1 %v5014_v29  ;;  %v5022_v29 = vld [vmem:[%s7011_s11 + $0x78] sm:$0xff]  }
 0xf76   :  { %4804 = vmatprep.subr.bf16.mxu1 %v5315_v0 }
 0xfdd   :  { %v3180_v15 = vpop.xlane.xlu0 %3179 }
 0xfde   :  { %v3191_v43 = vmul.f32 0.03125, %v3180_v15 }
 0xfdf   :  { %v3182_v47 = vpop.xlane.xlu1 %3181 }
 0xfe0   :  { %v3197_v35 = vsub.f32 %v6747_v28, %v3191_v43  ;;  %v3192_v9 = vmul.f32 0.03125, %v3182_v47 }
 0xfe2   :  { %v3198_v31 = vsub.f32 %v6750_v61, %v3192_v9  ;;  %v6781_v63 = vmul.f32 %v5505_v46, %v3197_v35 }
 0xfe4   :  { %v3209_v39 = vmul.f32 %v6781_v63, %v6781_v63  ;;  %v6786_v51 = vmul.f32 %v5505_v46, %v3198_v31  ;;  %v3264_v31 = vrot.slane %v5314_v41, %v1567_v45 }
 0xfe5   :  { %v3184_v17 = vpop.xlane.xlu0 %3183 }
 0xfe6   :  { %v3193_v60 = vmul.f32 0.03125, %v3184_v17  ;;  %3215 = vadd.xlane.f32.xlu0 %v3209_v39  ;;  %v3210_v26 = vmul.f32 %v6786_v51, %v6786_v51 }
 0xfe7   :  { %v3186_v14 = vpop.xlane.xlu1 %3185 }
 0xfe8   :  { %v3199_v34 = vsub.f32 %v6755_v1, %v3193_v60  ;;  %v3194_v62 = vmul.f32 0.03125, %v3186_v14  ;;  %3217 = vadd.xlane.f32.xlu1 %v3210_v26 }
 0xfea   :  { %v3200_v58 = vsub.f32 %v6758_v21, %v3194_v62  ;;  %v6793_v38 = vmul.f32 %v5505_v46, %v3199_v34 }
 0xfec   :  { %v3211_v37 = vmul.f32 %v6793_v38, %v6793_v38  ;;  %v6798_v59 = vmul.f32 %v5505_v46, %v3200_v58 }
 0xfed   :  { %v3188_v7 = vpop.xlane.xlu0 %3187 }
 0xfee   :  { %v3195_v25 = vmul.f32 0.03125, %v3188_v7  ;;  %3219 = vadd.xlane.f32.xlu0 %v3211_v37  ;;  %v3212_v36 = vmul.f32 %v6798_v59, %v6798_v59 }
 0xfef   :  { %v3190_v10 = vpop.xlane.xlu1 %3189 }
 0xff0   :  { %v3201_v32 = vsub.f32 %v6763_v48, %v3195_v25  ;;  %v3196_v54 = vmul.f32 0.03125, %v3190_v10  ;;  %3221 = vadd.xlane.f32.xlu1 %v3212_v36 }
 0xff2   :  { %v3202_v2 = vsub.f32 %v6766_v5, %v3196_v54  ;;  %v6805_v3 = vmul.f32 %v5505_v46, %v3201_v32 }
 0xff4   :  { %v3213_v11 = vmul.f32 %v6805_v3, %v6805_v3  ;;  %v6810_v50 = vmul.f32 %v5505_v46, %v3202_v2 }
 0xff6   :  { %3223 = vadd.xlane.f32.xlu0 %v3213_v11  ;;  %v3214_v20 = vmul.f32 %v6810_v50, %v6810_v50 }
 0xff8   :  { %3225 = vadd.xlane.f32.xlu1 %v3214_v20  ;;  %v5017_v20 = vld [vmem:[%s7011_s11 + $0x50] sm:$0xff]  }
0x1073   :  { %v3216_v33 = vpop.xlane.xlu0 %3215 }
0x1074   :  { %v3227_v27 = vmul.f32 0.03125, %v3216_v33  ;;  %v4024_v33 = vld [vmem:[%s7012_s10 + $0x1] ss:$0 sm:$0xff] }
0x1075   :  { %v3218_v24 = vpop.xlane.xlu1 %3217 }
0x1076   :  { %v3233_v30 = vadd.f32 1e-06, %v3227_v27  ;;  %v3228_v55 = vmul.f32 0.03125, %v3218_v24 }
0x1078   :  { %5271 = vrsqrt.f32 %v3233_v30  ;;  %v3234_v22 = vadd.f32 1e-06, %v3228_v55 }
0x107a   :  { %5273 = vrsqrt.f32 %v3234_v22 }
0x107b   :  { %v3220_v40 = vpop.xlane.xlu0 %3219 }
0x107c   :  { %v3229_v52 = vmul.f32 0.03125, %v3220_v40 }
0x107d   :  { %v3222_v18 = vpop.xlane.xlu1 %3221 }
0x107e   :  { %v3235_v4 = vadd.f32 1e-06, %v3229_v52  ;;  %v3230_v53 = vmul.f32 0.03125, %v3222_v18 }
0x1080   :  { %5275 = vrsqrt.f32 %v3235_v4  ;;  %v3236_v42 = vadd.f32 1e-06, %v3230_v53 }
0x1082   :  { %v5272_v19 = vpop.eup %5271  ;;  %5277 = vrsqrt.f32 %v3236_v42 }
0x1083   :  { %v3245_v6 = vmul.f32 %v5272_v19, %v6781_v63  ;;  %v3224_v56 = vpop.xlane.xlu0 %3223 }
0x1084   :  { %v5274_v15 = vpop.eup %5273  ;;  %v3231_v43 = vmul.f32 0.03125, %v3224_v56 }
0x1085   :  { %v3255_v47 = vmul.f32 %v3254_v23, %v3245_v6  ;;  %v3246_v35 = vmul.f32 %v5274_v15, %v6786_v51  ;;  %v3226_v9 = vpop.xlane.xlu1 %3225 }
0x1086   :  { %v3237_v39 = vadd.f32 1e-06, %v3231_v43  ;;  %v3232_v17 = vmul.f32 0.03125, %v3226_v9 }
0x1087   :  { %v3256_v60 = vmul.f32 %v3254_v23, %v3246_v35  ;;  %v3265_v12 = vadd.f32 %v3264_v31, %v3255_v47 }
0x1088   :  { %5279 = vrsqrt.f32 %v3237_v39  ;;  %v3238_v26 = vadd.f32 1e-06, %v3232_v17 }
0x1089   :  { %v3266_v14 = vadd.f32 %v3264_v31, %v3256_v60 }
0x108a   :  { %v5276_v34 = vpop.eup %5275  ;;  %5281 = vrsqrt.f32 %v3238_v26 }
0x108b   :  { %v3271_v63 = vpack.c.bf16 %v3266_v14, %v3265_v12  ;;  %v3247_v62 = vmul.f32 %v5276_v34, %v6793_v38 }
0x108c   :  { %v5278_v58 = vpop.eup %5277 }
0x108d   :  { %4765 = vmatmul.mubr.bf16.vlgmr.msra.gmra.mrb[108].mxu1 %v3271_v63  ;;  %v3248_v51 = vmul.f32 %v5278_v58, %v6798_v59  ;;  %v3257_v37 = vmul.f32 %v3254_v23, %v3247_v62 }
0x108e   :  { %4768 = vmatprep.mubr.msk.bf16.mxu1 %vm5316_vm0, %v5315_v0 }
0x108f   :  { %v3258_v49 = vmul.f32 %v3254_v23, %v3248_v51  ;;  %v3267_v45 = vadd.f32 %v3264_v31, %v3257_v37 }
0x1091   :  { %v3268_v7 = vadd.f32 %v3264_v31, %v3258_v49 }
0x1092   :  { %v5280_v25 = vpop.eup %5279 }
0x1093   :  { %v3272_v36 = vpack.c.bf16 %v3268_v7, %v3267_v45  ;;  %v3249_v10 = vmul.f32 %v5280_v25, %v6805_v3  ;;  %v5015_v3 = vld [vmem:[%s7011_s11 + $0x40] sm:$0xff]  }
0x1094   :  { %v5282_v32 = vpop.eup %5281  ;;  %4777 = vmatpush3.bf16.msra.mxu0 %v5015_v3 }
0x1095   :  { %4769 = vmatmul.mubr.bf16.gmra.mrb[112].mxu1 %v3272_v36  ;;  %v3250_v54 = vmul.f32 %v5282_v32, %v6810_v50  ;;  %v3259_v38 = vmul.f32 %v3254_v23, %v3249_v10  ;;  %4778 = vmatprep.subr.bf16.mxu0 %v5315_v0  ;;  %v5016_v50 = vld [vmem:[%s7011_s11 + $0x48] sm:$0xff]  }
0x1096   :  { %4772 = vmatprep.mubr.msk.bf16.mxu1 %vm5316_vm0, %v5315_v0 }
0x1097   :  { %v3260_v59 = vmul.f32 %v3254_v23, %v3250_v54  ;;  %v3269_v2 = vadd.f32 %v3264_v31, %v3259_v38 }
0x1098   :  { %4779 = vmatpush3.bf16.msra.mxu0 %v5016_v50 }
0x1099   :  { %v3270_v11 = vadd.f32 %v3264_v31, %v3260_v59  ;;  %4780 = vmatprep.subr.bf16.mxu0 %v5315_v0 }
0x109b   :  { %v3273_v44 = vpack.c.bf16 %v3270_v11, %v3269_v2 }
0x109c   :  { %4781 = vmatpush3.bf16.msra.mxu0 %v5017_v20 }
0x109d   :  { %4773 = vmatmul.mubr.bf16.gmra.mrb[116].mxu1 %v3273_v44  ;;  %4782 = vmatprep.subr.bf16.mxu0 %v5315_v0 }
0x109e   :  { %4820 = vmatprep.mubr.msk.bf16.mxu1 %vm5316_vm0, %v5315_v0 }
0x10a0   :  { %4783 = vmatpush3.bf16.msra.mxu0 %v5018_v13 }
0x10a1   :  { %4784 = vmatprep.subr.bf16.mxu0 %v5315_v0 }
0x10a4   :  { %4785 = vmatpush3.bf16.msra.mxu0 %v5019_v16 }
0x10a5   :  { %4786 = vmatprep.subr.bf16.mxu0 %v5315_v0 }
0x10a8   :  { %4787 = vmatpush3.bf16.msra.mxu0 %v5020_v8 }
0x10a9   :  { %4788 = vmatprep.subr.bf16.mxu0 %v5315_v0 }
0x10ac   :  { %4789 = vmatpush3.bf16.msra.mxu0 %v5021_v57 }
0x10ad   :  { %4790 = vmatprep.subr.bf16.mxu0 %v5315_v0 }
0x10b0   :  { %4791 = vmatpush3.bf16.msra.mxu0 %v5022_v29 }
0x1160   :  { %v3381_v27 = vpop.f32.mrb[108].mxu1 }
0x1161   :  { %v3382_v24 = vadd.f32 %v4024_v33, %v3381_v27  ;;  %v4766_v30 = vpop.f32.mrb[109].mxu1 }
0x1162   :  { %v3384_v55 = vpop.f32.mrb[110].mxu1 }
0x1163   :  { %v3410_v22 = vmul.f32 0.044715, %v3382_v24  ;;  %v3385_v40 = vadd.f32 %v4024_v33, %v3384_v55  ;;  %v4767_v52 = vpop.f32.mrb[111].mxu1  ;;  %v3404_v50 = vmul.f32 0.5, %v3382_v24 }
0x1165   :  { %v3416_v18 = vmul.f32 %v3410_v22, %v3382_v24  ;;  %v3411_v4 = vmul.f32 0.044715, %v3385_v40  ;;  %v3405_v20 = vmul.f32 0.5, %v3385_v40 }
0x1167   :  { %v3422_v53 = vmul.f32 %v3416_v18, %v3382_v24  ;;  %v3417_v42 = vmul.f32 %v3411_v4, %v3385_v40 }
0x1168   :  { %v3389_v41 = vpop.f32.mrb[112].mxu1 }
0x1169   :  { %v3428_v23 = vadd.f32 %v3422_v53, %v3382_v24  ;;  %v3423_v19 = vmul.f32 %v3417_v42, %v3385_v40  ;;  %v3390_v6 = vadd.f32 %v4024_v33, %v3389_v41  ;;  %v4770_v56 = vpop.f32.mrb[113].mxu1 }
0x116a   :  { %v3392_v15 = vpop.f32.mrb[114].mxu1 }
0x116b   :  { %v3434_v43 = vmul.f32 0.7978846, %v3428_v23  ;;  %v3429_v47 = vadd.f32 %v3423_v19, %v3385_v40  ;;  %v3412_v35 = vmul.f32 0.044715, %v3390_v6  ;;  %v3393_v9 = vadd.f32 %v4024_v33, %v3392_v15  ;;  %v4771_v31 = vpop.f32.mrb[115].mxu1 }
0x116c   :  { %v3406_v52 = vmul.f32 0.5, %v3390_v6 }
0x116d   :  { %5283 = vtanh.f32 %v3434_v43  ;;  %v3435_v39 = vmul.f32 0.7978846, %v3429_v47  ;;  %v3418_v17 = vmul.f32 %v3412_v35, %v3390_v6  ;;  %v3413_v60 = vmul.f32 0.044715, %v3393_v9 }
0x116e   :  { %v3407_v18 = vmul.f32 0.5, %v3393_v9 }
0x116f   :  { %5285 = vtanh.f32 %v3435_v39  ;;  %v3424_v26 = vmul.f32 %v3418_v17, %v3390_v6  ;;  %v3419_v12 = vmul.f32 %v3413_v60, %v3393_v9 }
0x1170   :  { %v3397_v14 = vpop.f32.mrb[116].mxu1 }
0x1171   :  { %v3425_v34 = vmul.f32 %v3419_v12, %v3393_v9  ;;  %v3398_v63 = vadd.f32 %v4024_v33, %v3397_v14  ;;  %v4774_v62 = vpop.f32.mrb[117].mxu1  ;;  %v3430_v58 = vadd.f32 %v3424_v26, %v3390_v6  ;;  %v4050_v6 = vld [vmem:[%s7013_s12 + $0x1] ss:$0 sm:$0xff] }
0x1172   :  { %v3400_v51 = vpop.f32.mrb[118].mxu1 }
0x1173   :  { %v3414_v37 = vmul.f32 0.044715, %v3398_v63  ;;  %v3401_v49 = vadd.f32 %v4024_v33, %v3400_v51  ;;  %v4775_v45 = vpop.f32.mrb[119].mxu1  ;;  %v3431_v7 = vadd.f32 %v3425_v34, %v3393_v9  ;;  %v3436_v25 = vmul.f32 0.7978846, %v3430_v58 }
0x1174   :  { %v3408_v19 = vmul.f32 0.5, %v3398_v63 }
0x1175   :  { %v3420_v36 = vmul.f32 %v3414_v37, %v3398_v63  ;;  %v3415_v10 = vmul.f32 0.044715, %v3401_v49  ;;  %v3437_v32 = vmul.f32 0.7978846, %v3431_v7  ;;  %5287 = vtanh.f32 %v3436_v25 }
0x1176   :  { %v3409_v56 = vmul.f32 0.5, %v3401_v49 }
0x1177   :  { %v5284_v54 = vpop.eup %5283  ;;  %v3426_v38 = vmul.f32 %v3420_v36, %v3398_v63  ;;  %v3421_v59 = vmul.f32 %v3415_v10, %v3401_v49  ;;  %5289 = vtanh.f32 %v3437_v32 }
0x1178   :  { %v3446_v2 = vadd.f32 1.0, %v5284_v54 }
0x1179   :  { %v5286_v11 = vpop.eup %5285  ;;  %v3427_v44 = vmul.f32 %v3421_v59, %v3401_v49  ;;  %v3432_v3 = vadd.f32 %v3426_v38, %v3398_v63 }
0x117a   :  { %v3447_v13 = vadd.f32 1.0, %v5286_v11  ;;  %v3452_v57 = vmul.f32 %v3446_v2, %v3404_v50 }
0x117b   :  { %v3433_v16 = vadd.f32 %v3427_v44, %v3401_v49  ;;  %v3438_v8 = vmul.f32 0.7978846, %v3432_v3 }
0x117c   :  { %v3453_v29 = vmul.f32 %v3447_v13, %v3405_v20 }
0x117d   :  { %v3439_v33 = vmul.f32 0.7978846, %v3433_v16  ;;  %5291 = vtanh.f32 %v3438_v8 }
0x117e   :  { %v3458_v27 = vpack.c.bf16 %v3453_v29, %v3452_v57 }
0x117f   :  { %v5288_v30 = vpop.eup %5287  ;;  %5293 = vtanh.f32 %v3439_v33 }
0x1180   :  { %4793 = vmatmul.mubr.bf16.vlgmr.msra.gmra.mrb[120].mxu0 %v3458_v27  ;;  %v3448_v55 = vadd.f32 1.0, %v5288_v30 }
0x1181   :  { %v5290_v22 = vpop.eup %5289  ;;  %4796 = vmatprep.mubr.msk.bf16.mxu0 %vm5316_vm0, %v5315_v0 }
0x1182   :  { %v3449_v24 = vadd.f32 1.0, %v5290_v22  ;;  %v3454_v40 = vmul.f32 %v3448_v55, %v3406_v52 }
0x1184   :  { %v3455_v4 = vmul.f32 %v3449_v24, %v3407_v18 }
0x1186   :  { %v3459_v53 = vpack.c.bf16 %v3455_v4, %v3454_v40 }
0x1187   :  { %v5292_v42 = vpop.eup %5291 }
0x1188   :  { %4797 = vmatmul.mubr.bf16.gmra.mrb[124].mxu0 %v3459_v53  ;;  %v3450_v41 = vadd.f32 1.0, %v5292_v42 }
0x1189   :  { %v5294_v23 = vpop.eup %5293  ;;  %4800 = vmatprep.mubr.msk.bf16.mxu0 %vm5316_vm0, %v5315_v0 }
0x118a   :  { %v3451_v15 = vadd.f32 1.0, %v5294_v23  ;;  %v3456_v43 = vmul.f32 %v3450_v41, %v3408_v19  ;;  %v5025_v19 = vld [vmem:[%s7014_s15 + $0x10] sm:$0xff]  }
0x118c   :  { %v3457_v47 = vmul.f32 %v3451_v15, %v3409_v56  ;;  %v5027_v15 = vld [vmem:[%s7014_s15 + $0x20] sm:$0xff]  }
0x118e   :  { %v3460_v35 = vpack.c.bf16 %v3457_v47, %v3456_v43  ;;  %v5028_v43 = vld [vmem:[%s7014_s15 + $0x28] sm:$0xff]   ;;  %v5029_v47 = vld [vmem:[%s7014_s15 + $0x30] sm:$0xff]  }
0x1190   :  { %4801 = vmatmul.mubr.bf16.gmra.mrb[128].mxu0 %v3460_v35  ;;  %v5030_v35 = vld [vmem:[%s7014_s15 + $0x38] sm:$0xff]  }
0x1253   :  { %v3568_v9 = vpop.f32.mrb[120].mxu0 }
0x1254   :  { %v3569_v31 = vadd.f32 %v4050_v6, %v3568_v9  ;;  %v4794_v39 = vpop.f32.mrb[121].mxu0 }
0x1255   :  { %v3571_v17 = vpop.f32.mrb[122].mxu0 }
0x1256   :  { %v3572_v60 = vadd.f32 %v4050_v6, %v3571_v17  ;;  %v4795_v26 = vpop.f32.mrb[123].mxu0  ;;  %v3591_v12 = vadd.f32 %v3569_v31, %v6747_v28 }
0x1258   :  { %3599 = vadd.xlane.f32.xlu0 %v3591_v12  ;;  %v3592_v14 = vadd.f32 %v3572_v60, %v6750_v61 }
0x125a   :  { %3601 = vadd.xlane.f32.xlu1 %v3592_v14 }
0x125b   :  { %v3576_v34 = vpop.f32.mrb[124].mxu0 }
0x125c   :  { %v3577_v63 = vadd.f32 %v4050_v6, %v3576_v34  ;;  %v4798_v62 = vpop.f32.mrb[125].mxu0 }
0x125d   :  { %v3579_v58 = vpop.f32.mrb[126].mxu0 }
0x125e   :  { %v3593_v51 = vadd.f32 %v3577_v63, %v6755_v1  ;;  %v3580_v37 = vadd.f32 %v4050_v6, %v3579_v58  ;;  %v4799_v49 = vpop.f32.mrb[127].mxu0  ;;  %v5023_v1 = vld [vmem:[%s7014_s15] sm:$0xff]  }
0x125f   :  { %4805 = vmatpush3.bf16.msra.mxu1 %v5023_v1 }
0x1260   :  { %v3594_v45 = vadd.f32 %v3580_v37, %v6758_v21  ;;  %3603 = vadd.xlane.f32.xlu0 %v3593_v51  ;;  %v5024_v21 = vld [vmem:[%s7014_s15 + $0x8] sm:$0xff]   ;;  %4806 = vmatprep.subr.bf16.mxu1 %v5315_v0 }
0x1262   :  { %3605 = vadd.xlane.f32.xlu1 %v3594_v45 }
0x1263   :  { %v3584_v7 = vpop.f32.mrb[128].mxu0  ;;  %4807 = vmatpush3.bf16.msra.mxu1 %v5024_v21 }
0x1264   :  { %v3585_v25 = vadd.f32 %v4050_v6, %v3584_v7  ;;  %v4802_v36 = vpop.f32.mrb[129].mxu0  ;;  %4808 = vmatprep.subr.bf16.mxu1 %v5315_v0 }
0x1265   :  { %v3587_v28 = vpop.f32.mrb[130].mxu0 }
0x1266   :  { %v3595_v10 = vadd.f32 %v3585_v25, %v6763_v48  ;;  %v3588_v61 = vadd.f32 %v4050_v6, %v3587_v28  ;;  %v4803_v32 = vpop.f32.mrb[131].mxu0 }
0x1267   :  { %4809 = vmatpush3.bf16.msra.mxu1 %v5025_v19  ;;  %v4060_v32 = vld [vmem:[%s7016_s14] ss:$0 sm:$0xff] }
0x1268   :  { %v3596_v54 = vadd.f32 %v3588_v61, %v6766_v5  ;;  %3607 = vadd.xlane.f32.xlu0 %v3595_v10  ;;  %4810 = vmatprep.subr.bf16.mxu1 %v5315_v0 }
0x126a   :  { %3609 = vadd.xlane.f32.xlu1 %v3596_v54 }
0x12e5   :  { %v3600_v48 = vpop.xlane.xlu0 %3599 }
0x12e6   :  { %v3611_v38 = vmul.f32 0.03125, %v3600_v48 }
0x12e7   :  { %v3602_v59 = vpop.xlane.xlu1 %3601 }
0x12e8   :  { %v3617_v5 = vsub.f32 %v3591_v12, %v3611_v38  ;;  %v3612_v2 = vmul.f32 0.03125, %v3602_v59 }
0x12ea   :  { %v6912_v11 = vmul.f32 %v5505_v46, %v3617_v5  ;;  %v3618_v44 = vsub.f32 %v3592_v14, %v3612_v2 }
0x12ec   :  { %v6915_v3 = vmul.f32 %v5505_v46, %v3618_v44  ;;  %v3629_v50 = vmul.f32 %v6912_v11, %v6912_v11 }
0x12ed   :  { %v3604_v20 = vpop.xlane.xlu0 %3603 }
0x12ee   :  { %v3613_v13 = vmul.f32 0.03125, %v3604_v20  ;;  %3635 = vadd.xlane.f32.xlu0 %v3629_v50  ;;  %v3630_v16 = vmul.f32 %v6915_v3, %v6915_v3 }
0x12ef   :  { %v3606_v8 = vpop.xlane.xlu1 %3605 }
0x12f0   :  { %v3619_v57 = vsub.f32 %v3593_v51, %v3613_v13  ;;  %v3614_v29 = vmul.f32 0.03125, %v3606_v8  ;;  %3637 = vadd.xlane.f32.xlu1 %v3630_v16  ;;  %v4059_v51 = vld [vmem:[%s7015_s13] ss:$0 sm:$0xff] }
0x12f2   :  { %v6922_v33 = vmul.f32 %v5505_v46, %v3619_v57  ;;  %v3620_v27 = vsub.f32 %v3594_v45, %v3614_v29 }
0x12f4   :  { %v6925_v30 = vmul.f32 %v5505_v46, %v3620_v27  ;;  %v3631_v55 = vmul.f32 %v6922_v33, %v6922_v33 }
0x12f5   :  { %v3608_v22 = vpop.xlane.xlu0 %3607 }
0x12f6   :  { %v3615_v52 = vmul.f32 0.03125, %v3608_v22  ;;  %3639 = vadd.xlane.f32.xlu0 %v3631_v55  ;;  %v3632_v18 = vmul.f32 %v6925_v30, %v6925_v30 }
0x12f7   :  { %v3610_v24 = vpop.xlane.xlu1 %3609 }
0x12f8   :  { %v3621_v40 = vsub.f32 %v3595_v10, %v3615_v52  ;;  %v3616_v4 = vmul.f32 0.03125, %v3610_v24  ;;  %3641 = vadd.xlane.f32.xlu1 %v3632_v18  ;;  %v4061_v52 = vld [vmem:[%s7017_s16] ss:$0 sm:$0xff] }
0x12fa   :  { %v6932_v53 = vmul.f32 %v5505_v46, %v3621_v40  ;;  %v3622_v42 = vsub.f32 %v3596_v54, %v3616_v4 }
0x12fc   :  { %v6935_v41 = vmul.f32 %v5505_v46, %v3622_v42  ;;  %v3633_v23 = vmul.f32 %v6932_v53, %v6932_v53  ;;  %v5026_v46 = vld [vmem:[%s7014_s15 + $0x18] sm:$0xff]  }
0x12fd   :  { %4811 = vmatpush3.bf16.msra.mxu1 %v5026_v46 }
0x12fe   :  { %3643 = vadd.xlane.f32.xlu0 %v3633_v23  ;;  %v3634_v56 = vmul.f32 %v6935_v41, %v6935_v41  ;;  %4812 = vmatprep.subr.bf16.mxu1 %v5315_v0 }
0x1300   :  { %3645 = vadd.xlane.f32.xlu1 %v3634_v56 }
0x1301   :  { %4813 = vmatpush3.bf16.msra.mxu1 %v5027_v15 }
0x1302   :  { %4814 = vmatprep.subr.bf16.mxu1 %v5315_v0 }
0x1305   :  { %4815 = vmatpush3.bf16.msra.mxu1 %v5028_v43 }
0x1306   :  { %4816 = vmatprep.subr.bf16.mxu1 %v5315_v0 }
0x1309   :  { %4817 = vmatpush3.bf16.msra.mxu1 %v5029_v47 }
0x130a   :  { %4818 = vmatprep.subr.bf16.mxu1 %v5315_v0 }
0x130d   :  { %4819 = vmatpush3.bf16.msra.mxu1 %v5030_v35 }
0x137b   :  { %v3636_v6 = vpop.xlane.xlu0 %3635 }
0x137c   :  { %v3647_v9 = vmul.f32 0.03125, %v3636_v6 }
0x137d   :  { %v3638_v31 = vpop.xlane.xlu1 %3637 }
0x137e   :  { %v3653_v39 = vadd.f32 1e-06, %v3647_v9  ;;  %v3648_v17 = vmul.f32 0.03125, %v3638_v31 }
0x1380   :  { %5295 = vrsqrt.f32 %v3653_v39  ;;  %v3654_v60 = vadd.f32 1e-06, %v3648_v17 }
0x1382   :  { %5297 = vrsqrt.f32 %v3654_v60 }
0x1383   :  { %v3640_v26 = vpop.xlane.xlu0 %3639 }
0x1384   :  { %v3649_v12 = vmul.f32 0.03125, %v3640_v26 }
0x1385   :  { %v3642_v14 = vpop.xlane.xlu1 %3641 }
0x1386   :  { %v3655_v34 = vadd.f32 1e-06, %v3649_v12  ;;  %v3650_v63 = vmul.f32 0.03125, %v3642_v14 }
0x1388   :  { %5299 = vrsqrt.f32 %v3655_v34  ;;  %v3656_v62 = vadd.f32 1e-06, %v3650_v63 }
0x138a   :  { %v5296_v58 = vpop.eup %5295  ;;  %5301 = vrsqrt.f32 %v3656_v62 }
0x138b   :  { %v3665_v37 = vmul.f32 %v5296_v58, %v6912_v11  ;;  %v3644_v49 = vpop.xlane.xlu0 %3643 }
0x138c   :  { %v5298_v45 = vpop.eup %5297  ;;  %v3651_v7 = vmul.f32 0.03125, %v3644_v49 }
0x138d   :  { %v3677_v25 = vmul.f32 %v4059_v51, %v3665_v37  ;;  %v3666_v36 = vmul.f32 %v5298_v45, %v6915_v3  ;;  %v3646_v28 = vpop.xlane.xlu1 %3645 }
0x138e   :  { %v3657_v10 = vadd.f32 1e-06, %v3651_v7  ;;  %v3652_v61 = vmul.f32 0.03125, %v3646_v28 }
0x138f   :  { %v3678_v54 = vmul.f32 %v4059_v51, %v3666_v36  ;;  %v3689_v21 = vadd.f32 %v4060_v32, %v3677_v25 }
0x1390   :  { %5303 = vrsqrt.f32 %v3657_v10  ;;  %v3658_v1 = vadd.f32 1e-06, %v3652_v61 }
0x1391   :  { %v3690_v48 = vadd.f32 %v4060_v32, %v3678_v54 }
0x1392   :  { %v5300_v38 = vpop.eup %5299  ;;  %5305 = vrsqrt.f32 %v3658_v1 }
0x1393   :  { %v3695_v59 = vpack.c.bf16 %v3690_v48, %v3689_v21  ;;  %v3667_v5 = vmul.f32 %v5300_v38, %v6922_v33 }
0x1394   :  { %v5302_v2 = vpop.eup %5301 }
0x1395   :  { %4821 = vmatmul.mubr.bf16.vlgmr.msra.gmra.mrb[120].mxu1 %v3695_v59  ;;  %v3668_v11 = vmul.f32 %v5302_v2, %v6925_v30  ;;  %v3679_v44 = vmul.f32 %v4059_v51, %v3667_v5 }
0x1396   :  { %4824 = vmatprep.mubr.msk.bf16.mxu1 %vm5316_vm0, %v5315_v0 }
0x1397   :  { %v3680_v3 = vmul.f32 %v4059_v51, %v3668_v11  ;;  %v3691_v50 = vadd.f32 %v4060_v32, %v3679_v44 }
0x1399   :  { %v3692_v20 = vadd.f32 %v4060_v32, %v3680_v3 }
0x139a   :  { %v5304_v13 = vpop.eup %5303 }
0x139b   :  { %v3696_v16 = vpack.c.bf16 %v3692_v20, %v3691_v50  ;;  %v3669_v8 = vmul.f32 %v5304_v13, %v6932_v53 }
0x139c   :  { %v5306_v57 = vpop.eup %5305 }
0x139d   :  { %4825 = vmatmul.mubr.bf16.gmra.mrb[124].mxu1 %v3696_v16  ;;  %v3670_v29 = vmul.f32 %v5306_v57, %v6935_v41  ;;  %v3681_v33 = vmul.f32 %v4059_v51, %v3669_v8 }
0x139e   :  { %4828 = vmatprep.mubr.msk.bf16.mxu1 %vm5316_vm0, %v5315_v0 }
0x139f   :  { %v3682_v27 = vmul.f32 %v4059_v51, %v3670_v29  ;;  %v3693_v30 = vadd.f32 %v4060_v32, %v3681_v33 }
0x13a1   :  { %v3694_v55 = vadd.f32 %v4060_v32, %v3682_v27 }
0x13a3   :  { %v3697_v22 = vpack.c.bf16 %v3694_v55, %v3693_v30 }
0x13a5   :  { %4829 = vmatmul.mubr.bf16.gmra.mrb[128].mxu1 %v3697_v22 }
0x1468   :  { %v3803_v18 = vpop.f32.mrb[120].mxu1 }
0x1469   :  { %v3804_v24 = vadd.f32 %v4061_v52, %v3803_v18  ;;  %v4822_v40 = vpop.f32.mrb[121].mxu1 }
0x146a   :  { %v3806_v4 = vpop.f32.mrb[122].mxu1 }
0x146b   :  { %3826 = vst [vmem:[%s7018_s17] sm:$0xff] %v3804_v24  ;;  %v3807_v53 = vadd.f32 %v4061_v52, %v3806_v4  ;;  %v4823_v42 = vpop.f32.mrb[123].mxu1 }
0x146d   :  { %3827 = vst [vmem:[%s7018_s17 + $0x8] sm:$0xff] %v3807_v53 }
0x1470   :  { %v3811_v0 = vpop.f32.mrb[124].mxu1 }
0x1471   :  { %v3812_v41 = vadd.f32 %v4061_v52, %v3811_v0  ;;  %v4826_v23 = vpop.f32.mrb[125].mxu1 }
0x1472   :  { %v3814_v19 = vpop.f32.mrb[126].mxu1 }
0x1473   :  { %3828 = vst [vmem:[%s7018_s17 + $0x10] sm:$0xff] %v3812_v41  ;;  %v3815_v56 = vadd.f32 %v4061_v52, %v3814_v19  ;;  %v4827_v46 = vpop.f32.mrb[127].mxu1 }
0x1475   :  { %3829 = vst [vmem:[%s7018_s17 + $0x18] sm:$0xff] %v3815_v56 }
0x1478   :  { %v3819_v15 = vpop.f32.mrb[128].mxu1 }
0x1479   :  { %v3820_v43 = vadd.f32 %v4061_v52, %v3819_v15  ;;  %v4830_v47 = vpop.f32.mrb[129].mxu1 }
0x147a   :  { %v3822_v35 = vpop.f32.mrb[130].mxu1 }
0x147b   :  { %3830 = vst [vmem:[%s7018_s17 + $0x20] sm:$0xff] %v3820_v43  ;;  %v3823_v6 = vadd.f32 %v4061_v52, %v3822_v35  ;;  %v4831_v9 = vpop.f32.mrb[131].mxu1 }
0x147d   :  { %3831 = vst [vmem:[%s7018_s17 + $0x28] sm:$0xff] %v3823_v6 }

</bundles_post_ra>
